<compile_context>
chip_gen: v7x
topology: tpu7x:2x2x1
jax: 0.10.0
libtpu: 0.0.40
codegen_flags: <defaults>
</compile_context>

<pallas_src>
import functools

import jax
import jax.numpy as jnp
from jax.experimental import pallas as pl
from jax.experimental.pallas import tpu as pltpu

_EPS = 1e-5
_MXU_DTYPE = jnp.bfloat16          # set to jnp.float32 for bit-closer parity
_VMEM_LIMIT = 32 * 1024 * 1024     # explicit scoped-VMEM budget (v5e/v6e/v7x safe)


def _cparams(dimension_semantics):
    return pltpu.CompilerParams(dimension_semantics=dimension_semantics,
                                vmem_limit_bytes=_VMEM_LIMIT)


def _row_tile(m, target):
    """Largest multiple-of-8 divisor of m that is <= target (else m itself)."""
    if m <= target:
        return m
    t = (target // 8) * 8
    while t >= 8:
        if m % t == 0:
            return t
        t -= 8
    return m


# ---------------------------------------------------------------------------
# Kernels
# ---------------------------------------------------------------------------
def _conv1x1_stats_kernel(x_ref, w_ref, y_ref, sum_ref, sq_ref):
    """1x1 conv (matmul) on an M-tile + per-channel sum/sumsq accumulation."""
    @pl.when(pl.program_id(0) == 0)
    def _init():
        sum_ref[...] = jnp.zeros_like(sum_ref)
        sq_ref[...] = jnp.zeros_like(sq_ref)

    y = jnp.dot(x_ref[...].astype(_MXU_DTYPE), w_ref[...],
                preferred_element_type=jnp.float32)
    y_ref[...] = y
    sum_ref[...] += jnp.sum(y, axis=0, keepdims=True)
    sq_ref[...] += jnp.sum(y * y, axis=0, keepdims=True)


def _bn_relu_conv1x1_stats_kernel(x_ref, s_ref, b_ref, w_ref,
                                  y_ref, sum_ref, sq_ref):
    """Fused BN-apply + ReLU + 1x1 conv + next-BN stats, on an M-tile."""
    @pl.when(pl.program_id(0) == 0)
    def _init():
        sum_ref[...] = jnp.zeros_like(sum_ref)
        sq_ref[...] = jnp.zeros_like(sq_ref)

    a = jnp.maximum(x_ref[...] * s_ref[...] + b_ref[...], 0.0)
    y = jnp.dot(a.astype(_MXU_DTYPE), w_ref[...],
                preferred_element_type=jnp.float32)
    y_ref[...] = y
    sum_ref[...] += jnp.sum(y, axis=0, keepdims=True)
    sq_ref[...] += jnp.sum(y * y, axis=0, keepdims=True)


def _bn_relu_conv3x3_stats_kernel(x_ref, s_ref, b_ref, w_ref,
                                  y_ref, sum_ref, sq_ref,
                                  xpad_ref, acc_ref,
                                  *, hout, wout, stride):
    """One image per grid step:
       BN-apply + ReLU (fused) -> zero-pad into VMEM scratch -> 9 tap matmuls
       into a VMEM f32 accumulator -> write conv output + accumulate BN stats."""
    @pl.when(pl.program_id(0) == 0)
    def _init():
        sum_ref[...] = jnp.zeros_like(sum_ref)
        sq_ref[...] = jnp.zeros_like(sq_ref)

    h, w, c = x_ref.shape[1], x_ref.shape[2], x_ref.shape[3]
    cout = w_ref.shape[-1]

    # Fused BN1-apply + ReLU on the raw conv1 output tile.
    a = jnp.maximum(x_ref[0] * s_ref[...] + b_ref[...], 0.0)

    # Zero padding (pad=1) built in the value domain, then staged in VMEM.
    zrow = jnp.zeros((1, w, c), a.dtype)
    zcol = jnp.zeros((h + 2, 1, c), a.dtype)
    ap = jnp.concatenate([zrow, a, zrow], axis=0)
    ap = jnp.concatenate([zcol, ap, zcol], axis=1)
    xpad_ref[...] = ap

    # 3x3 conv as 9 shifted matmuls, accumulated in a VMEM f32 scratch.
    acc_ref[...] = jnp.zeros_like(acc_ref)
    for kh in range(3):
        for kw in range(3):
            if stride == 1:
                tap = xpad_ref[kh:kh + hout, kw:kw + wout, :]
            else:
                # TODO(synk): for stride=2, striding at the DMA level (strided
                # index_map) would halve VMEM/XLU traffic vs this in-kernel
                # strided read.
                tap = xpad_ref[pl.ds(kh, hout, stride),
                               pl.ds(kw, wout, stride), :]
            acc_ref[...] += jnp.dot(
                tap.reshape(hout * wout, c).astype(_MXU_DTYPE),
                w_ref[kh, kw],
                preferred_element_type=jnp.float32)

    y = acc_ref[...]
    y_ref[...] = y.reshape(1, hout, wout, cout).astype(y_ref.dtype)
    sum_ref[...] += jnp.sum(y, axis=0, keepdims=True)
    sq_ref[...] += jnp.sum(y * y, axis=0, keepdims=True)


def _bn_add_relu_kernel(x_ref, s_ref, b_ref, id_ref, o_ref):
    """Fused BN3-apply + residual add + ReLU, on an M-tile."""
    y = x_ref[...] * s_ref[...] + b_ref[...] + id_ref[...]
    o_ref[...] = jnp.maximum(y, 0.0).astype(o_ref.dtype)


# ---------------------------------------------------------------------------
# pallas_call wrappers
# ---------------------------------------------------------------------------
def conv1x1_stats(x2d, w, *, row_tile):
    m, cin = x2d.shape
    cout = w.shape[1]
    tm = _row_tile(m, row_tile)
    return pl.pallas_call(
        _conv1x1_stats_kernel,
        out_shape=(jax.ShapeDtypeStruct((m, cout), jnp.float32),
                   jax.ShapeDtypeStruct((1, cout), jnp.float32),
                   jax.ShapeDtypeStruct((1, cout), jnp.float32)),
        grid=(m // tm,),
        in_specs=[pl.BlockSpec((tm, cin), lambda i: (i, 0)),
                  pl.BlockSpec((cin, cout), lambda i: (0, 0))],   # resident
        out_specs=(pl.BlockSpec((tm, cout), lambda i: (i, 0)),
                   pl.BlockSpec((1, cout), lambda i: (0, 0)),     # accumulator
                   pl.BlockSpec((1, cout), lambda i: (0, 0))),
        compiler_params=_cparams(("arbitrary",)),
    )(x2d, w)


def bn_relu_conv1x1_stats(x2d, scale, shift, w, *, row_tile):
    m, cin = x2d.shape
    cout = w.shape[1]
    tm = _row_tile(m, row_tile)
    return pl.pallas_call(
        _bn_relu_conv1x1_stats_kernel,
        out_shape=(jax.ShapeDtypeStruct((m, cout), jnp.float32),
                   jax.ShapeDtypeStruct((1, cout), jnp.float32),
                   jax.ShapeDtypeStruct((1, cout), jnp.float32)),
        grid=(m // tm,),
        in_specs=[pl.BlockSpec((tm, cin), lambda i: (i, 0)),
                  pl.BlockSpec((1, cin), lambda i: (0, 0)),
                  pl.BlockSpec((1, cin), lambda i: (0, 0)),
                  pl.BlockSpec((cin, cout), lambda i: (0, 0))],
        out_specs=(pl.BlockSpec((tm, cout), lambda i: (i, 0)),
                   pl.BlockSpec((1, cout), lambda i: (0, 0)),
                   pl.BlockSpec((1, cout), lambda i: (0, 0))),
        compiler_params=_cparams(("arbitrary",)),
    )(x2d, scale, shift, w)


def bn_relu_conv3x3_stats(y1_nhwc, scale, shift, w2, stride):
    n, h, w, c = y1_nhwc.shape
    cout = w2.shape[-1]
    hout = (h + 2 - 3) // stride + 1
    wout = (w + 2 - 3) // stride + 1
    kern = functools.partial(_bn_relu_conv3x3_stats_kernel,
                             hout=hout, wout=wout, stride=stride)
    return pl.pallas_call(
        kern,
        out_shape=(jax.ShapeDtypeStruct((n, hout, wout, cout), jnp.float32),
                   jax.ShapeDtypeStruct((1, cout), jnp.float32),
                   jax.ShapeDtypeStruct((1, cout), jnp.float32)),
        grid=(n,),
        in_specs=[pl.BlockSpec((1, h, w, c), lambda i: (i, 0, 0, 0)),
                  pl.BlockSpec((1, c), lambda i: (0, 0)),
                  pl.BlockSpec((1, c), lambda i: (0, 0)),
                  pl.BlockSpec((3, 3, c, cout), lambda i: (0, 0, 0, 0))],
        out_specs=(pl.BlockSpec((1, hout, wout, cout), lambda i: (i, 0, 0, 0)),
                   pl.BlockSpec((1, cout), lambda i: (0, 0)),
                   pl.BlockSpec((1, cout), lambda i: (0, 0))),
        scratch_shapes=[pltpu.VMEM((h + 2, w + 2, c), jnp.float32),
                        pltpu.VMEM((hout * wout, cout), jnp.float32)],
        compiler_params=_cparams(("arbitrary",)),
    )(y1_nhwc, scale, shift, w2)


def bn_add_relu(y2d, scale, shift, identity2d, *, row_tile):
    m, c = y2d.shape
    tm = _row_tile(m, row_tile)
    return pl.pallas_call(
        _bn_add_relu_kernel,
        out_shape=jax.ShapeDtypeStruct((m, c), identity2d.dtype),
        grid=(m // tm,),
        in_specs=[pl.BlockSpec((tm, c), lambda i: (i, 0)),
                  pl.BlockSpec((1, c), lambda i: (0, 0)),
                  pl.BlockSpec((1, c), lambda i: (0, 0)),
                  pl.BlockSpec((tm, c), lambda i: (i, 0))],
        out_specs=pl.BlockSpec((tm, c), lambda i: (i, 0)),
        compiler_params=_cparams(("parallel",)),   # no carries: dual-TC OK
    )(y2d, scale, shift, identity2d)


# ---------------------------------------------------------------------------
# BN stats -> scale/shift (tiny JAX glue between kernels)
# ---------------------------------------------------------------------------
def _bn_scale_shift(s, sq, count, gamma, beta):
    mean = s / count
    var = jnp.maximum(sq / count - mean * mean, 0.0)   # biased var (training BN)
    inv = jax.lax.rsqrt(var + _EPS)
    scale = gamma[None, :] * inv
    shift = beta[None, :] - mean * scale
    return scale, shift


# ---------------------------------------------------------------------------
# Block forward
# ---------------------------------------------------------------------------
def block_forward(x_nchw, p, stride=1, row_tile=512):
    n, cin, h, w = x_nchw.shape
    x = jnp.transpose(x_nchw, (0, 2, 3, 1))            # NCHW -> NHWC
    m = n * h * w
    x2d = x.reshape(m, cin)

    c1 = p["w1"].shape[0]
    cout = p["w3"].shape[0]

    # TODO(synk): identity_downsample submodule is None in this configuration;
    # the residual is a plain passthrough (requires stride==1, cin==4*c1 — the
    # same constraint the PyTorch module has when identity_downsample is None).
    if stride != 1 or cin != cout:
        raise NotImplementedError(
            "identity_downsample=None requires stride=1 and "
            "in_channels == 4 * intermediate_channels")

    # Weights: PyTorch (Cout, Cin, kh, kw) -> matmul layouts, cast to MXU dtype.
    w1 = jnp.transpose(p["w1"][:, :, 0, 0], (1, 0)).astype(_MXU_DTYPE)  # (Cin, C1)
    w2 = jnp.transpose(p["w2"], (2, 3, 1, 0)).astype(_MXU_DTYPE)        # (3,3,C1,C1)
    w3 = jnp.transpose(p["w3"][:, :, 0, 0], (1, 0)).astype(_MXU_DTYPE)  # (C1, Cout)
    # NOTE: conv biases (b1/b2/b3) are exact no-ops under training-mode BN
    # (the per-channel mean removes them) and are intentionally not loaded.

    # conv1 (1x1) + BN1 batch stats
    y1, s1, q1 = conv1x1_stats(x2d, w1, row_tile=row_tile)
    sc1, sh1 = _bn_scale_shift(s1, q1, m, p["g1"], p["be1"])

    # conv2 (3x3, stride, pad=1) with fused BN1-apply + ReLU, BN2 batch stats
    y2, s2, q2 = bn_relu_conv3x3_stats(y1.reshape(n, h, w, c1), sc1, sh1, w2, stride)
    n2, h2, w2s, _ = y2.shape
    m2 = n2 * h2 * w2s
    sc2, sh2 = _bn_scale_shift(s2, q2, m2, p["g2"], p["be2"])

    # conv3 (1x1, expansion=4) with fused BN2-apply + ReLU, BN3 batch stats
    y3, s3, q3 = bn_relu_conv1x1_stats(y2.reshape(m2, c1), sc2, sh2, w3,
                                       row_tile=row_tile)
    sc3, sh3 = _bn_scale_shift(s3, q3, m2, p["g3"], p["be3"])

    # BN3-apply + residual add + ReLU
    out2d = bn_add_relu(y3, sc3, sh3, x2d, row_tile=row_tile)
    out = out2d.reshape(n2, h2, w2s, cout)
    return jnp.transpose(out, (0, 3, 1, 2))             # NHWC -> NCHW


# ---------------------------------------------------------------------------
# Pure-JAX reference (PyTorch semantics, f32) for correctness checking
# ---------------------------------------------------------------------------
def _reference_block(x_nchw, p, stride=1):
    x = jnp.transpose(x_nchw, (0, 2, 3, 1))

    def conv1x1(a, w, b):
        return jnp.einsum("nhwc,oc->nhwo", a, w[:, :, 0, 0]) + b

    def conv3x3(a, w, b, s):
        return jax.lax.conv_general_dilated(
            a, jnp.transpose(w, (2, 3, 1, 0)), (s, s), ((1, 1), (1, 1)),
            dimension_numbers=("NHWC", "HWIO", "NHWC")) + b

    def bn(a, g, be):
        mean = jnp.mean(a, axis=(0, 1, 2), keepdims=True)
        var = jnp.mean((a - mean) ** 2, axis=(0, 1, 2), keepdims=True)
        return (a - mean) * jax.lax.rsqrt(var + _EPS) * g + be

    identity = x
    a = jax.nn.relu(bn(conv1x1(x, p["w1"], p["b1"]), p["g1"], p["be1"]))
    a = jax.nn.relu(bn(conv3x3(a, p["w2"], p["b2"], stride), p["g2"], p["be2"]))
    a = bn(conv1x1(a, p["w3"], p["b3"]), p["g3"], p["be3"])
    a = jax.nn.relu(a + identity)
    return jnp.transpose(a, (0, 3, 1, 2))


# ---------------------------------------------------------------------------
# Deterministic parameter construction (PyTorch weight layouts)
# ---------------------------------------------------------------------------
def make_params(key, in_channels, intermediate_channels, expansion=4):
    cmid = intermediate_channels
    cout = cmid * expansion
    ks = jax.random.split(key, 12)
    f32 = jnp.float32
    return {
        "w1": 0.1 * jax.random.normal(ks[0], (cmid, in_channels, 1, 1), f32),
        "b1": 0.1 * jax.random.normal(ks[1], (cmid,), f32),
        "w2": 0.1 * jax.random.normal(ks[2], (cmid, cmid, 3, 3), f32),
        "b2": 0.1 * jax.random.normal(ks[3], (cmid,), f32),
        "w3": 0.1 * jax.random.normal(ks[4], (cout, cmid, 1, 1), f32),
        "b3": 0.1 * jax.random.normal(ks[5], (cout,), f32),
        "g1": 1.0 + 0.1 * jax.random.normal(ks[6], (cmid,), f32),
        "be1": 0.1 * jax.random.normal(ks[7], (cmid,), f32),
        "g2": 1.0 + 0.1 * jax.random.normal(ks[8], (cmid,), f32),
        "be2": 0.1 * jax.random.normal(ks[9], (cmid,), f32),
        "g3": 1.0 + 0.1 * jax.random.normal(ks[10], (cout,), f32),
        "be3": 0.1 * jax.random.normal(ks[11], (cout,), f32),
    }


if __name__ == "__main__":
    key = jax.random.PRNGKey(0)
    kp, kx = jax.random.split(key)

    # Small demo config: stride=1, identity_downsample=None requires
    # in_channels == 4 * intermediate_channels.  128 channels keeps the final
    # output lane-dense; row_tile=128 exercises the multi-tile grid (M=512).
    N, H, W = 2, 16, 16
    intermediate_channels = 32
    in_channels = intermediate_channels * 4            # 128

    params = make_params(kp, in_channels, intermediate_channels)
    x = jax.random.normal(kx, (N, in_channels, H, W), jnp.float32)

    fwd = jax.jit(functools.partial(block_forward, stride=1, row_tile=128))
    out = jax.block_until_ready(fwd(x, params))

    assert out.shape == (N, in_channels, H, W), out.shape
    assert bool(jnp.all(jnp.isfinite(out)))
    assert bool(jnp.all(out >= 0.0))                    # final ReLU

    ref = _reference_block(x, params, stride=1)
    max_err = float(jnp.max(jnp.abs(out - ref)))
    assert max_err < 0.25, f"max |out - ref| = {max_err}"  # bf16 MXU tolerance
    print("KERNEL_OK")
</pallas_src>

<mosaic_0001>
module attributes {stable_mosaic.version = 11 : i64} {
  func.func @_conv1x1_stats_kernel(%arg0: i32, %arg1: memref<128x128xf32, #tpu.memory_space<vmem>>, %arg2: memref<128x32xbf16, #tpu.memory_space<vmem>>, %arg3: memref<128x32xf32, #tpu.memory_space<vmem>>, %arg4: memref<1x32xf32, #tpu.memory_space<vmem>>, %arg5: memref<1x32xf32, #tpu.memory_space<vmem>>) attributes {dimension_semantics = [#tpu.dimension_semantics<arbitrary>], iteration_bounds = array<i64: 4>, scalar_prefetch = 0 : i64, scratch_operands = 0 : i64, tpu.core_type = #tpu.core_type<tc>, window_params = [{transform_indices = @transform_0, window_bounds = array<i64: 128, 128>}, {pipeline_mode = #tpu.pipeline_mode<synchronous>, transform_indices = @transform_1, window_bounds = array<i64: 128, 32>}, {transform_indices = @transform_2, window_bounds = array<i64: 128, 32>}, {pipeline_mode = #tpu.pipeline_mode<synchronous>, transform_indices = @transform_3, window_bounds = array<i64: 1, 32>}, {pipeline_mode = #tpu.pipeline_mode<synchronous>, transform_indices = @transform_4, window_bounds = array<i64: 1, 32>}]} {
    %c0_i32 = arith.constant 0 : i32
    %0 = arith.cmpi eq, %arg0, %c0_i32 : i32
    %1 = arith.extui %0 : i1 to i32
    %c0_i32_0 = arith.constant 0 : i32
    %2 = arith.cmpi ne, %1, %c0_i32_0 : i32
    scf.if %2 {
      %cst_16 = arith.constant 0.000000e+00 : f32
      %19 = vector.broadcast %cst_16 : f32 to vector<1x32xf32>
      %c0_17 = arith.constant 0 : index
      %c0_18 = arith.constant 0 : index
      %20 = vector.load %arg4[%c0_17, %c0_18] : memref<1x32xf32, #tpu.memory_space<vmem>>, vector<1x32xf32>
      tpu.vector_store %arg4[%c0_17, %c0_18], %19 {strides = array<i32>} : memref<1x32xf32, #tpu.memory_space<vmem>>, vector<1x32xf32>,
      %cst_19 = arith.constant 0.000000e+00 : f32
      %21 = vector.broadcast %cst_19 : f32 to vector<1x32xf32>
      %c0_20 = arith.constant 0 : index
      %c0_21 = arith.constant 0 : index
      %22 = vector.load %arg5[%c0_20, %c0_21] : memref<1x32xf32, #tpu.memory_space<vmem>>, vector<1x32xf32>
      tpu.vector_store %arg5[%c0_20, %c0_21], %21 {strides = array<i32>} : memref<1x32xf32, #tpu.memory_space<vmem>>, vector<1x32xf32>,
    } else {
    }
    %c0 = arith.constant 0 : index
    %c0_1 = arith.constant 0 : index
    %3 = vector.load %arg1[%c0, %c0_1] : memref<128x128xf32, #tpu.memory_space<vmem>>, vector<128x128xf32>
    %4 = arith.truncf %3 : vector<128x128xf32> to vector<128x128xbf16>
    %c0_2 = arith.constant 0 : index
    %c0_3 = arith.constant 0 : index
    %5 = vector.load %arg2[%c0_2, %c0_3] : memref<128x32xbf16, #tpu.memory_space<vmem>>, vector<128x32xbf16>
    %cst = arith.constant dense<0.000000e+00> : vector<128x32xf32>
    %6 = tpu.matmul %4, %5, %cst {dimension_numbers = #tpu.dot_dimension_numbers<[1], [0], [0], [1], [0, 0, 1, 1], [], []>} : vector<128x128xbf16>, vector<128x32xbf16>, vector<128x32xf32> -> vector<128x32xf32>
    %c0_4 = arith.constant 0 : index
    %c0_5 = arith.constant 0 : index
    %7 = vector.load %arg3[%c0_4, %c0_5] : memref<128x32xf32, #tpu.memory_space<vmem>>, vector<128x32xf32>
    tpu.vector_store %arg3[%c0_4, %c0_5], %6 {strides = array<i32>} : memref<128x32xf32, #tpu.memory_space<vmem>>, vector<128x32xf32>,
    %c0_6 = arith.constant 0 : index
    %c0_7 = arith.constant 0 : index
    %8 = vector.load %arg4[%c0_6, %c0_7] : memref<1x32xf32, #tpu.memory_space<vmem>>, vector<1x32xf32>
    %cst_8 = arith.constant dense<0.000000e+00> : vector<32xf32>
    %9 = vector.multi_reduction <add>, %6, %cst_8 [0] : vector<128x32xf32> to vector<32xf32>
    %10 = vector.shape_cast %9 : vector<32xf32> to vector<1x32xf32>
    %11 = arith.addf %8, %10 : vector<1x32xf32>
    %c0_9 = arith.constant 0 : index
    %c0_10 = arith.constant 0 : index
    %12 = vector.load %arg4[%c0_9, %c0_10] : memref<1x32xf32, #tpu.memory_space<vmem>>, vector<1x32xf32>
    tpu.vector_store %arg4[%c0_9, %c0_10], %11 {strides = array<i32>} : memref<1x32xf32, #tpu.memory_space<vmem>>, vector<1x32xf32>,
    %c0_11 = arith.constant 0 : index
    %c0_12 = arith.constant 0 : index
    %13 = vector.load %arg5[%c0_11, %c0_12] : memref<1x32xf32, #tpu.memory_space<vmem>>, vector<1x32xf32>
    %14 = arith.mulf %6, %6 : vector<128x32xf32>
    %cst_13 = arith.constant dense<0.000000e+00> : vector<32xf32>
    %15 = vector.multi_reduction <add>, %14, %cst_13 [0] : vector<128x32xf32> to vector<32xf32>
    %16 = vector.shape_cast %15 : vector<32xf32> to vector<1x32xf32>
    %17 = arith.addf %13, %16 : vector<1x32xf32>
    %c0_14 = arith.constant 0 : index
    %c0_15 = arith.constant 0 : index
    %18 = vector.load %arg5[%c0_14, %c0_15] : memref<1x32xf32, #tpu.memory_space<vmem>>, vector<1x32xf32>
    tpu.vector_store %arg5[%c0_14, %c0_15], %17 {strides = array<i32>} : memref<1x32xf32, #tpu.memory_space<vmem>>, vector<1x32xf32>,
    return
  }
  func.func @transform_0(%arg0: i32) -> (i32, i32) {
    %c0_i32 = arith.constant 0 : i32
    %c0_i32_0 = arith.constant 0 : i32
    return %arg0, %c0_i32 : i32, i32
  }
  func.func @transform_1(%arg0: i32) -> (i32, i32) {
    %c0_i32 = arith.constant 0 : i32
    %c0_i32_0 = arith.constant 0 : i32
    %c0_i32_1 = arith.constant 0 : i32
    return %c0_i32, %c0_i32_0 : i32, i32
  }
  func.func @transform_2(%arg0: i32) -> (i32, i32) {
    %c0_i32 = arith.constant 0 : i32
    %c0_i32_0 = arith.constant 0 : i32
    return %arg0, %c0_i32 : i32, i32
  }
  func.func @transform_3(%arg0: i32) -> (i32, i32) {
    %c0_i32 = arith.constant 0 : i32
    %c0_i32_0 = arith.constant 0 : i32
    %c0_i32_1 = arith.constant 0 : i32
    return %c0_i32, %c0_i32_0 : i32, i32
  }
  func.func @transform_4(%arg0: i32) -> (i32, i32) {
    %c0_i32 = arith.constant 0 : i32
    %c0_i32_0 = arith.constant 0 : i32
    %c0_i32_1 = arith.constant 0 : i32
    return %c0_i32, %c0_i32_0 : i32, i32
  }
}

module attributes {stable_mosaic.version = 11 : i64} {
  func.func @_bn_relu_conv1x1_stats_kernel(%arg0: i32, %arg1: memref<128x32xf32, #tpu.memory_space<vmem>>, %arg2: memref<1x32xf32, #tpu.memory_space<vmem>>, %arg3: memref<1x32xf32, #tpu.memory_space<vmem>>, %arg4: memref<32x128xbf16, #tpu.memory_space<vmem>>, %arg5: memref<128x128xf32, #tpu.memory_space<vmem>>, %arg6: memref<1x128xf32, #tpu.memory_space<vmem>>, %arg7: memref<1x128xf32, #tpu.memory_space<vmem>>) attributes {dimension_semantics = [#tpu.dimension_semantics<arbitrary>], iteration_bounds = array<i64: 4>, scalar_prefetch = 0 : i64, scratch_operands = 0 : i64, tpu.core_type = #tpu.core_type<tc>, window_params = [{transform_indices = @transform_0, window_bounds = array<i64: 128, 32>}, {pipeline_mode = #tpu.pipeline_mode<synchronous>, transform_indices = @transform_1, window_bounds = array<i64: 1, 32>}, {pipeline_mode = #tpu.pipeline_mode<synchronous>, transform_indices = @transform_2, window_bounds = array<i64: 1, 32>}, {pipeline_mode = #tpu.pipeline_mode<synchronous>, transform_indices = @transform_3, window_bounds = array<i64: 32, 128>}, {transform_indices = @transform_4, window_bounds = array<i64: 128, 128>}, {pipeline_mode = #tpu.pipeline_mode<synchronous>, transform_indices = @transform_5, window_bounds = array<i64: 1, 128>}, {pipeline_mode = #tpu.pipeline_mode<synchronous>, transform_indices = @transform_6, window_bounds = array<i64: 1, 128>}]} {
    %c0_i32 = arith.constant 0 : i32
    %0 = arith.cmpi eq, %arg0, %c0_i32 : i32
    %1 = arith.extui %0 : i1 to i32
    %c0_i32_0 = arith.constant 0 : i32
    %2 = arith.cmpi ne, %1, %c0_i32_0 : i32
    scf.if %2 {
      %cst_21 = arith.constant 0.000000e+00 : f32
      %27 = vector.broadcast %cst_21 : f32 to vector<1x128xf32>
      %c0_22 = arith.constant 0 : index
      %c0_23 = arith.constant 0 : index
      %28 = vector.load %arg6[%c0_22, %c0_23] : memref<1x128xf32, #tpu.memory_space<vmem>>, vector<1x128xf32>
      tpu.vector_store %arg6[%c0_22, %c0_23], %27 {strides = array<i32>} : memref<1x128xf32, #tpu.memory_space<vmem>>, vector<1x128xf32>,
      %cst_24 = arith.constant 0.000000e+00 : f32
      %29 = vector.broadcast %cst_24 : f32 to vector<1x128xf32>
      %c0_25 = arith.constant 0 : index
      %c0_26 = arith.constant 0 : index
      %30 = vector.load %arg7[%c0_25, %c0_26] : memref<1x128xf32, #tpu.memory_space<vmem>>, vector<1x128xf32>
      tpu.vector_store %arg7[%c0_25, %c0_26], %29 {strides = array<i32>} : memref<1x128xf32, #tpu.memory_space<vmem>>, vector<1x128xf32>,
    } else {
    }
    %c0 = arith.constant 0 : index
    %c0_1 = arith.constant 0 : index
    %3 = vector.load %arg1[%c0, %c0_1] : memref<128x32xf32, #tpu.memory_space<vmem>>, vector<128x32xf32>
    %c0_2 = arith.constant 0 : index
    %c0_3 = arith.constant 0 : index
    %4 = vector.load %arg2[%c0_2, %c0_3] : memref<1x32xf32, #tpu.memory_space<vmem>>, vector<1x32xf32>
    %5 = vector.broadcast %4 : vector<1x32xf32> to vector<128x32xf32>
    %6 = arith.mulf %3, %5 : vector<128x32xf32>
    %c0_4 = arith.constant 0 : index
    %c0_5 = arith.constant 0 : index
    %7 = vector.load %arg3[%c0_4, %c0_5] : memref<1x32xf32, #tpu.memory_space<vmem>>, vector<1x32xf32>
    %8 = vector.broadcast %7 : vector<1x32xf32> to vector<128x32xf32>
    %9 = arith.addf %6, %8 : vector<128x32xf32>
    %cst = arith.constant 0.000000e+00 : f32
    %10 = vector.broadcast %cst : f32 to vector<128x32xf32>
    %11 = arith.maximumf %9, %10 : vector<128x32xf32>
    %12 = arith.truncf %11 : vector<128x32xf32> to vector<128x32xbf16>
    %c0_6 = arith.constant 0 : index
    %c0_7 = arith.constant 0 : index
    %13 = vector.load %arg4[%c0_6, %c0_7] : memref<32x128xbf16, #tpu.memory_space<vmem>>, vector<32x128xbf16>
    %cst_8 = arith.constant dense<0.000000e+00> : vector<128x128xf32>
    %14 = tpu.matmul %12, %13, %cst_8 {dimension_numbers = #tpu.dot_dimension_numbers<[1], [0], [0], [1], [0, 0, 1, 1], [], []>} : vector<128x32xbf16>, vector<32x128xbf16>, vector<128x128xf32> -> vector<128x128xf32>
    %c0_9 = arith.constant 0 : index
    %c0_10 = arith.constant 0 : index
    %15 = vector.load %arg5[%c0_9, %c0_10] : memref<128x128xf32, #tpu.memory_space<vmem>>, vector<128x128xf32>
    tpu.vector_store %arg5[%c0_9, %c0_10], %14 {strides = array<i32>} : memref<128x128xf32, #tpu.memory_space<vmem>>, vector<128x128xf32>,
    %c0_11 = arith.constant 0 : index
    %c0_12 = arith.constant 0 : index
    %16 = vector.load %arg6[%c0_11, %c0_12] : memref<1x128xf32, #tpu.memory_space<vmem>>, vector<1x128xf32>
    %cst_13 = arith.constant dense<0.000000e+00> : vector<128xf32>
    %17 = vector.multi_reduction <add>, %14, %cst_13 [0] : vector<128x128xf32> to vector<128xf32>
    %18 = vector.shape_cast %17 : vector<128xf32> to vector<1x128xf32>
    %19 = arith.addf %16, %18 : vector<1x128xf32>
    %c0_14 = arith.constant 0 : index
    %c0_15 = arith.constant 0 : index
    %20 = vector.load %arg6[%c0_14, %c0_15] : memref<1x128xf32, #tpu.memory_space<vmem>>, vector<1x128xf32>
    tpu.vector_store %arg6[%c0_14, %c0_15], %19 {strides = array<i32>} : memref<1x128xf32, #tpu.memory_space<vmem>>, vector<1x128xf32>,
    %c0_16 = arith.constant 0 : index
    %c0_17 = arith.constant 0 : index
    %21 = vector.load %arg7[%c0_16, %c0_17] : memref<1x128xf32, #tpu.memory_space<vmem>>, vector<1x128xf32>
    %22 = arith.mulf %14, %14 : vector<128x128xf32>
    %cst_18 = arith.constant dense<0.000000e+00> : vector<128xf32>
    %23 = vector.multi_reduction <add>, %22, %cst_18 [0] : vector<128x128xf32> to vector<128xf32>
    %24 = vector.shape_cast %23 : vector<128xf32> to vector<1x128xf32>
    %25 = arith.addf %21, %24 : vector<1x128xf32>
    %c0_19 = arith.constant 0 : index
    %c0_20 = arith.constant 0 : index
    %26 = vector.load %arg7[%c0_19, %c0_20] : memref<1x128xf32, #tpu.memory_space<vmem>>, vector<1x128xf32>
    tpu.vector_store %arg7[%c0_19, %c0_20], %25 {strides = array<i32>} : memref<1x128xf32, #tpu.memory_space<vmem>>, vector<1x128xf32>,
    return
  }
  func.func @transform_0(%arg0: i32) -> (i32, i32) {
    %c0_i32 = arith.constant 0 : i32
    %c0_i32_0 = arith.constant 0 : i32
    return %arg0, %c0_i32 : i32, i32
  }
  func.func @transform_1(%arg0: i32) -> (i32, i32) {
    %c0_i32 = arith.constant 0 : i32
    %c0_i32_0 = arith.constant 0 : i32
    %c0_i32_1 = arith.constant 0 : i32
    return %c0_i32, %c0_i32_0 : i32, i32
  }
  func.func @transform_2(%arg0: i32) -> (i32, i32) {
    %c0_i32 = arith.constant 0 : i32
    %c0_i32_0 = arith.constant 0 : i32
    %c0_i32_1 = arith.constant 0 : i32
    return %c0_i32, %c0_i32_0 : i32, i32
  }
  func.func @transform_3(%arg0: i32) -> (i32, i32) {
    %c0_i32 = arith.constant 0 : i32
    %c0_i32_0 = arith.constant 0 : i32
    %c0_i32_1 = arith.constant 0 : i32
    return %c0_i32, %c0_i32_0 : i32, i32
  }
  func.func @transform_4(%arg0: i32) -> (i32, i32) {
    %c0_i32 = arith.constant 0 : i32
    %c0_i32_0 = arith.constant 0 : i32
    return %arg0, %c0_i32 : i32, i32
  }
  func.func @transform_5(%arg0: i32) -> (i32, i32) {
    %c0_i32 = arith.constant 0 : i32
    %c0_i32_0 = arith.constant 0 : i32
    %c0_i32_1 = arith.constant 0 : i32
    return %c0_i32, %c0_i32_0 : i32, i32
  }
  func.func @transform_6(%arg0: i32) -> (i32, i32) {
    %c0_i32 = arith.constant 0 : i32
    %c0_i32_0 = arith.constant 0 : i32
    %c0_i32_1 = arith.constant 0 : i32
    return %c0_i32, %c0_i32_0 : i32, i32
  }
}

module attributes {stable_mosaic.version = 11 : i64} {
  func.func @_bn_relu_conv3x3_stats_kernel(%arg0: i32, %arg1: memref<1x16x16x32xf32, #tpu.memory_space<vmem>>, %arg2: memref<1x32xf32, #tpu.memory_space<vmem>>, %arg3: memref<1x32xf32, #tpu.memory_space<vmem>>, %arg4: memref<3x3x32x32xbf16, #tpu.memory_space<vmem>>, %arg5: memref<1x16x16x32xf32, #tpu.memory_space<vmem>>, %arg6: memref<1x32xf32, #tpu.memory_space<vmem>>, %arg7: memref<1x32xf32, #tpu.memory_space<vmem>>, %arg8: memref<18x18x32xf32, #tpu.memory_space<vmem>>, %arg9: memref<256x32xf32, #tpu.memory_space<vmem>>) attributes {dimension_semantics = [#tpu.dimension_semantics<arbitrary>], iteration_bounds = array<i64: 2>, scalar_prefetch = 0 : i64, scratch_operands = 2 : i64, tpu.core_type = #tpu.core_type<tc>, window_params = [{transform_indices = @transform_0, window_bounds = array<i64: 1, 16, 16, 32>}, {pipeline_mode = #tpu.pipeline_mode<synchronous>, transform_indices = @transform_1, window_bounds = array<i64: 1, 32>}, {pipeline_mode = #tpu.pipeline_mode<synchronous>, transform_indices = @transform_2, window_bounds = array<i64: 1, 32>}, {pipeline_mode = #tpu.pipeline_mode<synchronous>, transform_indices = @transform_3, window_bounds = array<i64: 3, 3, 32, 32>}, {transform_indices = @transform_4, window_bounds = array<i64: 1, 16, 16, 32>}, {pipeline_mode = #tpu.pipeline_mode<synchronous>, transform_indices = @transform_5, window_bounds = array<i64: 1, 32>}, {pipeline_mode = #tpu.pipeline_mode<synchronous>, transform_indices = @transform_6, window_bounds = array<i64: 1, 32>}]} {
    %c0_i32 = arith.constant 0 : i32
    %0 = arith.cmpi eq, %arg0, %c0_i32 : i32
    %1 = arith.extui %0 : i1 to i32
    %c0_i32_0 = arith.constant 0 : i32
    %2 = arith.cmpi ne, %1, %c0_i32_0 : i32
    scf.if %2 {
      %cst_138 = arith.constant 0.000000e+00 : f32
      %117 = vector.broadcast %cst_138 : f32 to vector<1x32xf32>
      %c0_139 = arith.constant 0 : index
      %c0_140 = arith.constant 0 : index
      %118 = vector.load %arg6[%c0_139, %c0_140] : memref<1x32xf32, #tpu.memory_space<vmem>>, vector<1x32xf32>
      tpu.vector_store %arg6[%c0_139, %c0_140], %117 {strides = array<i32>} : memref<1x32xf32, #tpu.memory_space<vmem>>, vector<1x32xf32>,
      %cst_141 = arith.constant 0.000000e+00 : f32
      %119 = vector.broadcast %cst_141 : f32 to vector<1x32xf32>
      %c0_142 = arith.constant 0 : index
      %c0_143 = arith.constant 0 : index
      %120 = vector.load %arg7[%c0_142, %c0_143] : memref<1x32xf32, #tpu.memory_space<vmem>>, vector<1x32xf32>
      tpu.vector_store %arg7[%c0_142, %c0_143], %119 {strides = array<i32>} : memref<1x32xf32, #tpu.memory_space<vmem>>, vector<1x32xf32>,
    } else {
    }
    %c0 = arith.constant 0 : index
    %c0_1 = arith.constant 0 : index
    %c0_2 = arith.constant 0 : index
    %c0_3 = arith.constant 0 : index
    %3 = vector.load %arg1[%c0, %c0_1, %c0_2, %c0_3] : memref<1x16x16x32xf32, #tpu.memory_space<vmem>>, vector<1x16x16x32xf32>
    %4 = vector.shape_cast %3 : vector<1x16x16x32xf32> to vector<16x16x32xf32>
    %c0_4 = arith.constant 0 : index
    %c0_5 = arith.constant 0 : index
    %5 = vector.load %arg2[%c0_4, %c0_5] : memref<1x32xf32, #tpu.memory_space<vmem>>, vector<1x32xf32>
    %6 = vector.shape_cast %5 : vector<1x32xf32> to vector<1x1x32xf32>
    %7 = vector.broadcast %6 : vector<1x1x32xf32> to vector<16x16x32xf32>
    %8 = arith.mulf %4, %7 : vector<16x16x32xf32>
    %c0_6 = arith.constant 0 : index
    %c0_7 = arith.constant 0 : index
    %9 = vector.load %arg3[%c0_6, %c0_7] : memref<1x32xf32, #tpu.memory_space<vmem>>, vector<1x32xf32>
    %10 = vector.shape_cast %9 : vector<1x32xf32> to vector<1x1x32xf32>
    %11 = vector.broadcast %10 : vector<1x1x32xf32> to vector<16x16x32xf32>
    %12 = arith.addf %8, %11 : vector<16x16x32xf32>
    %cst = arith.constant 0.000000e+00 : f32
    %13 = vector.broadcast %cst : f32 to vector<16x16x32xf32>
    %14 = arith.maximumf %12, %13 : vector<16x16x32xf32>
    %cst_8 = arith.constant 0.000000e+00 : f32
    %15 = vector.broadcast %cst_8 : f32 to vector<1x16x32xf32>
    %cst_9 = arith.constant 0.000000e+00 : f32
    %16 = vector.broadcast %cst_9 : f32 to vector<18x1x32xf32>
    %17 = tpu.concatenate %15, %14, %15 in 0 : vector<1x16x32xf32>, vector<16x16x32xf32>, vector<1x16x32xf32> -> vector<18x16x32xf32>
    %18 = tpu.concatenate %16, %17, %16 in 1 : vector<18x1x32xf32>, vector<18x16x32xf32>, vector<18x1x32xf32> -> vector<18x18x32xf32>
    %c0_10 = arith.constant 0 : index
    %c0_11 = arith.constant 0 : index
    %c0_12 = arith.constant 0 : index
    %19 = vector.load %arg8[%c0_10, %c0_11, %c0_12] : memref<18x18x32xf32, #tpu.memory_space<vmem>>, vector<18x18x32xf32>
    tpu.vector_store %arg8[%c0_10, %c0_11, %c0_12], %18 {strides = array<i32>} : memref<18x18x32xf32, #tpu.memory_space<vmem>>, vector<18x18x32xf32>,
    %cst_13 = arith.constant 0.000000e+00 : f32
    %20 = vector.broadcast %cst_13 : f32 to vector<256x32xf32>
    %c0_14 = arith.constant 0 : index
    %c0_15 = arith.constant 0 : index
    %21 = vector.load %arg9[%c0_14, %c0_15] : memref<256x32xf32, #tpu.memory_space<vmem>>, vector<256x32xf32>
    tpu.vector_store %arg9[%c0_14, %c0_15], %20 {strides = array<i32>} : memref<256x32xf32, #tpu.memory_space<vmem>>, vector<256x32xf32>,
    %c0_16 = arith.constant 0 : index
    %c0_17 = arith.constant 0 : index
    %c0_18 = arith.constant 0 : index
    %22 = vector.load %arg8[%c0_16, %c0_17, %c0_18] : memref<18x18x32xf32, #tpu.memory_space<vmem>>, vector<16x16x32xf32>
    %c0_19 = arith.constant 0 : index
    %c0_20 = arith.constant 0 : index
    %23 = vector.load %arg9[%c0_19, %c0_20] : memref<256x32xf32, #tpu.memory_space<vmem>>, vector<256x32xf32>
    %24 = vector.shape_cast %22 : vector<16x16x32xf32> to vector<256x32xf32>
    %25 = arith.truncf %24 : vector<256x32xf32> to vector<256x32xbf16>
    %c0_21 = arith.constant 0 : index
    %c0_22 = arith.constant 0 : index
    %c0_23 = arith.constant 0 : index
    %c0_24 = arith.constant 0 : index
    %26 = vector.load %arg4[%c0_21, %c0_22, %c0_23, %c0_24] : memref<3x3x32x32xbf16, #tpu.memory_space<vmem>>, vector<1x1x32x32xbf16>
    %27 = vector.shape_cast %26 : vector<1x1x32x32xbf16> to vector<32x32xbf16>
    %cst_25 = arith.constant dense<0.000000e+00> : vector<256x32xf32>
    %28 = tpu.matmul %25, %27, %cst_25 {dimension_numbers = #tpu.dot_dimension_numbers<[1], [0], [0], [1], [0, 0, 1, 1], [], []>} : vector<256x32xbf16>, vector<32x32xbf16>, vector<256x32xf32> -> vector<256x32xf32>
    %29 = arith.addf %23, %28 : vector<256x32xf32>
    %c0_26 = arith.constant 0 : index
    %c0_27 = arith.constant 0 : index
    %30 = vector.load %arg9[%c0_26, %c0_27] : memref<256x32xf32, #tpu.memory_space<vmem>>, vector<256x32xf32>
    tpu.vector_store %arg9[%c0_26, %c0_27], %29 {strides = array<i32>} : memref<256x32xf32, #tpu.memory_space<vmem>>, vector<256x32xf32>,
    %c0_28 = arith.constant 0 : index
    %c1 = arith.constant 1 : index
    %c0_29 = arith.constant 0 : index
    %31 = vector.load %arg8[%c0_28, %c1, %c0_29] : memref<18x18x32xf32, #tpu.memory_space<vmem>>, vector<16x16x32xf32>
    %c0_30 = arith.constant 0 : index
    %c0_31 = arith.constant 0 : index
    %32 = vector.load %arg9[%c0_30, %c0_31] : memref<256x32xf32, #tpu.memory_space<vmem>>, vector<256x32xf32>
    %33 = vector.shape_cast %31 : vector<16x16x32xf32> to vector<256x32xf32>
    %34 = arith.truncf %33 : vector<256x32xf32> to vector<256x32xbf16>
    %c0_32 = arith.constant 0 : index
    %c1_33 = arith.constant 1 : index
    %c0_34 = arith.constant 0 : index
    %c0_35 = arith.constant 0 : index
    %35 = vector.load %arg4[%c0_32, %c1_33, %c0_34, %c0_35] : memref<3x3x32x32xbf16, #tpu.memory_space<vmem>>, vector<1x1x32x32xbf16>
    %36 = vector.shape_cast %35 : vector<1x1x32x32xbf16> to vector<32x32xbf16>
    %cst_36 = arith.constant dense<0.000000e+00> : vector<256x32xf32>
    %37 = tpu.matmul %34, %36, %cst_36 {dimension_numbers = #tpu.dot_dimension_numbers<[1], [0], [0], [1], [0, 0, 1, 1], [], []>} : vector<256x32xbf16>, vector<32x32xbf16>, vector<256x32xf32> -> vector<256x32xf32>
    %38 = arith.addf %32, %37 : vector<256x32xf32>
    %c0_37 = arith.constant 0 : index
    %c0_38 = arith.constant 0 : index
    %39 = vector.load %arg9[%c0_37, %c0_38] : memref<256x32xf32, #tpu.memory_space<vmem>>, vector<256x32xf32>
    tpu.vector_store %arg9[%c0_37, %c0_38], %38 {strides = array<i32>} : memref<256x32xf32, #tpu.memory_space<vmem>>, vector<256x32xf32>,
    %c0_39 = arith.constant 0 : index
    %c2 = arith.constant 2 : index
    %c0_40 = arith.constant 0 : index
    %40 = vector.load %arg8[%c0_39, %c2, %c0_40] : memref<18x18x32xf32, #tpu.memory_space<vmem>>, vector<16x16x32xf32>
    %c0_41 = arith.constant 0 : index
    %c0_42 = arith.constant 0 : index
    %41 = vector.load %arg9[%c0_41, %c0_42] : memref<256x32xf32, #tpu.memory_space<vmem>>, vector<256x32xf32>
    %42 = vector.shape_cast %40 : vector<16x16x32xf32> to vector<256x32xf32>
    %43 = arith.truncf %42 : vector<256x32xf32> to vector<256x32xbf16>
    %c0_43 = arith.constant 0 : index
    %c2_44 = arith.constant 2 : index
    %c0_45 = arith.constant 0 : index
    %c0_46 = arith.constant 0 : index
    %44 = vector.load %arg4[%c0_43, %c2_44, %c0_45, %c0_46] : memref<3x3x32x32xbf16, #tpu.memory_space<vmem>>, vector<1x1x32x32xbf16>
    %45 = vector.shape_cast %44 : vector<1x1x32x32xbf16> to vector<32x32xbf16>
    %cst_47 = arith.constant dense<0.000000e+00> : vector<256x32xf32>
    %46 = tpu.matmul %43, %45, %cst_47 {dimension_numbers = #tpu.dot_dimension_numbers<[1], [0], [0], [1], [0, 0, 1, 1], [], []>} : vector<256x32xbf16>, vector<32x32xbf16>, vector<256x32xf32> -> vector<256x32xf32>
    %47 = arith.addf %41, %46 : vector<256x32xf32>
    %c0_48 = arith.constant 0 : index
    %c0_49 = arith.constant 0 : index
    %48 = vector.load %arg9[%c0_48, %c0_49] : memref<256x32xf32, #tpu.memory_space<vmem>>, vector<256x32xf32>
    tpu.vector_store %arg9[%c0_48, %c0_49], %47 {strides = array<i32>} : memref<256x32xf32, #tpu.memory_space<vmem>>, vector<256x32xf32>,
    %c1_50 = arith.constant 1 : index
    %c0_51 = arith.constant 0 : index
    %c0_52 = arith.constant 0 : index
    %49 = vector.load %arg8[%c1_50, %c0_51, %c0_52] : memref<18x18x32xf32, #tpu.memory_space<vmem>>, vector<16x16x32xf32>
    %c0_53 = arith.constant 0 : index
    %c0_54 = arith.constant 0 : index
    %50 = vector.load %arg9[%c0_53, %c0_54] : memref<256x32xf32, #tpu.memory_space<vmem>>, vector<256x32xf32>
    %51 = vector.shape_cast %49 : vector<16x16x32xf32> to vector<256x32xf32>
    %52 = arith.truncf %51 : vector<256x32xf32> to vector<256x32xbf16>
    %c1_55 = arith.constant 1 : index
    %c0_56 = arith.constant 0 : index
    %c0_57 = arith.constant 0 : index
    %c0_58 = arith.constant 0 : index
    %53 = vector.load %arg4[%c1_55, %c0_56, %c0_57, %c0_58] : memref<3x3x32x32xbf16, #tpu.memory_space<vmem>>, vector<1x1x32x32xbf16>
    %54 = vector.shape_cast %53 : vector<1x1x32x32xbf16> to vector<32x32xbf16>
    %cst_59 = arith.constant dense<0.000000e+00> : vector<256x32xf32>
    %55 = tpu.matmul %52, %54, %cst_59 {dimension_numbers = #tpu.dot_dimension_numbers<[1], [0], [0], [1], [0, 0, 1, 1], [], []>} : vector<256x32xbf16>, vector<32x32xbf16>, vector<256x32xf32> -> vector<256x32xf32>
    %56 = arith.addf %50, %55 : vector<256x32xf32>
    %c0_60 = arith.constant 0 : index
    %c0_61 = arith.constant 0 : index
    %57 = vector.load %arg9[%c0_60, %c0_61] : memref<256x32xf32, #tpu.memory_space<vmem>>, vector<256x32xf32>
    tpu.vector_store %arg9[%c0_60, %c0_61], %56 {strides = array<i32>} : memref<256x32xf32, #tpu.memory_space<vmem>>, vector<256x32xf32>,
    %c1_62 = arith.constant 1 : index
    %c1_63 = arith.constant 1 : index
    %c0_64 = arith.constant 0 : index
    %58 = vector.load %arg8[%c1_62, %c1_63, %c0_64] : memref<18x18x32xf32, #tpu.memory_space<vmem>>, vector<16x16x32xf32>
    %c0_65 = arith.constant 0 : index
    %c0_66 = arith.constant 0 : index
    %59 = vector.load %arg9[%c0_65, %c0_66] : memref<256x32xf32, #tpu.memory_space<vmem>>, vector<256x32xf32>
    %60 = vector.shape_cast %58 : vector<16x16x32xf32> to vector<256x32xf32>
    %61 = arith.truncf %60 : vector<256x32xf32> to vector<256x32xbf16>
    %c1_67 = arith.constant 1 : index
    %c1_68 = arith.constant 1 : index
    %c0_69 = arith.constant 0 : index
    %c0_70 = arith.constant 0 : index
    %62 = vector.load %arg4[%c1_67, %c1_68, %c0_69, %c0_70] : memref<3x3x32x32xbf16, #tpu.memory_space<vmem>>, vector<1x1x32x32xbf16>
    %63 = vector.shape_cast %62 : vector<1x1x32x32xbf16> to vector<32x32xbf16>
    %cst_71 = arith.constant dense<0.000000e+00> : vector<256x32xf32>
    %64 = tpu.matmul %61, %63, %cst_71 {dimension_numbers = #tpu.dot_dimension_numbers<[1], [0], [0], [1], [0, 0, 1, 1], [], []>} : vector<256x32xbf16>, vector<32x32xbf16>, vector<256x32xf32> -> vector<256x32xf32>
    %65 = arith.addf %59, %64 : vector<256x32xf32>
    %c0_72 = arith.constant 0 : index
    %c0_73 = arith.constant 0 : index
    %66 = vector.load %arg9[%c0_72, %c0_73] : memref<256x32xf32, #tpu.memory_space<vmem>>, vector<256x32xf32>
    tpu.vector_store %arg9[%c0_72, %c0_73], %65 {strides = array<i32>} : memref<256x32xf32, #tpu.memory_space<vmem>>, vector<256x32xf32>,
    %c1_74 = arith.constant 1 : index
    %c2_75 = arith.constant 2 : index
    %c0_76 = arith.constant 0 : index
    %67 = vector.load %arg8[%c1_74, %c2_75, %c0_76] : memref<18x18x32xf32, #tpu.memory_space<vmem>>, vector<16x16x32xf32>
    %c0_77 = arith.constant 0 : index
    %c0_78 = arith.constant 0 : index
    %68 = vector.load %arg9[%c0_77, %c0_78] : memref<256x32xf32, #tpu.memory_space<vmem>>, vector<256x32xf32>
    %69 = vector.shape_cast %67 : vector<16x16x32xf32> to vector<256x32xf32>
    %70 = arith.truncf %69 : vector<256x32xf32> to vector<256x32xbf16>
    %c1_79 = arith.constant 1 : index
    %c2_80 = arith.constant 2 : index
    %c0_81 = arith.constant 0 : index
    %c0_82 = arith.constant 0 : index
    %71 = vector.load %arg4[%c1_79, %c2_80, %c0_81, %c0_82] : memref<3x3x32x32xbf16, #tpu.memory_space<vmem>>, vector<1x1x32x32xbf16>
    %72 = vector.shape_cast %71 : vector<1x1x32x32xbf16> to vector<32x32xbf16>
    %cst_83 = arith.constant dense<0.000000e+00> : vector<256x32xf32>
    %73 = tpu.matmul %70, %72, %cst_83 {dimension_numbers = #tpu.dot_dimension_numbers<[1], [0], [0], [1], [0, 0, 1, 1], [], []>} : vector<256x32xbf16>, vector<32x32xbf16>, vector<256x32xf32> -> vector<256x32xf32>
    %74 = arith.addf %68, %73 : vector<256x32xf32>
    %c0_84 = arith.constant 0 : index
    %c0_85 = arith.constant 0 : index
    %75 = vector.load %arg9[%c0_84, %c0_85] : memref<256x32xf32, #tpu.memory_space<vmem>>, vector<256x32xf32>
    tpu.vector_store %arg9[%c0_84, %c0_85], %74 {strides = array<i32>} : memref<256x32xf32, #tpu.memory_space<vmem>>, vector<256x32xf32>,
    %c2_86 = arith.constant 2 : index
    %c0_87 = arith.constant 0 : index
    %c0_88 = arith.constant 0 : index
    %76 = vector.load %arg8[%c2_86, %c0_87, %c0_88] : memref<18x18x32xf32, #tpu.memory_space<vmem>>, vector<16x16x32xf32>
    %c0_89 = arith.constant 0 : index
    %c0_90 = arith.constant 0 : index
    %77 = vector.load %arg9[%c0_89, %c0_90] : memref<256x32xf32, #tpu.memory_space<vmem>>, vector<256x32xf32>
    %78 = vector.shape_cast %76 : vector<16x16x32xf32> to vector<256x32xf32>
    %79 = arith.truncf %78 : vector<256x32xf32> to vector<256x32xbf16>
    %c2_91 = arith.constant 2 : index
    %c0_92 = arith.constant 0 : index
    %c0_93 = arith.constant 0 : index
    %c0_94 = arith.constant 0 : index
    %80 = vector.load %arg4[%c2_91, %c0_92, %c0_93, %c0_94] : memref<3x3x32x32xbf16, #tpu.memory_space<vmem>>, vector<1x1x32x32xbf16>
    %81 = vector.shape_cast %80 : vector<1x1x32x32xbf16> to vector<32x32xbf16>
    %cst_95 = arith.constant dense<0.000000e+00> : vector<256x32xf32>
    %82 = tpu.matmul %79, %81, %cst_95 {dimension_numbers = #tpu.dot_dimension_numbers<[1], [0], [0], [1], [0, 0, 1, 1], [], []>} : vector<256x32xbf16>, vector<32x32xbf16>, vector<256x32xf32> -> vector<256x32xf32>
    %83 = arith.addf %77, %82 : vector<256x32xf32>
    %c0_96 = arith.constant 0 : index
    %c0_97 = arith.constant 0 : index
    %84 = vector.load %arg9[%c0_96, %c0_97] : memref<256x32xf32, #tpu.memory_space<vmem>>, vector<256x32xf32>
    tpu.vector_store %arg9[%c0_96, %c0_97], %83 {strides = array<i32>} : memref<256x32xf32, #tpu.memory_space<vmem>>, vector<256x32xf32>,
    %c2_98 = arith.constant 2 : index
    %c1_99 = arith.constant 1 : index
    %c0_100 = arith.constant 0 : index
    %85 = vector.load %arg8[%c2_98, %c1_99, %c0_100] : memref<18x18x32xf32, #tpu.memory_space<vmem>>, vector<16x16x32xf32>
    %c0_101 = arith.constant 0 : index
    %c0_102 = arith.constant 0 : index
    %86 = vector.load %arg9[%c0_101, %c0_102] : memref<256x32xf32, #tpu.memory_space<vmem>>, vector<256x32xf32>
    %87 = vector.shape_cast %85 : vector<16x16x32xf32> to vector<256x32xf32>
    %88 = arith.truncf %87 : vector<256x32xf32> to vector<256x32xbf16>
    %c2_103 = arith.constant 2 : index
    %c1_104 = arith.constant 1 : index
    %c0_105 = arith.constant 0 : index
    %c0_106 = arith.constant 0 : index
    %89 = vector.load %arg4[%c2_103, %c1_104, %c0_105, %c0_106] : memref<3x3x32x32xbf16, #tpu.memory_space<vmem>>, vector<1x1x32x32xbf16>
    %90 = vector.shape_cast %89 : vector<1x1x32x32xbf16> to vector<32x32xbf16>
    %cst_107 = arith.constant dense<0.000000e+00> : vector<256x32xf32>
    %91 = tpu.matmul %88, %90, %cst_107 {dimension_numbers = #tpu.dot_dimension_numbers<[1], [0], [0], [1], [0, 0, 1, 1], [], []>} : vector<256x32xbf16>, vector<32x32xbf16>, vector<256x32xf32> -> vector<256x32xf32>
    %92 = arith.addf %86, %91 : vector<256x32xf32>
    %c0_108 = arith.constant 0 : index
    %c0_109 = arith.constant 0 : index
    %93 = vector.load %arg9[%c0_108, %c0_109] : memref<256x32xf32, #tpu.memory_space<vmem>>, vector<256x32xf32>
    tpu.vector_store %arg9[%c0_108, %c0_109], %92 {strides = array<i32>} : memref<256x32xf32, #tpu.memory_space<vmem>>, vector<256x32xf32>,
    %c2_110 = arith.constant 2 : index
    %c2_111 = arith.constant 2 : index
    %c0_112 = arith.constant 0 : index
    %94 = vector.load %arg8[%c2_110, %c2_111, %c0_112] : memref<18x18x32xf32, #tpu.memory_space<vmem>>, vector<16x16x32xf32>
    %c0_113 = arith.constant 0 : index
    %c0_114 = arith.constant 0 : index
    %95 = vector.load %arg9[%c0_113, %c0_114] : memref<256x32xf32, #tpu.memory_space<vmem>>, vector<256x32xf32>
    %96 = vector.shape_cast %94 : vector<16x16x32xf32> to vector<256x32xf32>
    %97 = arith.truncf %96 : vector<256x32xf32> to vector<256x32xbf16>
    %c2_115 = arith.constant 2 : index
    %c2_116 = arith.constant 2 : index
    %c0_117 = arith.constant 0 : index
    %c0_118 = arith.constant 0 : index
    %98 = vector.load %arg4[%c2_115, %c2_116, %c0_117, %c0_118] : memref<3x3x32x32xbf16, #tpu.memory_space<vmem>>, vector<1x1x32x32xbf16>
    %99 = vector.shape_cast %98 : vector<1x1x32x32xbf16> to vector<32x32xbf16>
    %cst_119 = arith.constant dense<0.000000e+00> : vector<256x32xf32>
    %100 = tpu.matmul %97, %99, %cst_119 {dimension_numbers = #tpu.dot_dimension_numbers<[1], [0], [0], [1], [0, 0, 1, 1], [], []>} : vector<256x32xbf16>, vector<32x32xbf16>, vector<256x32xf32> -> vector<256x32xf32>
    %101 = arith.addf %95, %100 : vector<256x32xf32>
    %c0_120 = arith.constant 0 : index
    %c0_121 = arith.constant 0 : index
    %102 = vector.load %arg9[%c0_120, %c0_121] : memref<256x32xf32, #tpu.memory_space<vmem>>, vector<256x32xf32>
    tpu.vector_store %arg9[%c0_120, %c0_121], %101 {strides = array<i32>} : memref<256x32xf32, #tpu.memory_space<vmem>>, vector<256x32xf32>,
    %c0_122 = arith.constant 0 : index
    %c0_123 = arith.constant 0 : index
    %103 = vector.load %arg9[%c0_122, %c0_123] : memref<256x32xf32, #tpu.memory_space<vmem>>, vector<256x32xf32>
    %104 = vector.shape_cast %103 : vector<256x32xf32> to vector<1x16x16x32xf32>
    %c0_124 = arith.constant 0 : index
    %c0_125 = arith.constant 0 : index
    %c0_126 = arith.constant 0 : index
    %c0_127 = arith.constant 0 : index
    %105 = vector.load %arg5[%c0_124, %c0_125, %c0_126, %c0_127] : memref<1x16x16x32xf32, #tpu.memory_space<vmem>>, vector<1x16x16x32xf32>
    tpu.vector_store %arg5[%c0_124, %c0_125, %c0_126, %c0_127], %104 {strides = array<i32>} : memref<1x16x16x32xf32, #tpu.memory_space<vmem>>, vector<1x16x16x32xf32>,
    %c0_128 = arith.constant 0 : index
    %c0_129 = arith.constant 0 : index
    %106 = vector.load %arg6[%c0_128, %c0_129] : memref<1x32xf32, #tpu.memory_space<vmem>>, vector<1x32xf32>
    %cst_130 = arith.constant dense<0.000000e+00> : vector<32xf32>
    %107 = vector.multi_reduction <add>, %103, %cst_130 [0] : vector<256x32xf32> to vector<32xf32>
    %108 = vector.shape_cast %107 : vector<32xf32> to vector<1x32xf32>
    %109 = arith.addf %106, %108 : vector<1x32xf32>
    %c0_131 = arith.constant 0 : index
    %c0_132 = arith.constant 0 : index
    %110 = vector.load %arg6[%c0_131, %c0_132] : memref<1x32xf32, #tpu.memory_space<vmem>>, vector<1x32xf32>
    tpu.vector_store %arg6[%c0_131, %c0_132], %109 {strides = array<i32>} : memref<1x32xf32, #tpu.memory_space<vmem>>, vector<1x32xf32>,
    %c0_133 = arith.constant 0 : index
    %c0_134 = arith.constant 0 : index
    %111 = vector.load %arg7[%c0_133, %c0_134] : memref<1x32xf32, #tpu.memory_space<vmem>>, vector<1x32xf32>
    %112 = arith.mulf %103, %103 : vector<256x32xf32>
    %cst_135 = arith.constant dense<0.000000e+00> : vector<32xf32>
    %113 = vector.multi_reduction <add>, %112, %cst_135 [0] : vector<256x32xf32> to vector<32xf32>
    %114 = vector.shape_cast %113 : vector<32xf32> to vector<1x32xf32>
    %115 = arith.addf %111, %114 : vector<1x32xf32>
    %c0_136 = arith.constant 0 : index
    %c0_137 = arith.constant 0 : index
    %116 = vector.load %arg7[%c0_136, %c0_137] : memref<1x32xf32, #tpu.memory_space<vmem>>, vector<1x32xf32>
    tpu.vector_store %arg7[%c0_136, %c0_137], %115 {strides = array<i32>} : memref<1x32xf32, #tpu.memory_space<vmem>>, vector<1x32xf32>,
    return
  }
  func.func @transform_0(%arg0: i32) -> (i32, i32, i32, i32) {
    %c0_i32 = arith.constant 0 : i32
    %c0_i32_0 = arith.constant 0 : i32
    %c0_i32_1 = arith.constant 0 : i32
    %c0_i32_2 = arith.constant 0 : i32
    return %arg0, %c0_i32, %c0_i32_0, %c0_i32_1 : i32, i32, i32, i32
  }
  func.func @transform_1(%arg0: i32) -> (i32, i32) {
    %c0_i32 = arith.constant 0 : i32
    %c0_i32_0 = arith.constant 0 : i32
    %c0_i32_1 = arith.constant 0 : i32
    return %c0_i32, %c0_i32_0 : i32, i32
  }
  func.func @transform_2(%arg0: i32) -> (i32, i32) {
    %c0_i32 = arith.constant 0 : i32
    %c0_i32_0 = arith.constant 0 : i32
    %c0_i32_1 = arith.constant 0 : i32
    return %c0_i32, %c0_i32_0 : i32, i32
  }
  func.func @transform_3(%arg0: i32) -> (i32, i32, i32, i32) {
    %c0_i32 = arith.constant 0 : i32
    %c0_i32_0 = arith.constant 0 : i32
    %c0_i32_1 = arith.constant 0 : i32
    %c0_i32_2 = arith.constant 0 : i32
    %c0_i32_3 = arith.constant 0 : i32
    return %c0_i32, %c0_i32_0, %c0_i32_1, %c0_i32_2 : i32, i32, i32, i32
  }
  func.func @transform_4(%arg0: i32) -> (i32, i32, i32, i32) {
    %c0_i32 = arith.constant 0 : i32
    %c0_i32_0 = arith.constant 0 : i32
    %c0_i32_1 = arith.constant 0 : i32
    %c0_i32_2 = arith.constant 0 : i32
    return %arg0, %c0_i32, %c0_i32_0, %c0_i32_1 : i32, i32, i32, i32
  }
  func.func @transform_5(%arg0: i32) -> (i32, i32) {
    %c0_i32 = arith.constant 0 : i32
    %c0_i32_0 = arith.constant 0 : i32
    %c0_i32_1 = arith.constant 0 : i32
    return %c0_i32, %c0_i32_0 : i32, i32
  }
  func.func @transform_6(%arg0: i32) -> (i32, i32) {
    %c0_i32 = arith.constant 0 : i32
    %c0_i32_0 = arith.constant 0 : i32
    %c0_i32_1 = arith.constant 0 : i32
    return %c0_i32, %c0_i32_0 : i32, i32
  }
}

module attributes {stable_mosaic.version = 11 : i64} {
  func.func @_bn_add_relu_kernel(%arg0: i32, %arg1: memref<128x128xf32, #tpu.memory_space<vmem>>, %arg2: memref<1x128xf32, #tpu.memory_space<vmem>>, %arg3: memref<1x128xf32, #tpu.memory_space<vmem>>, %arg4: memref<128x128xf32, #tpu.memory_space<vmem>>, %arg5: memref<128x128xf32, #tpu.memory_space<vmem>>) attributes {dimension_semantics = [#tpu.dimension_semantics<parallel>], iteration_bounds = array<i64: 4>, scalar_prefetch = 0 : i64, scratch_operands = 0 : i64, tpu.core_type = #tpu.core_type<tc>, window_params = [{transform_indices = @transform_0, window_bounds = array<i64: 128, 128>}, {pipeline_mode = #tpu.pipeline_mode<synchronous>, transform_indices = @transform_1, window_bounds = array<i64: 1, 128>}, {pipeline_mode = #tpu.pipeline_mode<synchronous>, transform_indices = @transform_2, window_bounds = array<i64: 1, 128>}, {transform_indices = @transform_3, window_bounds = array<i64: 128, 128>}, {transform_indices = @transform_4, window_bounds = array<i64: 128, 128>}]} {
    %c0 = arith.constant 0 : index
    %c0_0 = arith.constant 0 : index
    %0 = vector.load %arg1[%c0, %c0_0] : memref<128x128xf32, #tpu.memory_space<vmem>>, vector<128x128xf32>
    %c0_1 = arith.constant 0 : index
    %c0_2 = arith.constant 0 : index
    %1 = vector.load %arg2[%c0_1, %c0_2] : memref<1x128xf32, #tpu.memory_space<vmem>>, vector<1x128xf32>
    %2 = vector.broadcast %1 : vector<1x128xf32> to vector<128x128xf32>
    %3 = arith.mulf %0, %2 : vector<128x128xf32>
    %c0_3 = arith.constant 0 : index
    %c0_4 = arith.constant 0 : index
    %4 = vector.load %arg3[%c0_3, %c0_4] : memref<1x128xf32, #tpu.memory_space<vmem>>, vector<1x128xf32>
    %5 = vector.broadcast %4 : vector<1x128xf32> to vector<128x128xf32>
    %6 = arith.addf %3, %5 : vector<128x128xf32>
    %c0_5 = arith.constant 0 : index
    %c0_6 = arith.constant 0 : index
    %7 = vector.load %arg4[%c0_5, %c0_6] : memref<128x128xf32, #tpu.memory_space<vmem>>, vector<128x128xf32>
    %8 = arith.addf %6, %7 : vector<128x128xf32>
    %cst = arith.constant 0.000000e+00 : f32
    %9 = vector.broadcast %cst : f32 to vector<128x128xf32>
    %10 = arith.maximumf %8, %9 : vector<128x128xf32>
    %c0_7 = arith.constant 0 : index
    %c0_8 = arith.constant 0 : index
    %11 = vector.load %arg5[%c0_7, %c0_8] : memref<128x128xf32, #tpu.memory_space<vmem>>, vector<128x128xf32>
    tpu.vector_store %arg5[%c0_7, %c0_8], %10 {strides = array<i32>} : memref<128x128xf32, #tpu.memory_space<vmem>>, vector<128x128xf32>,
    return
  }
  func.func @transform_0(%arg0: i32) -> (i32, i32) {
    %c0_i32 = arith.constant 0 : i32
    %c0_i32_0 = arith.constant 0 : i32
    return %arg0, %c0_i32 : i32, i32
  }
  func.func @transform_1(%arg0: i32) -> (i32, i32) {
    %c0_i32 = arith.constant 0 : i32
    %c0_i32_0 = arith.constant 0 : i32
    %c0_i32_1 = arith.constant 0 : i32
    return %c0_i32, %c0_i32_0 : i32, i32
  }
  func.func @transform_2(%arg0: i32) -> (i32, i32) {
    %c0_i32 = arith.constant 0 : i32
    %c0_i32_0 = arith.constant 0 : i32
    %c0_i32_1 = arith.constant 0 : i32
    return %c0_i32, %c0_i32_0 : i32, i32
  }
  func.func @transform_3(%arg0: i32) -> (i32, i32) {
    %c0_i32 = arith.constant 0 : i32
    %c0_i32_0 = arith.constant 0 : i32
    return %arg0, %c0_i32 : i32, i32
  }
  func.func @transform_4(%arg0: i32) -> (i32, i32) {
    %c0_i32 = arith.constant 0 : i32
    %c0_i32_0 = arith.constant 0 : i32
    return %arg0, %c0_i32 : i32, i32
  }
}

</mosaic_0001>

<bundles_post_ra>
// kernel: block_forward.7
= control target key start
LH: loop header
LB: loop body
LE: loop exit
PB: predicated region body
PF: predicated region fallthrough
CT: control target
= control target key end

     0   :  { %9 = vsyncpa [#allocation3], 0  ;;  %s794_s0 = inlined_call_operand.vmem [shape: f32[512,128], index: 0, kind: input, shape index: {}]   ;;  %s795_s1 = inlined_call_operand.vmem [shape: f32[1,128], index: 1, kind: input, shape index: {}]   ;;  %s796_s2 = inlined_call_operand.vmem [shape: f32[1,128], index: 2, kind: input, shape index: {}]   ;;  %s797_s3 = inlined_call_operand.vmem [shape: f32[512,128], index: 3, kind: input, shape index: {}]   ;;  %s798_s4 = inlined_call_operand.hbm [shape: f32[512,128], index: 4, kind: output, shape index: {}]  }
   0x1   :  { %11 = vsyncpa [#allocation3 + $0x1], 0  ;;  %s585_s15 = smov 0   ;;  %s587_s16 = smov 0  }
   0x2   :  { %s589_s17 = smov 0   ;;  %s591_s18 = smov 0  }
   0x3 LB: > { %s606_s19 = sadd.s32 4294967295, %s555_s18   ;;  %s435_s20 = sadd.s32 4294967294, %s555_s18   ;;  %s555_s18 = sphi %s591_s18, %s804_s18   ;;  %s551_s17 = sphi %s589_s17, %s803_s17   ;;  %s547_s16 = sphi %s587_s16, %s802_s16   ;;  %s543_s15 = sphi %s585_s15, %s801_s15  }
   0x4   : > { %s610_s21 = sadd.s32 1, %s555_s18   ;;  %s118_s22 = sadd.s32 1, %s551_s17 }
   0x5   : > { %s115_s23 = ssub.s32 %s555_s18, %s610_s21  ;;  %p128_p0 = scmp.ne.s32.totalorder %s551_s17, %s547_s16 }
   0x6   : > { %p116_p1 = scmp.eq.s32.totalorder %s115_s23, 0  ;;  %p129_p2 = scmp.eq.s32.totalorder %s606_s19, 3 }
   0x7   : > { %p134_p3 = scmp.ne.s32.totalorder %s547_s16, %s543_s15  ;;  %p135_p4 = scmp.eq.s32.totalorder %s435_s20, 3 }
   0x8   : > { %s621_s24 = scalar_select %p116_p1, %s551_s17, %s118_s22  }
   0x9   : > { %p623_p5 = por %p129_p2, %p128_p0  ;;  %p627_p6 = por %p135_p4, %p134_p3 }
   0xa   : > { %p438_p7 = scmp.ge.s32.totalorder %s555_s18, 1  ;;  %p177_p8 = scmp.lt.s32.totalorder %s555_s18, 5 }
   0xc   : > { %p178_p9 = pnand %p438_p7, %p177_p8 }
   0xd   : > { %s440_s27 = sshll.u32 (!%p178_p9), %s606_s19, 4  ;;  %v637_v0 = vld [vmem:[%s795_s1] ss:$0 sm:$0xff] (!%p178_p9)  ;;  %s205_s11 = sand.u32 (!%p178_p9), 1, %s547_s16  }
   0xe   : > { %181 = sbr.rel (%p178_p9) target bundleno = 61 (0x3d), region = 36  ;;  %p209_p10 = scmp.lt.s32.totalorder (!%p178_p9), %s440_s27, 63  ;;  %v654_v2 = vld [vmem:[%s796_s2] ss:$0 sm:$0xff] (!%p178_p9) }
   0xf   : > { %s667_s14 = sshll.u32 (!%p178_p9), %s205_s11, 7  ;;  %s451_s22 = sshll.u32 (!%p178_p9), %s606_s19, 11 }
  0x10   : > { %s697_s20 = scalar_lea.vmem (!%p178_p9), [#allocation2], %s667_s14  ;;  %s744_s29 = scalar_lea.hbm (!%p178_p9), %s798_s4, %s451_s22 }
  0x11   : > { %s361_s23 = sshll.u32 (!%p178_p9), %s697_s20, 4  ;;  %s753_s19 = scalar_lea.sflag (!%p178_p9), [#allocation3], %s205_s11  ;;  %s746_s23 = int_to_ptr.vmem [resolvable:$true] %s361_s23 }
  0x12   : > { %s493_s30 = scalar_lea.vmem (!%p178_p9), %s746_s23, 2048  ;;  %s557_s5 = smov (!%p178_p9), [#allocation2]  }
  0x13   : > { %p494_p11 = scmp.ne.s32.totalorder (!%p178_p9), %s746_s23, %s493_s30  ;;  %s497_s6 = sshll.u32 (!%p178_p9), %s557_s5, 4  ;;  %s498_s6 = int_to_ptr.vmem [resolvable:$false] %s497_s6 }
  0x14   : > { %p500_p0 = scmp.lt.s32.totalorder (!%p178_p9), %s746_s23, %s498_s6 }
  0x15   : > { %s806_s27 = smov (!%p209_p10, %s440_s27), 63  ;;  %p495_p12 = pnand %p494_p11, %p623_p5 }
  0x16   : > { %s441_s28 = sshll.u32 %s806_s27, 3 }
  0x17   : > { %s642_s7 = scalar_lea.vmem %s794_s0, %s441_s28  ;;  %s647_s10 = scalar_lea.vmem %s797_s3, %s441_s28 }
  0x18   : > { %v221_v1 = vld [vmem:[%s642_s7] sm:$0xff]  ;;  %v222_v3 = vld [vmem:[%s642_s7 + $0x8] sm:$0xff]  ;;  %v223_v7 = vld [vmem:[%s642_s7 + $0x10] sm:$0xff]  ;;  %p496_p13 = pneg %p495_p12 }
  0x19   : > { %v244_v4 = vmul.f32 %v637_v0, %v221_v1  ;;  %v283_v5 = vld [vmem:[%s647_s10] sm:$0xff]  ;;  %v245_v6 = vmul.f32 %v637_v0, %v222_v3  ;;  %v284_v8 = vld [vmem:[%s647_s10 + $0x8] sm:$0xff]  ;;  %v246_v9 = vmul.f32 %v637_v0, %v223_v7  ;;  %v224_v10 = vld [vmem:[%s642_s7 + $0x18] sm:$0xff] }
  0x1a   : > { %v225_v11 = vld [vmem:[%s642_s7 + $0x20] sm:$0xff]  ;;  %v285_v14 = vld [vmem:[%s647_s10 + $0x10] sm:$0xff]  ;;  %v247_v15 = vmul.f32 %v637_v0, %v224_v10  ;;  %v286_v16 = vld [vmem:[%s647_s10 + $0x18] sm:$0xff] }
  0x1b   : > { %v267_v12 = vadd.f32 %v654_v2, %v244_v4  ;;  %v268_v13 = vadd.f32 %v654_v2, %v245_v6  ;;  %v248_v17 = vmul.f32 %v637_v0, %v225_v11  ;;  %v226_v18 = vld [vmem:[%s642_s7 + $0x28] sm:$0xff]  ;;  %v269_v19 = vadd.f32 %v654_v2, %v246_v9  ;;  %v287_v20 = vld [vmem:[%s647_s10 + $0x20] sm:$0xff]  ;;  %v227_v22 = vld [vmem:[%s642_s7 + $0x30] sm:$0xff] }
  0x1c   : > { %v249_v21 = vmul.f32 %v637_v0, %v226_v18  ;;  %v228_v23 = vld [vmem:[%s642_s7 + $0x38] sm:$0xff]  ;;  %v270_v26 = vadd.f32 %v654_v2, %v247_v15  ;;  %v288_v28 = vld [vmem:[%s647_s10 + $0x28] sm:$0xff]  ;;  %v250_v31 = vmul.f32 %v637_v0, %v227_v22  ;;  %v229_v33 = vld [vmem:[%s642_s7 + $0x40] sm:$0xff] }
  0x1d   : > { %v299_v24 = vadd.f32 %v283_v5, %v267_v12  ;;  %v300_v25 = vadd.f32 %v284_v8, %v268_v13  ;;  %v271_v27 = vadd.f32 %v654_v2, %v248_v17  ;;  %v301_v29 = vadd.f32 %v285_v14, %v269_v19  ;;  %v230_v34 = vld [vmem:[%s642_s7 + $0x48] sm:$0xff]  ;;  %v289_v39 = vld [vmem:[%s647_s10 + $0x30] sm:$0xff]  ;;  %v290_v40 = vld [vmem:[%s647_s10 + $0x38] sm:$0xff] }
  0x1e   : > { %v272_v30 = vadd.f32 %v654_v2, %v249_v21  ;;  %v251_v32 = vmul.f32 %v637_v0, %v228_v23  ;;  %v302_v37 = vadd.f32 %v286_v16, %v270_v26  ;;  %v231_v41 = vld [vmem:[%s642_s7 + $0x50] sm:$0xff]  ;;  %v273_v44 = vadd.f32 %v654_v2, %v250_v31  ;;  %v232_v46 = vld [vmem:[%s642_s7 + $0x58] sm:$0xff]  ;;  %v233_v47 = vld [vmem:[%s642_s7 + $0x60] sm:$0xff] }
  0x1f   : > { %v315_v35 = vmax.f32 %v299_v24, 0.0  ;;  %v316_v36 = vmax.f32 %v300_v25, 0.0  ;;  %v303_v38 = vadd.f32 %v287_v20, %v271_v27  ;;  %v317_v42 = vmax.f32 %v301_v29, 0.0  ;;  %v234_v52 = vld [vmem:[%s642_s7 + $0x68] sm:$0xff]  ;;  %v291_v56 = vld [vmem:[%s647_s10 + $0x40] sm:$0xff]  ;;  %v293_v61 = vld [vmem:[%s647_s10 + $0x50] sm:$0xff] }
  0x20   : > { %v304_v43 = vadd.f32 %v288_v28, %v272_v30  ;;  %v274_v45 = vadd.f32 %v654_v2, %v251_v32  ;;  %v318_v48 = vmax.f32 %v302_v37, 0.0  ;;  %v252_v50 = vmul.f32 %v637_v0, %v229_v33  ;;  %v292_v57 = vld [vmem:[%s647_s10 + $0x48] sm:$0xff]  ;;  %v235_v1 = vld [vmem:[%s642_s7 + $0x70] sm:$0xff]  ;;  %v236_v3 = vld [vmem:[%s642_s7 + $0x78] sm:$0xff]  ;;  %s499_s7 = scalar_lea.vmem %s498_s6, 4096 }
  0x21   : > { %331 = vst [vmem:[%s697_s20] sm:$0xff] %v315_v35  ;;  %332 = vst [vmem:[%s697_s20 + $0x8] sm:$0xff] %v316_v36  ;;  %v319_v49 = vmax.f32 %v303_v38, 0.0  ;;  %v253_v51 = vmul.f32 %v637_v0, %v230_v34  ;;  %v305_v54 = vadd.f32 %v289_v39, %v273_v44  ;;  %v254_v58 = vmul.f32 %v637_v0, %v231_v41  ;;  %v294_v7 = vld [vmem:[%s647_s10 + $0x58] sm:$0xff]  ;;  %v295_v8 = vld [vmem:[%s647_s10 + $0x60] sm:$0xff]  ;;  %p501_p1 = scmp.lt.s32.totalorder %s499_s7, %s493_s30 }
  0x22   : > { %333 = vst [vmem:[%s697_s20 + $0x10] sm:$0xff] %v317_v42  ;;  %v320_v53 = vmax.f32 %v304_v43, 0.0  ;;  %v306_v55 = vadd.f32 %v290_v40, %v274_v45  ;;  %334 = vst [vmem:[%s697_s20 + $0x18] sm:$0xff] %v318_v48  ;;  %v275_v59 = vadd.f32 %v654_v2, %v252_v50  ;;  %v255_v62 = vmul.f32 %v637_v0, %v232_v46  ;;  %v296_v14 = vld [vmem:[%s647_s10 + $0x68] sm:$0xff]  ;;  %v297_v23 = vld [vmem:[%s647_s10 + $0x70] sm:$0xff] }
  0x23   : > { %335 = vst [vmem:[%s697_s20 + $0x20] sm:$0xff] %v319_v49  ;;  %v276_v60 = vadd.f32 %v654_v2, %v253_v51  ;;  %v256_v63 = vmul.f32 %v637_v0, %v233_v47  ;;  %v321_v4 = vmax.f32 %v305_v54, 0.0  ;;  %v277_v6 = vadd.f32 %v654_v2, %v254_v58  ;;  %v298_v24 = vld [vmem:[%s647_s10 + $0x78] sm:$0xff]  ;;  %p502_p2 = por %p501_p1, %p500_p0 }
  0x24   : > { %336 = vst [vmem:[%s697_s20 + $0x28] sm:$0xff] %v320_v53  ;;  %v322_v5 = vmax.f32 %v306_v55, 0.0  ;;  %v257_v9 = vmul.f32 %v637_v0, %v234_v52  ;;  %v307_v10 = vadd.f32 %v291_v56, %v275_v59  ;;  %v278_v12 = vadd.f32 %v654_v2, %v255_v62 }
  0x25   : > { %v308_v11 = vadd.f32 %v292_v57, %v276_v60  ;;  %v279_v13 = vadd.f32 %v654_v2, %v256_v63  ;;  %337 = vst [vmem:[%s697_s20 + $0x30] sm:$0xff] %v321_v4  ;;  %v309_v15 = vadd.f32 %v293_v61, %v277_v6  ;;  %v258_v17 = vmul.f32 %v637_v0, %v235_v1  ;;  %p503_p3 = pnand %p502_p2, %p496_p13 }
  0x26   : > { %338 = vst [vmem:[%s697_s20 + $0x38] sm:$0xff] %v322_v5  ;;  %v280_v16 = vadd.f32 %v654_v2, %v257_v9  ;;  %v259_v18 = vmul.f32 %v637_v0, %v236_v3  ;;  %v323_v19 = vmax.f32 %v307_v10, 0.0  ;;  %v310_v21 = vadd.f32 %v294_v7, %v278_v12 }
  0x27   : > { %v324_v20 = vmax.f32 %v308_v11, 0.0  ;;  %v311_v22 = vadd.f32 %v295_v8, %v279_v13  ;;  %v325_v25 = vmax.f32 %v309_v15, 0.0  ;;  %v281_v27 = vadd.f32 %v654_v2, %v258_v17 }
  0x28   : > { %v312_v26 = vadd.f32 %v296_v14, %v280_v16  ;;  %v282_v28 = vadd.f32 %v654_v2, %v259_v18  ;;  %339 = vst [vmem:[%s697_s20 + $0x40] sm:$0xff] %v323_v19  ;;  %v326_v0 = vmax.f32 %v310_v21, 0.0 }
  0x29   : > { %340 = vst [vmem:[%s697_s20 + $0x48] sm:$0xff] %v324_v20  ;;  %v327_v29 = vmax.f32 %v311_v22, 0.0  ;;  %341 = vst [vmem:[%s697_s20 + $0x50] sm:$0xff] %v325_v25  ;;  %v313_v31 = vadd.f32 %v297_v23, %v281_v27 }
  0x2a   : > { %v328_v30 = vmax.f32 %v312_v26, 0.0  ;;  %v314_v32 = vadd.f32 %v298_v24, %v282_v28  ;;  %342 = vst [vmem:[%s697_s20 + $0x58] sm:$0xff] %v326_v0 }
  0x2b   : > { %343 = vst [vmem:[%s697_s20 + $0x60] sm:$0xff] %v327_v29  ;;  %v329_v2 = vmax.f32 %v313_v31, 0.0 }
  0x2c   : > { %344 = vst [vmem:[%s697_s20 + $0x68] sm:$0xff] %v328_v30  ;;  %v330_v33 = vmax.f32 %v314_v32, 0.0 }
  0x2d   : > { %345 = vst [vmem:[%s697_s20 + $0x70] sm:$0xff] %v329_v2 }
  0x2e   : > { %346 = vst [vmem:[%s697_s20 + $0x78] sm:$0xff] %v330_v33 }
  0x2f   : > { %506 = shalt.err (!%p503_p3)
}
  0x30   : > { %s507_s8 = scalar_lea.hbm %s744_s29, 2048  ;;  %s511_s11 = scalar_lea.hbm %s798_s4, 8192 }
  0x31   : > { %p508_p4 = scmp.ne.s32.totalorder %s744_s29, %s507_s8  ;;  %p512_p9 = scmp.lt.u32.totalorder %s744_s29, %s798_s4 }
  0x32   : > { %p513_p10 = scmp.lt.u32.totalorder %s511_s11, %s507_s8  ;;  %p515_p12 = scmp.lt.u32.totalorder %s507_s8, %s744_s29 }
  0x33   : > { %p509_p7 = pnand %p508_p4, %p623_p5 }
  0x34   : > { %p514_p11 = por %p513_p10, %p512_p9 }
  0x35   : > { %p510_p8 = pneg %p509_p7 }
  0x36   : > { %p516_p13 = por %p515_p12, %p514_p11 }
  0x38   : > { %p517_p0 = pnand %p516_p13, %p510_p8 }
  0x3a   : > { %520 = shalt.err (!%p517_p0)
}
  0x3b   : > { %s558_s14 = smov 128   ;;  %s559_s20 = smov 8  }
  0x3c   : > { %452 = dma.vmem_to_hbm [thread:$0]  (%p623_p5), %s746_s23, 2048, %s744_s29, %s753_s19, %s558_s14, %s558_s14, %s559_s20  }
  0x3d PF: > { %p458_p1 = scmp.ge.s32.totalorder %s555_s18, 2  ;;  %s376_s22 = sand.u32 1, %s543_s15  }
  0x3e   : > { %s377_s27 = scalar_lea.sflag [#allocation3], %s376_s22 }
  0x3f   : > { %p455_p2 = pnand %p458_p1, %p627_p6 }
  0x41   : > { %538 = dma.done.wait (!%p455_p2), %s377_s27, 2048  }
  0x42   : > { %540 = vsyncadd (!%p455_p2), %s377_s27, 4294965248  ;;  %p14_p3 = scmp.ge.s32.totalorder %s610_s21, 6   ;;  %s801_s15 = smov %s547_s16 }
  0x43   : > { %s802_s16 = smov %s551_s17  ;;  %s803_s17 = smov %s621_s24 }
  0x44   : > { %s804_s18 = smov %s610_s21  ;;  %16 = sbr.rel (!%p14_p3) target bundleno = 3 (0x3), region = 74 }
  0x4b   :  { %382 = vsyncpa [#allocation3], 1 }
  0x4c   :  { %384 = vsyncpa [#allocation3 + $0x1], 1 }

// kernel: block_forward.6
= control target key start
LH: loop header
LB: loop body
LE: loop exit
PB: predicated region body
PF: predicated region fallthrough
CT: control target
= control target key end

     0   :  { %s742_s21 = smov 0   ;;  %s869_s0 = inlined_call_operand.vmem [shape: f32[512,32], index: 0, kind: input, shape index: {}]   ;;  %s870_s1 = inlined_call_operand.vmem [shape: f32[1,32], index: 1, kind: input, shape index: {}]   ;;  %s871_s2 = inlined_call_operand.vmem [shape: f32[1,32], index: 2, kind: input, shape index: {}]   ;;  %s872_s3 = inlined_call_operand.vmem [shape: bf16[32,128], index: 3, kind: input, shape index: {}]   ;;  %s873_s4 = inlined_call_operand.vmem [shape: f32[512,128], index: 4, kind: output, shape index: {0}]   ;;  %s874_s5 = inlined_call_operand.vmem [shape: f32[1,128], index: 5, kind: output, shape index: {1}]   ;;  %s875_s6 = inlined_call_operand.vmem [shape: f32[1,128], index: 6, kind: output, shape index: {2}]  }
   0x1 LB: > { %s629_s22 = sadd.s32 4294967295, %s704_s21   ;;  %p633_p0 = scmp.ge.s32.totalorder %s704_s21, 1  ;;  %s704_s21 = sphi %s742_s21, %s17_s21  }
   0x2   : > { %p208_p1 = scmp.lt.s32.totalorder %s704_s21, 5 }
   0x4   : > { %p209_p2 = pnand %p633_p0, %p208_p1 }
   0x5   : > { %s634_s23 = sshll.u32 (!%p209_p2), %s629_s22, 4  ;;  %p638_p4 = scmp.ne.s32.totalorder (!%p209_p2), %s629_s22, 0 }
   0x6   : > { %212 = sbr.rel (%p209_p2) target bundleno = 294 (0x126), region = 36  ;;  %p239_p3 = scmp.lt.s32.totalorder (!%p209_p2), %s634_s23, 63 }
   0xd   : > { %s877_s23 = smov (!%p239_p3, %s634_s23), 63  ;;  %254 = sbr.rel (%p638_p4) target bundleno = 20 (0x14), region = 40 }
   0xe   : > { %s635_s24 = sshll.u32 %s877_s23, 3  ;;  %v706_v0 = vmov (!%p638_p4), 0.0  }
   0xf   : > { %s753_s27 = scalar_lea.vmem %s869_s0, %s635_s24  ;;  %s758_s30 = scalar_lea.vmem %s873_s4, %s635_s24  ;;  %255 = vst [vmem:[%s874_s5] sm:$0x1] (!%p638_p4), %v706_v0  ;;  %256 = vst [vmem:[%s875_s6] sm:$0x1] (!%p638_p4), %v706_v0 }
  0x14 PF: > { %v696_v1 = vld [vmem:[%s872_s3] sm:$0xff]   ;;  %v697_v2 = vld [vmem:[%s872_s3 + $0x8] sm:$0xff]   ;;  %v259_v9 = vld [vmem:[%s753_s27 + $0x10] sm:$0xff]  ;;  %vm359_vm0 = vcmask 261120  }
  0x15   : > { %663 = vmatprep.subr.bf16.mxu0 %v696_v1  ;;  %v257_v3 = vld [vmem:[%s753_s27] sm:$0xff]  ;;  %v258_v4 = vld [vmem:[%s753_s27 + $0x8] sm:$0xff]  ;;  %683 = vmatprep.subr.bf16.mxu1 %v696_v1  ;;  %v260_v10 = vld [vmem:[%s753_s27 + $0x18] sm:$0xff] }
  0x16   : > { %v777_v5 = vld [vmem:[%s870_s1] ss:$0 sm:$0xff]  ;;  %664 = vmatpush3.bf16.msra.mxu0 %v696_v1  ;;  %685 = vmatpush3.bf16.msra.mxu1 %v696_v1  ;;  %v262_v14 = vld [vmem:[%s753_s27 + $0x28] sm:$0xff]  ;;  %v263_v15 = vld [vmem:[%s753_s27 + $0x30] sm:$0xff] }
  0x17   : > { %v280_v6 = vmul.f32 %v777_v5, %v257_v3  ;;  %v281_v7 = vmul.f32 %v777_v5, %v258_v4  ;;  %v784_v8 = vld [vmem:[%s871_s2] ss:$0 sm:$0xff]  ;;  %665 = vmatprep.subr.bf16.mxu0 %v697_v2  ;;  %v282_v11 = vmul.f32 %v777_v5, %v259_v9  ;;  %v283_v12 = vmul.f32 %v777_v5, %v260_v10  ;;  %v264_v20 = vld [vmem:[%s753_s27 + $0x38] sm:$0xff]  ;;  %v266_v30 = vld [vmem:[%s753_s27 + $0x48] sm:$0xff] }
  0x18   : > { %v261_v13 = vld [vmem:[%s753_s27 + $0x20] sm:$0xff]  ;;  %684 = vmatprep.subr.bf16.mxu1 %v697_v2  ;;  %v285_v19 = vmul.f32 %v777_v5, %v262_v14  ;;  %v286_v23 = vmul.f32 %v777_v5, %v263_v15  ;;  %v287_v24 = vmul.f32 %v777_v5, %v264_v20  ;;  %v267_v35 = vld [vmem:[%s753_s27 + $0x50] sm:$0xff]  ;;  %v268_v36 = vld [vmem:[%s753_s27 + $0x58] sm:$0xff]  ;;  %v289_v46 = vmul.f32 %v777_v5, %v266_v30 }
  0x19   : > { %v303_v16 = vadd.f32 %v784_v8, %v280_v6  ;;  %v304_v17 = vadd.f32 %v784_v8, %v281_v7  ;;  %v284_v18 = vmul.f32 %v777_v5, %v261_v13  ;;  %v305_v21 = vadd.f32 %v784_v8, %v282_v11  ;;  %v265_v25 = vld [vmem:[%s753_s27 + $0x40] sm:$0xff]  ;;  %v270_v42 = vld [vmem:[%s753_s27 + $0x68] sm:$0xff]  ;;  %v271_v47 = vld [vmem:[%s753_s27 + $0x70] sm:$0xff] }
  0x1a   : > { %v306_v22 = vadd.f32 %v784_v8, %v283_v12  ;;  %666 = vmatpush3.bf16.msra.mxu0 %v697_v2  ;;  %v308_v29 = vadd.f32 %v784_v8, %v285_v19  ;;  %686 = vmatpush3.bf16.msra.mxu1 %v697_v2  ;;  %v309_v33 = vadd.f32 %v784_v8, %v286_v23  ;;  %v269_v41 = vld [vmem:[%s753_s27 + $0x60] sm:$0xff]  ;;  %v272_v52 = vld [vmem:[%s753_s27 + $0x78] sm:$0xff] }
  0x1b   : > { %v319_v26 = vmax.f32 %v303_v16, 0.0  ;;  %v320_v27 = vmax.f32 %v304_v17, 0.0  ;;  %v307_v28 = vadd.f32 %v784_v8, %v284_v18  ;;  %v321_v31 = vmax.f32 %v305_v21, 0.0 }
  0x1c   : > { %v322_v32 = vmax.f32 %v306_v22, 0.0  ;;  %v310_v34 = vadd.f32 %v784_v8, %v287_v24  ;;  %v324_v39 = vmax.f32 %v308_v29, 0.0  ;;  %v288_v40 = vmul.f32 %v777_v5, %v265_v25 }
  0x1d   : > { %v335_v37 = vpack.c.bf16 %v320_v27, %v319_v26  ;;  %v323_v38 = vmax.f32 %v307_v28, 0.0  ;;  %v325_v44 = vmax.f32 %v309_v33, 0.0  ;;  %v290_v50 = vmul.f32 %v777_v5, %v267_v35 }
  0x1e   : > { %v336_v43 = vpack.c.bf16 %v322_v32, %v321_v31  ;;  %v326_v45 = vmax.f32 %v310_v34, 0.0  ;;  %v311_v49 = vadd.f32 %v784_v8, %v288_v40  ;;  %v291_v51 = vmul.f32 %v777_v5, %v268_v36 }
  0x1f   : > { %667 = vmatprep.mubr.msk.bf16.mxu0 %vm359_vm0, %v335_v37  ;;  %v337_v48 = vpack.c.bf16 %v324_v39, %v323_v38  ;;  %v312_v53 = vadd.f32 %v784_v8, %v289_v46  ;;  %v292_v54 = vmul.f32 %v777_v5, %v269_v41  ;;  %v293_v55 = vmul.f32 %v777_v5, %v270_v42 }
  0x20   : > { %668 = vmatmul.mubr.msk.bf16.vlgmr.msra.gmra.mrb[0].mxu0 %vm359_vm0, %v336_v43  ;;  %v327_v56 = vmax.f32 %v311_v49, 0.0  ;;  %v313_v57 = vadd.f32 %v784_v8, %v290_v50  ;;  %v314_v58 = vadd.f32 %v784_v8, %v291_v51  ;;  %v294_v59 = vmul.f32 %v777_v5, %v271_v47 }
  0x21   : > { %671 = vmatprep.mubr.msk.bf16.mxu0 %vm359_vm0, %v337_v48  ;;  %v328_v60 = vmax.f32 %v312_v53, 0.0  ;;  %v315_v61 = vadd.f32 %v784_v8, %v292_v54  ;;  %v316_v62 = vadd.f32 %v784_v8, %v293_v55  ;;  %v295_v63 = vmul.f32 %v777_v5, %v272_v52 }
  0x22   : > { %v338_v0 = vpack.c.bf16 %v326_v45, %v325_v44  ;;  %v329_v1 = vmax.f32 %v313_v57, 0.0  ;;  %v330_v2 = vmax.f32 %v314_v58, 0.0  ;;  %v317_v3 = vadd.f32 %v784_v8, %v294_v59 }
  0x23   : > { %v339_v4 = vpack.c.bf16 %v328_v60, %v327_v56  ;;  %v331_v6 = vmax.f32 %v315_v61, 0.0  ;;  %v332_v7 = vmax.f32 %v316_v62, 0.0  ;;  %v318_v9 = vadd.f32 %v784_v8, %v295_v63 }
  0x24   : > { %v340_v10 = vpack.c.bf16 %v330_v2, %v329_v1  ;;  %v333_v5 = vmax.f32 %v317_v3, 0.0 }
  0x25   : > { %675 = vmatprep.mubr.msk.bf16.mxu1 %vm359_vm0, %v339_v4  ;;  %v341_v11 = vpack.c.bf16 %v332_v7, %v331_v6  ;;  %v334_v12 = vmax.f32 %v318_v9, 0.0 }
  0x26   : > { %676 = vmatmul.mubr.msk.bf16.vlgmr.msra.gmra.mrb[0].mxu1 %vm359_vm0, %v340_v10 }
  0x27   : > { %679 = vmatprep.mubr.msk.bf16.mxu1 %vm359_vm0, %v341_v11  ;;  %v342_v13 = vpack.c.bf16 %v334_v12, %v333_v5 }
  0x28   : > { %672 = vmatmul.mubr.msk.bf16.gmra.mrb[4].mxu0 %vm359_vm0, %v338_v0 }
  0x2e   : > { %680 = vmatmul.mubr.msk.bf16.gmra.mrb[4].mxu1 %vm359_vm0, %v342_v13 }
  0xf3   : > { %v669_v14 = vpop.f32.mrb[0].mxu0 }
  0xf4   : > { %483 = vst [vmem:[%s758_s30 + $0x10] sm:$0xff] %v669_v14  ;;  %v418_v8 = vpop.f32.mrb[1].mxu0  ;;  %v524_v20 = vmul.f32 %v669_v14, %v669_v14 }
  0xf5   : > { %481 = vst [vmem:[%s758_s30] sm:$0xff] %v418_v8  ;;  %v670_v15 = vpop.f32.mrb[2].mxu0  ;;  %v522_v17 = vmul.f32 %v418_v8, %v418_v8 }
  0xf6   : > { %484 = vst [vmem:[%s758_s30 + $0x18] sm:$0xff] %v670_v15  ;;  %v421_v16 = vpop.f32.mrb[3].mxu0  ;;  %v525_v24 = vmul.f32 %v670_v15, %v670_v15 }
  0xf7   : > { %482 = vst [vmem:[%s758_s30 + $0x8] sm:$0xff] %v421_v16  ;;  %v498_v18 = vadd.f32 %v421_v16, %v418_v8  ;;  %v523_v19 = vmul.f32 %v421_v16, %v421_v16 }
  0xf9   : > { %v499_v21 = vadd.f32 %v669_v14, %v498_v18  ;;  %v538_v22 = vadd.f32 %v523_v19, %v522_v17  ;;  %v677_v23 = vpop.f32.mrb[0].mxu1 }
  0xfa   : > { %491 = vst [vmem:[%s758_s30 + $0x50] sm:$0xff] %v677_v23  ;;  %v450_v28 = vpop.f32.mrb[1].mxu1  ;;  %v532_v56 = vmul.f32 %v677_v23, %v677_v23 }
  0xfb   : > { %v539_v25 = vadd.f32 %v538_v22, %v524_v20  ;;  %v673_v26 = vpop.f32.mrb[4].mxu0  ;;  %v500_v27 = vadd.f32 %v670_v15, %v499_v21  ;;  %489 = vst [vmem:[%s758_s30 + $0x40] sm:$0xff] %v450_v28  ;;  %v678_v30 = vpop.f32.mrb[2].mxu1  ;;  %v530_v47 = vmul.f32 %v450_v28, %v450_v28  ;;  %v497_v20 = vld [vmem:[%s874_s5] sm:$0x1] }
  0xfc   : > { %487 = vst [vmem:[%s758_s30 + $0x30] sm:$0xff] %v673_v26  ;;  %v434_v29 = vpop.f32.mrb[5].mxu0  ;;  %492 = vst [vmem:[%s758_s30 + $0x58] sm:$0xff] %v678_v30  ;;  %v453_v35 = vpop.f32.mrb[3].mxu1  ;;  %v528_v40 = vmul.f32 %v673_v26, %v673_v26  ;;  %v533_v59 = vmul.f32 %v678_v30, %v678_v30 }
  0xfd   : > { %485 = vst [vmem:[%s758_s30 + $0x20] sm:$0xff] %v434_v29  ;;  %v501_v31 = vadd.f32 %v500_v27, %v434_v29  ;;  %v526_v32 = vmul.f32 %v434_v29, %v434_v29  ;;  %v540_v33 = vadd.f32 %v539_v25, %v525_v24  ;;  %v674_v34 = vpop.f32.mrb[6].mxu0  ;;  %490 = vst [vmem:[%s758_s30 + $0x48] sm:$0xff] %v453_v35 }
  0xfe   : > { %488 = vst [vmem:[%s758_s30 + $0x38] sm:$0xff] %v674_v34  ;;  %v437_v36 = vpop.f32.mrb[7].mxu0  ;;  %v529_v44 = vmul.f32 %v674_v34, %v674_v34  ;;  %v531_v55 = vmul.f32 %v453_v35, %v453_v35 }
  0xff   : > { %v541_v37 = vadd.f32 %v540_v33, %v526_v32  ;;  %486 = vst [vmem:[%s758_s30 + $0x28] sm:$0xff] %v437_v36  ;;  %v502_v38 = vadd.f32 %v501_v31, %v437_v36  ;;  %v527_v39 = vmul.f32 %v437_v36, %v437_v36 }
 0x101   : > { %v503_v41 = vadd.f32 %v673_v26, %v502_v38  ;;  %v542_v42 = vadd.f32 %v541_v37, %v527_v39  ;;  %v681_v43 = vpop.f32.mrb[4].mxu1 }
 0x102   : > { %495 = vst [vmem:[%s758_s30 + $0x70] sm:$0xff] %v681_v43  ;;  %v466_v48 = vpop.f32.mrb[5].mxu1  ;;  %v536_v4 = vmul.f32 %v681_v43, %v681_v43 }
 0x103   : > { %v543_v45 = vadd.f32 %v542_v42, %v528_v40  ;;  %v504_v46 = vadd.f32 %v674_v34, %v503_v41  ;;  %493 = vst [vmem:[%s758_s30 + $0x60] sm:$0xff] %v466_v48  ;;  %v682_v49 = vpop.f32.mrb[6].mxu1  ;;  %v534_v62 = vmul.f32 %v466_v48, %v466_v48 }
 0x104   : > { %496 = vst [vmem:[%s758_s30 + $0x78] sm:$0xff] %v682_v49  ;;  %v469_v52 = vpop.f32.mrb[7].mxu1  ;;  %v537_v9 = vmul.f32 %v682_v49, %v682_v49 }
 0x105   : > { %v505_v50 = vadd.f32 %v504_v46, %v450_v28  ;;  %v544_v51 = vadd.f32 %v543_v45, %v529_v44  ;;  %494 = vst [vmem:[%s758_s30 + $0x68] sm:$0xff] %v469_v52  ;;  %v535_v3 = vmul.f32 %v469_v52, %v469_v52 }
 0x107   : > { %v545_v53 = vadd.f32 %v544_v51, %v530_v47  ;;  %v506_v54 = vadd.f32 %v505_v50, %v453_v35 }
 0x109   : > { %v507_v57 = vadd.f32 %v677_v23, %v506_v54  ;;  %v546_v58 = vadd.f32 %v545_v53, %v531_v55  ;;  %v521_v23 = vld [vmem:[%s875_s6] sm:$0x1] }
 0x10b   : > { %v547_v60 = vadd.f32 %v546_v58, %v532_v56  ;;  %v508_v61 = vadd.f32 %v678_v30, %v507_v57 }
 0x10d   : > { %v509_v63 = vadd.f32 %v508_v61, %v466_v48  ;;  %v548_v0 = vadd.f32 %v547_v60, %v533_v59 }
 0x10f   : > { %v549_v1 = vadd.f32 %v548_v0, %v534_v62  ;;  %v510_v2 = vadd.f32 %v509_v63, %v469_v52 }
 0x111   : > { %v511_v6 = vadd.f32 %v681_v43, %v510_v2  ;;  %v550_v7 = vadd.f32 %v549_v1, %v535_v3 }
 0x113   : > { %v512_v10 = vadd.f32 %v682_v49, %v511_v6  ;;  %v551_v11 = vadd.f32 %v550_v7, %v536_v4 }
 0x115   : > { %v513_v5 = vrot.slane %v512_v10, 4  ;;  %v552_v12 = vadd.f32 %v551_v11, %v537_v9 }
 0x117   : > { %v514_v13 = vadd.f32 %v513_v5, %v512_v10  ;;  %v553_v14 = vrot.slane %v552_v12, 4 }
 0x119   : > { %v515_v8 = vrot.slane %v514_v13, 2  ;;  %v554_v15 = vadd.f32 %v553_v14, %v552_v12 }
 0x11b   : > { %v516_v16 = vadd.f32 %v515_v8, %v514_v13  ;;  %v555_v17 = vrot.slane %v554_v15, 2 }
 0x11d   : > { %v517_v18 = vrot.slane %v516_v16, 1  ;;  %v556_v19 = vadd.f32 %v555_v17, %v554_v15 }
 0x11f   : > { %v518_v21 = vadd.f32 %v517_v18, %v516_v16  ;;  %v557_v22 = vrot.slane %v556_v19, 1 }
 0x121   : > { %v519_v24 = vadd.f32 %v518_v21, %v497_v20  ;;  %v558_v25 = vadd.f32 %v557_v22, %v556_v19 }
 0x123   : > { %520 = vst [vmem:[%s874_s5] sm:$0x1] %v519_v24  ;;  %v559_v26 = vadd.f32 %v558_v25, %v521_v23 }
 0x125   : > { %560 = vst [vmem:[%s875_s6] sm:$0x1] %v559_v26 }
 0x126 PF: > { %s17_s21 = sadd.s32 1, %s704_s21  }
 0x127   : > { %p14_p5 = scmp.ge.s32.totalorder %s17_s21, 6  }
 0x129   :  { %16 = sbr.rel (!%p14_p5) target bundleno = 1 (0x1), region = 86 }

// kernel: block_forward.4
= control target key start
LH: loop header
LB: loop body
LE: loop exit
PB: predicated region body
PF: predicated region fallthrough
CT: control target
= control target key end

     0   :  { %10 = vsyncpa [#allocation3], 0  ;;  %s1085_s0 = inlined_call_operand.hbm [shape: f32[512,128], index: 0, kind: input, shape index: {}]   ;;  %s1086_s1 = inlined_call_operand.vmem [shape: bf16[128,32], index: 1, kind: input, shape index: {}]   ;;  %s1087_s2 = inlined_call_operand.vmem [shape: f32[512,32], index: 2, kind: output, shape index: {0}]   ;;  %s1088_s3 = inlined_call_operand.vmem [shape: f32[1,32], index: 3, kind: output, shape index: {1}]   ;;  %s1089_s4 = inlined_call_operand.vmem [shape: f32[1,32], index: 4, kind: output, shape index: {2}]  }
   0x1   :  { %12 = vsyncpa [#allocation3 + $0x1], 0  ;;  %s833_s15 = smov 0   ;;  %s835_s16 = smov 0  }
   0x2   :  { %s837_s17 = smov 0   ;;  %s839_s18 = smov 0  }
   0x3 LB: > { %s852_s19 = sadd.s32 4294967295, %s802_s18   ;;  %s855_s20 = sadd.s32 1, %s802_s18   ;;  %s802_s18 = sphi %s839_s18, %s1096_s18   ;;  %s798_s17 = sphi %s837_s17, %s1095_s17   ;;  %s794_s16 = sphi %s835_s16, %s1094_s16   ;;  %s790_s15 = sphi %s833_s15, %s1093_s15  }
   0x4   : > { %s22_s21 = ssub.s32 %s802_s18, %s855_s20  ;;  %s25_s22 = sadd.s32 1, %s798_s17 }
   0x5   : > { %p23_p0 = scmp.eq.s32.totalorder %s22_s21, 0  ;;  %p32_p1 = scmp.ne.s32.totalorder %s798_s17, %s794_s16 }
   0x6   : > { %p33_p2 = scmp.eq.s32.totalorder %s802_s18, 0  ;;  %p38_p3 = scmp.ne.s32.totalorder %s794_s16, %s790_s15 }
   0x7   : > { %s865_s23 = scalar_select %p23_p0, %s798_s17, %s25_s22  }
   0x8   : > { %p34_p4 = por %p33_p2, %p32_p1  ;;  %p39_p5 = scmp.eq.s32.totalorder %s852_s19, 0 }
   0x9   : > { %p694_p6 = scmp.lt.s32.totalorder %s802_s18, 4  ;;  %s154_s25 = sand.u32 1, %s798_s17  }
   0xa   : > { %p869_p7 = por %p39_p5, %p38_p3  ;;  %s605_s26 = sshll.u32 %s154_s25, 7 }
   0xb   : > { %s623_s27 = sshll.u32 %s802_s18, 11  ;;  %s158_s5 = scalar_lea.vmem [#allocation2], %s605_s26 }
   0xc   : > { %s878_s30 = scalar_lea.hbm %s1085_s0, %s623_s27  ;;  %s165_s6 = sshll.u32 %s158_s5, 4  ;;  %s880_s6 = int_to_ptr.vmem [resolvable:$true] %s165_s6 }
   0xd   : > { %p882_p8 = pnand %p694_p6, %p34_p4  ;;  %s887_s8 = scalar_lea.sflag [#allocation3], %s154_s25 }
   0xe   : > { %s738_s9 = scalar_lea.hbm %s878_s30, 2048  ;;  %s743_s12 = scalar_lea.hbm %s1085_s0, 8192 }
   0xf   : > { %p739_p10 = scmp.ne.s32.totalorder %s878_s30, %s738_s9  ;;  %p740_p11 = pneg %p882_p8 }
  0x10   : > { %p744_p0 = scmp.lt.u32.totalorder %s878_s30, %s1085_s0  ;;  %p745_p1 = scmp.lt.u32.totalorder %s743_s12, %s738_s9 }
  0x11   : > { %p741_p12 = pnand %p740_p11, %p739_p10  ;;  %p747_p3 = scmp.lt.u32.totalorder %s738_s9, %s878_s30 }
  0x12   : > { %p746_p2 = por %p745_p1, %p744_p0 }
  0x13   : > { %p742_p13 = pneg %p741_p12 }
  0x14   : > { %p748_p4 = por %p747_p3, %p746_p2 }
  0x16   : > { %p749_p5 = pnand %p748_p4, %p742_p13 }
  0x18   : > { %752 = shalt.err (!%p749_p5)
}
  0x19   : > { %s753_s15 = scalar_lea.vmem %s880_s6, 2048  ;;  %s804_s21 = smov [#allocation2]  }
  0x1a   : > { %p754_p6 = scmp.ne.s32.totalorder %s880_s6, %s753_s15  ;;  %s758_s22 = sshll.u32 %s804_s21, 4  ;;  %s759_s22 = int_to_ptr.vmem [resolvable:$false] %s758_s22 }
  0x1b   : > { %s760_s25 = scalar_lea.vmem %s759_s22, 4096  ;;  %p761_p9 = scmp.lt.s32.totalorder %s880_s6, %s759_s22 }
  0x1c   : > { %p756_p10 = pnand %p754_p6, %p740_p11  ;;  %p762_p0 = scmp.lt.s32.totalorder %s760_s25, %s753_s15 }
  0x1e   : > { %p757_p12 = pneg %p756_p10  ;;  %p763_p1 = por %p762_p0, %p761_p9 }
  0x20   : > { %p764_p2 = pnand %p763_p1, %p757_p12 }
  0x22   : > { %767 = shalt.err (!%p764_p2)
}
  0x23   : > { %s805_s26 = smov 128   ;;  %s806_s27 = smov 8  }
  0x24   : > { %693 = dma.hbm_to_vmem [thread:$0]  (!%p882_p8), %s878_s30, 2048, %s880_s6, %s887_s8, %s805_s26, %s805_s26, %s806_s27  }
  0x25   : > { %p173_p11 = scmp.lt.s32.totalorder %s802_s18, 5  ;;  %p1092_p13 = scmp.ge.s32.totalorder %s802_s18, 1 }
  0x27   : > { %p174_p3 = pnand %p1092_p13, %p173_p11 }
  0x28   : > { %s179_s28 = sand.u32 (!%p174_p3), 1, %s794_s16  }
  0x29   : > { %177 = sbr.rel (%p174_p3) target bundleno = 354 (0x162), region = 28  ;;  %s609_s29 = sshll.u32 (!%p174_p3), %s179_s28, 7 }
  0x2a   : > { %s180_s5 = scalar_lea.sflag (!%p174_p3), [#allocation3], %s179_s28  ;;  %s919_s9 = scalar_lea.vmem (!%p174_p3), [#allocation2], %s609_s29 }
  0x30   : > { %785 = dma.done.wait (%p869_p7), %s180_s5, 2048  }
  0x31   : > { %787 = vsyncadd (%p869_p7), %s180_s5, 4294965248  ;;  %s610_s10 = sshll.u32 %s852_s19, 4  ;;  %p612_p8 = scmp.ne.s32.totalorder %s852_s19, 0 }
  0x32   : > { %p210_p9 = scmp.lt.s32.totalorder %s610_s10, 63  ;;  %vm220_vm0 = vcmask (!%p612_p8), 253952   ;;  %v807_v0 = vmov (!%p612_p8), 0.0  }
  0x33   : > { %219 = sbr.rel (%p612_p8) target bundleno = 58 (0x3a), region = 36  ;;  %221 = vst.msk [vmem:[%s1088_s3] sm:$0x1] (!%p612_p8), %vm220_vm0, %v807_v0  ;;  %222 = vst.msk [vmem:[%s1089_s4] sm:$0x1] (!%p612_p8), %vm220_vm0, %v807_v0 }
  0x34   : > { %s1098_s10 = smov (!%p210_p9, %s610_s10), 63 }
  0x35   : > { %s611_s30 = sshll.u32 %s1098_s10, 3 }
  0x36   : > { %s929_s7 = scalar_lea.vmem %s1087_s2, %s611_s30 }
  0x3a PF: > { %v730_v1 = vld [vmem:[%s1086_s1] sm:$0xff]   ;;  %v731_v2 = vld [vmem:[%s1086_s1 + $0x8] sm:$0xff]   ;;  %v732_v3 = vld [vmem:[%s1086_s1 + $0x10] sm:$0xff]   ;;  %vm408_vm1 = vcmask 261120   ;;  %vm464_vm2 = vcmask 253952  }
  0x3b   : > { %640 = vmatprep.subr.bf16.mxu0 %v730_v1  ;;  %672 = vmatprep.subr.bf16.mxu1 %v730_v1  ;;  %v733_v4 = vld [vmem:[%s1086_s1 + $0x18] sm:$0xff]   ;;  %v223_v5 = vld [vmem:[%s919_s9] sm:$0xff]  ;;  %v224_v6 = vld [vmem:[%s919_s9 + $0x8] sm:$0xff] }
  0x3c   : > { %641 = vmatpush3.bf16.msra.mxu0 %v730_v1  ;;  %680 = vmatpush3.bf16.msra.mxu1 %v730_v1  ;;  %v239_v7 = vpack.c.bf16 %v224_v6, %v223_v5  ;;  %v231_v8 = vld [vmem:[%s919_s9 + $0x40] sm:$0xff]  ;;  %v232_v9 = vld [vmem:[%s919_s9 + $0x48] sm:$0xff]  ;;  %v736_v13 = vld [vmem:[%s1086_s1 + $0x30] sm:$0xff]  }
  0x3d   : > { %642 = vmatprep.subr.bf16.mxu0 %v731_v2  ;;  %673 = vmatprep.subr.bf16.mxu1 %v731_v2  ;;  %v734_v10 = vld [vmem:[%s1086_s1 + $0x20] sm:$0xff]   ;;  %v243_v11 = vpack.c.bf16 %v232_v9, %v231_v8  ;;  %v735_v12 = vld [vmem:[%s1086_s1 + $0x28] sm:$0xff]   ;;  %v737_v14 = vld [vmem:[%s1086_s1 + $0x38] sm:$0xff]  }
  0x3e   : > { %656 = vmatprep.mubr.bf16.mxu0 %v239_v7  ;;  %v225_v15 = vld [vmem:[%s919_s9 + $0x10] sm:$0xff]  ;;  %v226_v16 = vld [vmem:[%s919_s9 + $0x18] sm:$0xff]  ;;  %v227_v17 = vld [vmem:[%s919_s9 + $0x20] sm:$0xff] }
  0x3f   : > { %664 = vmatprep.mubr.bf16.mxu1 %v243_v11  ;;  %v233_v18 = vld [vmem:[%s919_s9 + $0x50] sm:$0xff]  ;;  %v234_v19 = vld [vmem:[%s919_s9 + $0x58] sm:$0xff]  ;;  %v228_v20 = vld [vmem:[%s919_s9 + $0x28] sm:$0xff]  ;;  %v240_v23 = vpack.c.bf16 %v226_v16, %v225_v15 }
  0x40   : > { %643 = vmatpush3.bf16.msra.mxu0 %v731_v2  ;;  %681 = vmatpush3.bf16.msra.mxu1 %v731_v2  ;;  %v235_v21 = vld [vmem:[%s919_s9 + $0x60] sm:$0xff]  ;;  %v236_v22 = vld [vmem:[%s919_s9 + $0x68] sm:$0xff]  ;;  %v244_v24 = vpack.c.bf16 %v234_v19, %v233_v18  ;;  %v241_v25 = vpack.c.bf16 %v228_v20, %v227_v17  ;;  %v229_v27 = vld [vmem:[%s919_s9 + $0x30] sm:$0xff] }
  0x41   : > { %644 = vmatprep.subr.bf16.mxu0 %v732_v3  ;;  %674 = vmatprep.subr.bf16.mxu1 %v732_v3  ;;  %v245_v26 = vpack.c.bf16 %v236_v22, %v235_v21  ;;  %v230_v28 = vld [vmem:[%s919_s9 + $0x38] sm:$0xff]  ;;  %v237_v29 = vld [vmem:[%s919_s9 + $0x70] sm:$0xff] }
  0x42   : > { %v238_v30 = vld [vmem:[%s919_s9 + $0x78] sm:$0xff]  ;;  %v242_v31 = vpack.c.bf16 %v230_v28, %v229_v27 }
  0x43   : > { %v246_v32 = vpack.c.bf16 %v238_v30, %v237_v29 }
  0x44   : > { %645 = vmatpush3.bf16.msra.mxu0 %v732_v3  ;;  %682 = vmatpush3.bf16.msra.mxu1 %v732_v3 }
  0x45   : > { %646 = vmatprep.subr.bf16.mxu0 %v733_v4  ;;  %675 = vmatprep.subr.bf16.mxu1 %v733_v4 }
  0x48   : > { %647 = vmatpush3.bf16.msra.mxu0 %v733_v4  ;;  %683 = vmatpush3.bf16.msra.mxu1 %v733_v4 }
  0x49   : > { %648 = vmatprep.subr.bf16.mxu0 %v734_v10  ;;  %676 = vmatprep.subr.bf16.mxu1 %v734_v10 }
  0x4c   : > { %649 = vmatpush3.bf16.msra.mxu0 %v734_v10  ;;  %684 = vmatpush3.bf16.msra.mxu1 %v734_v10 }
  0x4d   : > { %650 = vmatprep.subr.bf16.mxu0 %v735_v12  ;;  %677 = vmatprep.subr.bf16.mxu1 %v735_v12 }
  0x50   : > { %651 = vmatpush3.bf16.msra.mxu0 %v735_v12  ;;  %685 = vmatpush3.bf16.msra.mxu1 %v735_v12 }
  0x51   : > { %652 = vmatprep.subr.bf16.mxu0 %v736_v13  ;;  %678 = vmatprep.subr.bf16.mxu1 %v736_v13 }
  0x54   : > { %653 = vmatpush3.bf16.msra.mxu0 %v736_v13  ;;  %686 = vmatpush3.bf16.msra.mxu1 %v736_v13 }
  0x55   : > { %654 = vmatprep.subr.bf16.mxu0 %v737_v14  ;;  %679 = vmatprep.subr.bf16.mxu1 %v737_v14 }
  0x58   : > { %655 = vmatpush3.bf16.msra.mxu0 %v737_v14  ;;  %687 = vmatpush3.bf16.msra.mxu1 %v737_v14 }
  0x5b   : > { %657 = vmatmul.mubr.bf16.vlgmr.msra.gmra.mrb[0].mxu0 %v240_v23  ;;  %665 = vmatmul.mubr.bf16.vlgmr.msra.gmra.mrb[0].mxu1 %v244_v24 }
  0x5c   : > { %660 = vmatprep.mubr.bf16.mxu0 %v241_v25  ;;  %668 = vmatprep.mubr.bf16.mxu1 %v245_v26 }
  0x63   : > { %661 = vmatmul.mubr.bf16.gmra.mrb[4].mxu0 %v242_v31  ;;  %669 = vmatmul.mubr.bf16.gmra.mrb[4].mxu1 %v246_v32 }
 0x12e   : > { %v658_v33 = vpop.f32.mrb[0].mxu0  ;;  %v978_v34 = vpop.f32.mrb[0].mxu1 }
 0x12f   : > { %411 = vst.msk [vmem:[%s929_s7 + $0x10] sm:$0xff] %vm408_vm1, %v658_v33  ;;  %v345_v35 = vpop.f32.mrb[1].mxu0  ;;  %419 = vst.msk [vmem:[%s929_s7 + $0x50] sm:$0xff] %vm408_vm1, %v978_v34  ;;  %v377_v36 = vpop.f32.mrb[1].mxu1  ;;  %v469_v42 = vmul.f32 %v658_v33, %v658_v33  ;;  %v429_v47 = vsel %vm408_vm1, %v658_v33, 0.0  ;;  %v477_v28 = vmul.f32 %v978_v34, %v978_v34  ;;  %v445_v32 = vsel %vm408_vm1, %v978_v34, 0.0 }
 0x130   : > { %409 = vst.msk [vmem:[%s929_s7] sm:$0xff] %vm408_vm1, %v345_v35  ;;  %v467_v37 = vmul.f32 %v345_v35, %v345_v35  ;;  %v659_v38 = vpop.f32.mrb[2].mxu0  ;;  %417 = vst.msk [vmem:[%s929_s7 + $0x40] sm:$0xff] %vm408_vm1, %v377_v36  ;;  %v989_v39 = vpop.f32.mrb[2].mxu1  ;;  %v426_v43 = vsel %vm408_vm1, %v345_v35, 0.0  ;;  %v475_v15 = vmul.f32 %v377_v36, %v377_v36  ;;  %v441_v20 = vsel %vm408_vm1, %v377_v36, 0.0 }
 0x131   : > { %412 = vst.msk [vmem:[%s929_s7 + $0x18] sm:$0xff] %vm408_vm1, %v659_v38  ;;  %v348_v40 = vpop.f32.mrb[3].mxu0  ;;  %420 = vst.msk [vmem:[%s929_s7 + $0x58] sm:$0xff] %vm408_vm1, %v989_v39  ;;  %v380_v41 = vpop.f32.mrb[3].mxu1  ;;  %v470_v49 = vmul.f32 %v659_v38, %v659_v38  ;;  %v486_v53 = vsel %vm408_vm1, %v469_v42, 0.0  ;;  %v431_v54 = vsel %vm408_vm1, %v659_v38, 0.0  ;;  %v478_v33 = vmul.f32 %v989_v39, %v989_v39 }
 0x132   : > { %410 = vst.msk [vmem:[%s929_s7 + $0x8] sm:$0xff] %vm408_vm1, %v348_v40  ;;  %v427_v44 = vsel %vm408_vm1, %v348_v40, 0.0  ;;  %v468_v45 = vmul.f32 %v348_v40, %v348_v40  ;;  %418 = vst.msk [vmem:[%s929_s7 + $0x48] sm:$0xff] %vm408_vm1, %v380_v41  ;;  %v483_v48 = vsel %vm408_vm1, %v467_v37, 0.0  ;;  %v498_v24 = vsel %vm408_vm1, %v475_v15, 0.0 }
 0x133   : > { %v428_v46 = vadd.f32 %v427_v44, %v426_v43  ;;  %v488_v61 = vsel %vm408_vm1, %v470_v49, 0.0  ;;  %v476_v25 = vmul.f32 %v380_v41, %v380_v41  ;;  %v443_v29 = vsel %vm408_vm1, %v380_v41, 0.0 }
 0x134   : > { %v484_v50 = vsel %vm408_vm1, %v468_v45, 0.0  ;;  %v502_v40 = vsel %vm408_vm1, %v477_v28, 0.0  ;;  %v447_v42 = vsel %vm408_vm1, %v989_v39, 0.0  ;;  %v504_v45 = vsel %vm408_vm1, %v478_v33, 0.0 }
 0x135   : > { %v430_v51 = vadd.f32 %v429_v47, %v428_v46  ;;  %v485_v52 = vadd.f32 %v484_v50, %v483_v48  ;;  %v500_v35 = vsel %vm408_vm1, %v476_v25, 0.0 }
 0x136   : > { %v662_v55 = vpop.f32.mrb[4].mxu0  ;;  %v1007_v56 = vpop.f32.mrb[4].mxu1 }
 0x137   : > { %v487_v57 = vadd.f32 %v486_v53, %v485_v52  ;;  %415 = vst.msk [vmem:[%s929_s7 + $0x30] sm:$0xff] %vm408_vm1, %v662_v55  ;;  %v361_v58 = vpop.f32.mrb[5].mxu0  ;;  %v432_v59 = vadd.f32 %v431_v54, %v430_v51  ;;  %423 = vst.msk [vmem:[%s929_s7 + $0x70] sm:$0xff] %vm408_vm1, %v1007_v56  ;;  %v393_v60 = vpop.f32.mrb[5].mxu1  ;;  %v473_v6 = vmul.f32 %v662_v55, %v662_v55  ;;  %v437_v12 = vsel %vm408_vm1, %v662_v55, 0.0 }
 0x138   : > { %413 = vst.msk [vmem:[%s929_s7 + $0x20] sm:$0xff] %vm408_vm1, %v361_v58  ;;  %v433_v62 = vsel %vm408_vm1, %v361_v58, 0.0  ;;  %v471_v63 = vmul.f32 %v361_v58, %v361_v58  ;;  %v663_v0 = vpop.f32.mrb[6].mxu0  ;;  %421 = vst.msk [vmem:[%s929_s7 + $0x60] sm:$0xff] %vm408_vm1, %v393_v60  ;;  %v671_v1 = vpop.f32.mrb[6].mxu1  ;;  %v479_v36 = vmul.f32 %v393_v60, %v393_v60  ;;  %v449_v41 = vsel %vm408_vm1, %v393_v60, 0.0 }
 0x139   : > { %v434_v2 = vadd.f32 %v433_v62, %v432_v59  ;;  %v489_v3 = vadd.f32 %v488_v61, %v487_v57  ;;  %416 = vst.msk [vmem:[%s929_s7 + $0x38] sm:$0xff] %vm408_vm1, %v663_v0  ;;  %v364_v4 = vpop.f32.mrb[7].mxu0  ;;  %424 = vst.msk [vmem:[%s929_s7 + $0x78] sm:$0xff] %vm408_vm1, %v671_v1  ;;  %v396_v5 = vpop.f32.mrb[7].mxu1  ;;  %v474_v13 = vmul.f32 %v663_v0, %v663_v0  ;;  %v494_v18 = vsel %vm408_vm1, %v473_v6, 0.0 }
 0x13a   : > { %v490_v7 = vsel %vm408_vm1, %v471_v63, 0.0  ;;  %414 = vst.msk [vmem:[%s929_s7 + $0x28] sm:$0xff] %vm408_vm1, %v364_v4  ;;  %v435_v8 = vsel %vm408_vm1, %v364_v4, 0.0  ;;  %v472_v9 = vmul.f32 %v364_v4, %v364_v4  ;;  %422 = vst.msk [vmem:[%s929_s7 + $0x68] sm:$0xff] %vm408_vm1, %v396_v5  ;;  %v439_v19 = vsel %vm408_vm1, %v663_v0, 0.0 }
 0x13b   : > { %v491_v10 = vadd.f32 %v490_v7, %v489_v3  ;;  %v436_v11 = vadd.f32 %v435_v8, %v434_v2  ;;  %v496_v23 = vsel %vm408_vm1, %v474_v13, 0.0  ;;  %v506_v34 = vsel %vm408_vm1, %v479_v36, 0.0 }
 0x13c   : > { %v492_v14 = vsel %vm408_vm1, %v472_v9, 0.0  ;;  %v480_v46 = vmul.f32 %v396_v5, %v396_v5  ;;  %v481_v49 = vmul.f32 %v1007_v56, %v1007_v56  ;;  %v451_v50 = vsel %vm408_vm1, %v396_v5, 0.0  ;;  %v425_v9 = vld [vmem:[%s1088_s3] sm:$0x1] }
 0x13d   : > { %v438_v16 = vadd.f32 %v437_v12, %v436_v11  ;;  %v493_v17 = vadd.f32 %v492_v14, %v491_v10  ;;  %v453_v39 = vsel %vm408_vm1, %v1007_v56, 0.0  ;;  %v482_v53 = vmul.f32 %v671_v1, %v671_v1  ;;  %v466_v11 = vld [vmem:[%s1089_s4] sm:$0x1] }
 0x13e   : > { %v508_v54 = vsel %vm408_vm1, %v480_v46, 0.0  ;;  %v510_v58 = vsel %vm408_vm1, %v481_v49, 0.0  ;;  %v455_v59 = vsel %vm408_vm1, %v671_v1, 0.0 }
 0x13f   : > { %v495_v21 = vadd.f32 %v494_v18, %v493_v17  ;;  %v440_v22 = vadd.f32 %v439_v19, %v438_v16  ;;  %v512_v62 = vsel %vm408_vm1, %v482_v53, 0.0 }
 0x141   : > { %v442_v26 = vadd.f32 %v441_v20, %v440_v22  ;;  %v497_v27 = vadd.f32 %v496_v23, %v495_v21 }
 0x143   : > { %v499_v30 = vadd.f32 %v498_v24, %v497_v27  ;;  %v444_v31 = vadd.f32 %v443_v29, %v442_v26 }
 0x145   : > { %v446_v37 = vadd.f32 %v445_v32, %v444_v31  ;;  %v501_v38 = vadd.f32 %v500_v35, %v499_v30 }
 0x147   : > { %v503_v43 = vadd.f32 %v502_v40, %v501_v38  ;;  %v448_v44 = vadd.f32 %v447_v42, %v446_v37 }
 0x149   : > { %v450_v47 = vadd.f32 %v449_v41, %v448_v44  ;;  %v505_v48 = vadd.f32 %v504_v45, %v503_v43 }
 0x14b   : > { %v507_v51 = vadd.f32 %v506_v34, %v505_v48  ;;  %v452_v52 = vadd.f32 %v451_v50, %v450_v47 }
 0x14d   : > { %v454_v55 = vadd.f32 %v453_v39, %v452_v52  ;;  %v509_v57 = vadd.f32 %v508_v54, %v507_v51 }
 0x14f   : > { %v456_v60 = vadd.f32 %v455_v59, %v454_v55  ;;  %v511_v61 = vadd.f32 %v510_v58, %v509_v57 }
 0x151   : > { %v457_v63 = vrot.slane %v456_v60, 4  ;;  %v513_v0 = vadd.f32 %v512_v62, %v511_v61 }
 0x153   : > { %v458_v2 = vadd.f32 %v457_v63, %v456_v60  ;;  %v514_v3 = vrot.slane %v513_v0, 4 }
 0x155   : > { %v459_v4 = vrot.slane %v458_v2, 2  ;;  %v515_v5 = vadd.f32 %v514_v3, %v513_v0 }
 0x157   : > { %v460_v56 = vadd.f32 %v459_v4, %v458_v2  ;;  %v516_v6 = vrot.slane %v515_v5, 2 }
 0x159   : > { %v461_v7 = vrot.slane %v460_v56, 1  ;;  %v517_v8 = vadd.f32 %v516_v6, %v515_v5 }
 0x15b   : > { %v462_v10 = vadd.f32 %v461_v7, %v460_v56  ;;  %v518_v1 = vrot.slane %v517_v8, 1 }
 0x15d   : > { %v463_v12 = vadd.f32 %v462_v10, %v425_v9  ;;  %v519_v13 = vadd.f32 %v518_v1, %v517_v8 }
 0x15f   : > { %465 = vst.msk [vmem:[%s1088_s3] sm:$0x1] %vm464_vm2, %v463_v12  ;;  %v520_v14 = vadd.f32 %v519_v13, %v466_v11 }
 0x161   : > { %521 = vst.msk [vmem:[%s1089_s4] sm:$0x1] %vm464_vm2, %v520_v14 }
 0x162 PF: > { %p15_p7 = scmp.ge.s32.totalorder %s855_s20, 6   ;;  %s1093_s15 = smov %s794_s16 }
 0x163   : > { %s1094_s16 = smov %s798_s17  ;;  %s1095_s17 = smov %s865_s23 }
 0x164   : > { %s1096_s18 = smov %s855_s20  ;;  %17 = sbr.rel (!%p15_p7) target bundleno = 3 (0x3), region = 88 }
 0x16b   :  { %556 = vsyncpa [#allocation3], 1 }
 0x16c   :  { %558 = vsyncpa [#allocation3 + $0x1], 1 }

// kernel: block_forward.5
= control target key start
LH: loop header
LB: loop body
LE: loop exit
PB: predicated region body
PF: predicated region fallthrough
CT: control target
= control target key end

     0   :  { %s5065_s21 = smov 0   ;;  %s6234_s0 = inlined_call_operand.vmem [shape: f32[2,16,16,32], index: 0, kind: input, shape index: {}]   ;;  %s6235_s1 = inlined_call_operand.vmem [shape: f32[1,32], index: 1, kind: input, shape index: {}]   ;;  %s6236_s2 = inlined_call_operand.vmem [shape: f32[1,32], index: 2, kind: input, shape index: {}]   ;;  %s6237_s3 = inlined_call_operand.vmem [shape: bf16[3,3,32,32], index: 3, kind: input, shape index: {}]   ;;  %s6238_s4 = inlined_call_operand.vmem [shape: f32[2,16,16,32], index: 4, kind: output, shape index: {0}]   ;;  %s6239_s5 = inlined_call_operand.vmem [shape: f32[1,32], index: 5, kind: output, shape index: {1}]   ;;  %s6240_s6 = inlined_call_operand.vmem [shape: f32[1,32], index: 6, kind: output, shape index: {2}]  }
   0x1 LB: > { %s4292_s22 = sadd.s32 4294967295, %s5026_s21   ;;  %p4296_p0 = scmp.ge.s32.totalorder %s5026_s21, 1  ;;  %s5026_s21 = sphi %s5065_s21, %s17_s21  }
   0x2   : > { %p207_p1 = scmp.lt.s32.totalorder %s5026_s21, 3 }
   0x4   : > { %p208_p2 = pnand %p4296_p0, %p207_p1 }
   0x5   : > { %p237_p3 = scmp.lt.s32.totalorder (!%p208_p2), %s4292_s22, 1  ;;  %p4301_p4 = scmp.ne.s32.totalorder (!%p208_p2), %s4292_s22, 0 }
   0x6   : > { %211 = sbr.rel (%p208_p2) target bundleno = 596 (0x254), region = 36 }
   0xd   : > { %s238_s23 = scalar_select %p237_p3, %s4292_s22, 1 }
   0xe   : > { %251 = sbr.rel (%p4301_p4) target bundleno = 21 (0x15), region = 40  ;;  %vm252_vm0 = vcmask (!%p4301_p4), 253952   ;;  %v5028_v0 = vmov (!%p4301_p4), 0.0  }
   0xf   : > { %s4500_s24 = sshll.u32 %s238_s23, 8  ;;  %253 = vst.msk [vmem:[%s6239_s5] sm:$0x1] (!%p4301_p4), %vm252_vm0, %v5028_v0  ;;  %254 = vst.msk [vmem:[%s6240_s6] sm:$0x1] (!%p4301_p4), %vm252_vm0, %v5028_v0 }
  0x10   : > { %s5076_s27 = scalar_lea.vmem %s6234_s0, %s4500_s24  ;;  %s5081_s30 = scalar_lea.vmem %s6238_s4, %s4500_s24 }
  0x15 PF: > { %v5002_v1 = vld [vmem:[%s6237_s3] sm:$0xff]   ;;  %v5095_v2 = vld [vmem:[%s6237_s3 + $0x8] sm:$0xff]   ;;  %v269_v3 = vld [vmem:[%s5076_s27 + $0x70] sm:$0xff]  ;;  %vm565_vm1 = vcmask 261120   ;;  %v5029_v9 = vmov 0.0   ;;  %vm430_vm2 = vcmask 1040384  }
  0x16   : > { %4988 = vmatprep.subr.bf16.mxu1 %v5002_v1  ;;  %4664 = vmatprep.subr.bf16.mxu0 %v5002_v1  ;;  %v270_v4 = vld [vmem:[%s5076_s27 + $0x78] sm:$0xff]  ;;  %v5102_v5 = vld [vmem:[%s6235_s1] ss:$0 sm:$0xff]  ;;  %621 = vst.msk [vmem:[#allocation3] sm:$0xff] %vm565_vm1, %v5029_v9  ;;  %622 = vst.msk [vmem:[#allocation3 + $0x8] sm:$0xff] %vm565_vm1, %v5029_v9  ;;  %v5152_v13 = vrot.slane %v5029_v9, 7 }
  0x17   : > { %4990 = vmatpush3.bf16.msra.mxu1 %v5002_v1  ;;  %v308_v6 = vmul.f32 %v5102_v5, %v269_v3  ;;  %v309_v7 = vmul.f32 %v5102_v5, %v270_v4  ;;  %v5109_v8 = vld [vmem:[%s6236_s2] ss:$0 sm:$0xff]  ;;  %4665 = vmatpush3.bf16.msra.mxu0 %v5002_v1  ;;  %623 = vst.msk [vmem:[#allocation3 + $0x10] sm:$0xff] %vm565_vm1, %v5029_v9  ;;  %624 = vst.msk [vmem:[#allocation3 + $0x18] sm:$0xff] %vm565_vm1, %v5029_v9  ;;  %v5147_v10 = vld [vmem:[%s6237_s3 + $0x10] sm:$0xff]   ;;  %vm568_vm3 = vcmask 254976  }
  0x18   : > { %625 = vst.msk [vmem:[#allocation3 + $0x20] sm:$0xff] %vm565_vm1, %v5029_v9  ;;  %626 = vst.msk [vmem:[#allocation3 + $0x28] sm:$0xff] %vm565_vm1, %v5029_v9  ;;  %4989 = vmatprep.subr.bf16.mxu1 %v5095_v2  ;;  %v271_v11 = vld [vmem:[%s5076_s27 + $0x80] sm:$0xff]  ;;  %v272_v12 = vld [vmem:[%s5076_s27 + $0x88] sm:$0xff]  ;;  %4666 = vmatprep.subr.bf16.mxu0 %v5095_v2  ;;  %v531_v21 = vsel %vm430_vm2, 0.0, %v5152_v13  ;;  %vm4119_vm4 = vcmask 253952  }
  0x19   : > { %627 = vst.msk [vmem:[#allocation3 + $0x30] sm:$0xff] %vm565_vm1, %v5029_v9  ;;  %628 = vst.msk [vmem:[#allocation3 + $0x38] sm:$0xff] %vm565_vm1, %v5029_v9  ;;  %v347_v14 = vadd.f32 %v5109_v8, %v308_v6  ;;  %v348_v15 = vadd.f32 %v5109_v8, %v309_v7  ;;  %v310_v16 = vmul.f32 %v5102_v5, %v271_v11  ;;  %v255_v18 = vld [vmem:[%s5076_s27] sm:$0xff]  ;;  %v256_v19 = vld [vmem:[%s5076_s27 + $0x8] sm:$0xff] }
  0x1a   : > { %629 = vst.msk [vmem:[#allocation3 + $0x40] sm:$0xff] %vm565_vm1, %v5029_v9  ;;  %630 = vst.msk [vmem:[#allocation3 + $0x48] sm:$0xff] %vm565_vm1, %v5029_v9  ;;  %v311_v17 = vmul.f32 %v5102_v5, %v272_v12  ;;  %v273_v20 = vld [vmem:[%s5076_s27 + $0x90] sm:$0xff]  ;;  %v294_v22 = vmul.f32 %v5102_v5, %v255_v18  ;;  %v295_v23 = vmul.f32 %v5102_v5, %v256_v19  ;;  %v274_v24 = vld [vmem:[%s5076_s27 + $0x98] sm:$0xff] }
  0x1b   : > { %631 = vst.msk [vmem:[#allocation3 + $0x50] sm:$0xff] %vm565_vm1, %v5029_v9  ;;  %632 = vst.msk [vmem:[#allocation3 + $0x58] sm:$0xff] %vm565_vm1, %v5029_v9  ;;  %v312_v25 = vmul.f32 %v5102_v5, %v273_v20  ;;  %4991 = vmatpush3.bf16.msra.mxu1 %v5095_v2  ;;  %v379_v26 = vmax.f32 %v347_v14, 0.0  ;;  %v380_v27 = vmax.f32 %v348_v15, 0.0  ;;  %v349_v28 = vadd.f32 %v5109_v8, %v310_v16  ;;  %v5185_v34 = vld [vmem:[%s6237_s3 + $0x20] sm:$0xff]   ;;  %v276_v44 = vld [vmem:[%s5076_s27 + $0xa8] sm:$0xff] }
  0x1c   : > { %633 = vst.msk [vmem:[#allocation3 + $0x60] sm:$0xff] %vm565_vm1, %v5029_v9  ;;  %634 = vst.msk [vmem:[#allocation3 + $0x68] sm:$0xff] %vm565_vm1, %v5029_v9  ;;  %v350_v29 = vadd.f32 %v5109_v8, %v311_v17  ;;  %4667 = vmatpush3.bf16.msra.mxu0 %v5095_v2  ;;  %4700 = vmatprep.subr.bf16.mxu1 %v5147_v10  ;;  %v333_v30 = vadd.f32 %v5109_v8, %v294_v22  ;;  %v275_v43 = vld [vmem:[%s5076_s27 + $0xa0] sm:$0xff]  ;;  %v257_v49 = vld [vmem:[%s5076_s27 + $0x10] sm:$0xff] }
  0x1d   : > { %635 = vst.msk [vmem:[#allocation3 + $0x70] sm:$0xff] %vm565_vm1, %v5029_v9  ;;  %636 = vst.msk [vmem:[#allocation3 + $0x78] sm:$0xff] %vm565_vm1, %v5029_v9  ;;  %v334_v31 = vadd.f32 %v5109_v8, %v295_v23  ;;  %v313_v32 = vmul.f32 %v5102_v5, %v274_v24  ;;  %v351_v33 = vadd.f32 %v5109_v8, %v312_v25  ;;  %v454_v35 = vrot.slane %v379_v26, 7  ;;  %v258_v59 = vld [vmem:[%s5076_s27 + $0x18] sm:$0xff]  ;;  %v259_v60 = vld [vmem:[%s5076_s27 + $0x20] sm:$0xff] }
  0x1e   : > { %637 = vst.msk [vmem:[#allocation3 + $0x80] sm:$0xff] %vm565_vm1, %v5029_v9  ;;  %638 = vst.msk [vmem:[#allocation3 + $0x88] sm:$0xff] %vm565_vm1, %v5029_v9  ;;  %v5187_v36 = vrot.slane %v380_v27, 7  ;;  %v381_v37 = vmax.f32 %v349_v28, 0.0  ;;  %v382_v38 = vmax.f32 %v350_v29, 0.0  ;;  %v365_v39 = vmax.f32 %v333_v30, 0.0  ;;  %4736 = vmatprep.subr.bf16.mxu0 %v5185_v34 }
  0x1f   : > { %639 = vst.msk [vmem:[#allocation3 + $0x90] sm:$0xff] %vm565_vm1, %v5029_v9  ;;  %640 = vst.msk [vmem:[#allocation3 + $0x98] sm:$0xff] %vm565_vm1, %v5029_v9  ;;  %v366_v40 = vmax.f32 %v334_v31, 0.0  ;;  %v352_v41 = vadd.f32 %v5109_v8, %v313_v32  ;;  %v383_v42 = vmax.f32 %v351_v33, 0.0  ;;  %v539_v46 = vsel %vm430_vm2, 0.0, %v454_v35  ;;  %v260_v2 = vld [vmem:[%s5076_s27 + $0x28] sm:$0xff] }
  0x20   : > { %641 = vst.msk [vmem:[#allocation3 + $0xa0] sm:$0xff] %vm565_vm1, %v5029_v9  ;;  %642 = vst.msk [vmem:[#allocation3 + $0xa8] sm:$0xff] %vm565_vm1, %v5029_v9  ;;  %v456_v45 = vsel %vm430_vm2, %v454_v35, %v5187_v36  ;;  %v457_v47 = vrot.slane %v381_v37, 7  ;;  %v5196_v48 = vrot.slane %v382_v38, 7  ;;  %v433_v50 = vrot.slane %v365_v39, 7  ;;  %v277_v3 = vld [vmem:[%s5076_s27 + $0xb0] sm:$0xff] }
  0x21   : > { %643 = vst.msk [vmem:[#allocation3 + $0xb0] sm:$0xff] %vm565_vm1, %v5029_v9  ;;  %644 = vst.msk [vmem:[#allocation3 + $0xb8] sm:$0xff] %vm565_vm1, %v5029_v9  ;;  %v434_v51 = vrot.slane %v366_v40, 7  ;;  %v384_v52 = vmax.f32 %v352_v41, 0.0  ;;  %v460_v53 = vrot.slane %v383_v42, 7  ;;  %v314_v57 = vmul.f32 %v5102_v5, %v275_v43  ;;  %v278_v11 = vld [vmem:[%s5076_s27 + $0xb8] sm:$0xff] }
  0x22   : > { %645 = vst.msk [vmem:[#allocation3 + $0xc0] sm:$0xff] %vm565_vm1, %v5029_v9  ;;  %646 = vst.msk [vmem:[#allocation3 + $0xc8] sm:$0xff] %vm565_vm1, %v5029_v9  ;;  %v459_v54 = vsel %vm430_vm2, %v457_v47, %v5196_v48  ;;  %v540_v55 = vsel %vm430_vm2, 0.0, %v457_v47  ;;  %v315_v58 = vmul.f32 %v5102_v5, %v276_v44  ;;  %v532_v63 = vsel %vm430_vm2, 0.0, %v433_v50  ;;  %v5245_v37 = vld [vmem:[%s6237_s3 + $0x18] sm:$0xff]   ;;  %v279_v38 = vld [vmem:[%s5076_s27 + $0xc0] sm:$0xff] }
  0x23   : > { %647 = vst.msk [vmem:[#allocation3 + $0xd0] sm:$0xff] %vm565_vm1, %v5029_v9  ;;  %648 = vst.msk [vmem:[#allocation3 + $0xd8] sm:$0xff] %vm565_vm1, %v5029_v9  ;;  %v435_v62 = vsel %vm430_vm2, %v433_v50, %v434_v51  ;;  %v549_v0 = vsel %vm430_vm2, %v434_v51, 0.0  ;;  %v5213_v1 = vrot.slane %v384_v52, 7  ;;  %v541_v6 = vsel %vm430_vm2, 0.0, %v460_v53 }
  0x24   : > { %649 = vst.msk [vmem:[#allocation3 + $0xe0] sm:$0xff] %vm565_vm1, %v5029_v9  ;;  %650 = vst.msk [vmem:[#allocation3 + $0xe8] sm:$0xff] %vm565_vm1, %v5029_v9  ;;  %v353_v7 = vadd.f32 %v5109_v8, %v314_v57  ;;  %v296_v14 = vmul.f32 %v5102_v5, %v257_v49  ;;  %v297_v15 = vmul.f32 %v5102_v5, %v258_v59 }
  0x25   : > { %651 = vst.msk [vmem:[#allocation3 + $0xf0] sm:$0xff] %vm565_vm1, %v5029_v9  ;;  %652 = vst.msk [vmem:[#allocation3 + $0xf8] sm:$0xff] %vm565_vm1, %v5029_v9  ;;  %v354_v9 = vadd.f32 %v5109_v8, %v315_v58  ;;  %v462_v12 = vsel %vm430_vm2, %v460_v53, %v5213_v1  ;;  %v298_v16 = vmul.f32 %v5102_v5, %v259_v60  ;;  %v263_v60 = vld [vmem:[%s5076_s27 + $0x40] sm:$0xff] }
  0x26   : > { %567 = vst.msk [vmem:[#allocation2 + $0x8] sm:$0xff] %vm565_vm1, %v5152_v13  ;;  %619 = vst.msk [vmem:[#allocation2 + $0x1a0] sm:$0xff] %vm565_vm1, %v5152_v13  ;;  %v385_v17 = vmax.f32 %v353_v7, 0.0  ;;  %v299_v19 = vmul.f32 %v5102_v5, %v260_v2  ;;  %v316_v20 = vmul.f32 %v5102_v5, %v277_v3  ;;  %v336_v22 = vadd.f32 %v5109_v8, %v297_v15 }
  0x27   : > { %566 = vst.msk [vmem:[#allocation2] sm:$0xff] %vm565_vm1, %v531_v21  ;;  %618 = vst.msk [vmem:[#allocation2 + $0x198] sm:$0xff] %vm565_vm1, %v531_v21  ;;  %v386_v18 = vmax.f32 %v354_v9, 0.0  ;;  %v335_v21 = vadd.f32 %v5109_v8, %v296_v14  ;;  %v337_v23 = vadd.f32 %v5109_v8, %v298_v16  ;;  %v317_v24 = vmul.f32 %v5102_v5, %v278_v11  ;;  %v282_v16 = vld [vmem:[%s5076_s27 + $0xd8] sm:$0xff] }
  0x28   : > { %591 = vst.msk [vmem:[#allocation2 + $0xc0] sm:$0xff] %vm565_vm1, %v539_v46  ;;  %592 = vst.msk [vmem:[#allocation2 + $0xc8] sm:$0xff] %vm565_vm1, %v456_v45  ;;  %v463_v27 = vrot.slane %v385_v17, 7  ;;  %v338_v29 = vadd.f32 %v5109_v8, %v299_v19  ;;  %v355_v30 = vadd.f32 %v5109_v8, %v316_v20  ;;  %v368_v33 = vmax.f32 %v336_v22, 0.0  ;;  %v280_v45 = vld [vmem:[%s5076_s27 + $0xc8] sm:$0xff]  ;;  %v261_v46 = vld [vmem:[%s5076_s27 + $0x30] sm:$0xff] }
  0x29   : > { %594 = vst.msk [vmem:[#allocation2 + $0xd8] sm:$0xff] %vm565_vm1, %v540_v55  ;;  %595 = vst.msk [vmem:[#allocation2 + $0xe0] sm:$0xff] %vm565_vm1, %v459_v54  ;;  %v5238_v28 = vrot.slane %v386_v18, 7  ;;  %v367_v32 = vmax.f32 %v335_v21, 0.0  ;;  %v369_v35 = vmax.f32 %v337_v23, 0.0  ;;  %v356_v44 = vadd.f32 %v5109_v8, %v317_v24  ;;  %v262_v54 = vld [vmem:[%s5076_s27 + $0x38] sm:$0xff] }
  0x2a   : > { %570 = vst.msk [vmem:[#allocation2 + $0x18] sm:$0xff] %vm565_vm1, %v532_v63  ;;  %571 = vst.msk [vmem:[#allocation2 + $0x20] sm:$0xff] %vm565_vm1, %v435_v62  ;;  %v542_v42 = vsel %vm430_vm2, 0.0, %v463_v27  ;;  %v370_v43 = vmax.f32 %v338_v29, 0.0  ;;  %v5257_v52 = vrot.slane %v368_v33, 7  ;;  %v387_v58 = vmax.f32 %v355_v30, 0.0 }
  0x2b   : > { %572 = vst.msk [vmem:[#allocation2 + $0x28] sm:$0x3] %vm568_vm3, %v549_v0  ;;  %v465_v41 = vsel %vm430_vm2, %v463_v27, %v5238_v28  ;;  %v436_v51 = vrot.slane %v367_v32, 7  ;;  %v439_v53 = vrot.slane %v369_v35, 7  ;;  %v388_v59 = vmax.f32 %v356_v44, 0.0  ;;  %v5300_v18 = vld [vmem:[%s6237_s3 + $0x30] sm:$0xff]  }
  0x2c   : > { %597 = vst.msk [vmem:[#allocation2 + $0xf0] sm:$0xff] %vm565_vm1, %v541_v6  ;;  %598 = vst.msk [vmem:[#allocation2 + $0xf8] sm:$0xff] %vm565_vm1, %v462_v12  ;;  %v5262_v57 = vrot.slane %v370_v43, 7  ;;  %v318_v3 = vmul.f32 %v5102_v5, %v279_v38  ;;  %v281_v6 = vld [vmem:[%s5076_s27 + $0xd0] sm:$0xff]  ;;  %v466_v11 = vrot.slane %v387_v58, 7  ;;  %v300_v15 = vmul.f32 %v5102_v5, %v261_v46 }
  0x2d   : > { %v654_v56 = vld [vmem:[#allocation2 + $0x8] sm:$0xff]  ;;  %600 = vst.msk [vmem:[#allocation2 + $0x108] sm:$0xff] %vm565_vm1, %v542_v42  ;;  %601 = vst.msk [vmem:[#allocation2 + $0x110] sm:$0xff] %vm565_vm1, %v465_v41  ;;  %v438_v63 = vsel %vm430_vm2, %v436_v51, %v5257_v52  ;;  %v533_v0 = vsel %vm430_vm2, 0.0, %v436_v51  ;;  %v534_v2 = vsel %vm430_vm2, 0.0, %v439_v53  ;;  %v5286_v12 = vrot.slane %v388_v59, 7 }
  0x2e   : > { %v653_v61 = vld [vmem:[#allocation2] sm:$0xff]  ;;  %573 = vst.msk [vmem:[#allocation2 + $0x30] sm:$0xff] %vm565_vm1, %v533_v0  ;;  %574 = vst.msk [vmem:[#allocation2 + $0x38] sm:$0xff] %vm565_vm1, %v438_v63  ;;  %v441_v9 = vsel %vm430_vm2, %v439_v53, %v5262_v57  ;;  %v357_v14 = vadd.f32 %v5109_v8, %v318_v3  ;;  %v548_v17 = vsel %vm430_vm2, %v5152_v13, 0.0  ;;  %v543_v19 = vsel %vm430_vm2, 0.0, %v466_v11  ;;  %v266_v3 = vld [vmem:[%s5076_s27 + $0x58] sm:$0xff] }
  0x2f   : > { %v717_v4 = vpack.c.bf16 %v654_v56, %v653_v61  ;;  %v669_v25 = vld [vmem:[#allocation2 + $0xc0] sm:$0xff]  ;;  %v670_v26 = vld [vmem:[#allocation2 + $0xc8] sm:$0xff]  ;;  %576 = vst.msk [vmem:[#allocation2 + $0x48] sm:$0xff] %vm565_vm1, %v534_v2  ;;  %577 = vst.msk [vmem:[#allocation2 + $0x50] sm:$0xff] %vm565_vm1, %v441_v9  ;;  %v301_v20 = vmul.f32 %v5102_v5, %v262_v54  ;;  %v302_v21 = vmul.f32 %v5102_v5, %v263_v60 }
  0x30   : > { %v725_v31 = vpack.c.bf16 %v670_v26, %v669_v25  ;;  %v671_v39 = vld [vmem:[#allocation2 + $0xd8] sm:$0xff]  ;;  %v672_v40 = vld [vmem:[#allocation2 + $0xe0] sm:$0xff]  ;;  %v5007_v61 = vld [vmem:[%s6237_s3 + $0x28] sm:$0xff]   ;;  %569 = vst.msk [vmem:[#allocation2 + $0x10] sm:$0x3] %vm568_vm3, %v548_v17  ;;  %v389_v23 = vmax.f32 %v357_v14, 0.0  ;;  %v339_v24 = vadd.f32 %v5109_v8, %v300_v15  ;;  %v321_v32 = vmul.f32 %v5102_v5, %v282_v16 }
  0x31   : > { %4668 = vmatprep.mubr.msk.bf16.mxu0 %vm565_vm1, %v717_v4  ;;  %v726_v47 = vpack.c.bf16 %v672_v40, %v671_v39  ;;  %v655_v49 = vld [vmem:[#allocation2 + $0x18] sm:$0xff]  ;;  %v656_v50 = vld [vmem:[#allocation2 + $0x20] sm:$0xff]  ;;  %v264_v4 = vld [vmem:[%s5076_s27 + $0x48] sm:$0xff]  ;;  %620 = vst.msk [vmem:[#allocation2 + $0x1a8] sm:$0x3] %vm568_vm3, %v548_v17  ;;  %v340_v29 = vadd.f32 %v5109_v8, %v301_v20  ;;  %v341_v30 = vadd.f32 %v5109_v8, %v302_v21 }
  0x32   : > { %4684 = vmatprep.mubr.msk.bf16.mxu1 %vm565_vm1, %v725_v31  ;;  %v5260_v55 = vpack.c.bf16 %v656_v50, %v655_v49  ;;  %v5314_v13 = vld [vmem:[%s6237_s3 + $0x40] sm:$0xff]   ;;  %603 = vst.msk [vmem:[#allocation2 + $0x120] sm:$0xff] %vm565_vm1, %v543_v19  ;;  %v303_v25 = vmul.f32 %v5102_v5, %v264_v4  ;;  %v320_v31 = vmul.f32 %v5102_v5, %v281_v6  ;;  %v469_v38 = vrot.slane %v389_v23, 7  ;;  %v284_v60 = vld [vmem:[%s5076_s27 + $0xe8] sm:$0xff]  ;;  %v265_v2 = vld [vmem:[%s5076_s27 + $0x50] sm:$0xff] }
  0x33   : > { %v673_v56 = vld [vmem:[#allocation2 + $0xf0] sm:$0xff]  ;;  %4685 = vmatmul.mubr.msk.bf16.vlgmr.msra.gmra.mrb[0].mxu1 %vm565_vm1, %v726_v47  ;;  %v674_v62 = vld [vmem:[#allocation2 + $0xf8] sm:$0xff]  ;;  %v371_v39 = vmax.f32 %v339_v24, 0.0  ;;  %v372_v40 = vmax.f32 %v340_v29, 0.0  ;;  %v360_v50 = vadd.f32 %v5109_v8, %v321_v32  ;;  %v283_v59 = vld [vmem:[%s5076_s27 + $0xe0] sm:$0xff]  ;;  %v323_v19 = vmul.f32 %v5102_v5, %v284_v60 }
  0x34   : > { %4701 = vmatpush3.bf16.msra.mxu1 %v5147_v10  ;;  %4669 = vmatmul.mubr.msk.bf16.vlgmr.msra.gmra.mrb[0].mxu0 %vm565_vm1, %v5260_v55  ;;  %v5279_v7 = vpack.c.bf16 %v674_v62, %v673_v56  ;;  %v319_v10 = vmul.f32 %v5102_v5, %v280_v45  ;;  %v675_v26 = vld [vmem:[#allocation2 + $0x108] sm:$0xff]  ;;  %v676_v27 = vld [vmem:[#allocation2 + $0x110] sm:$0xff]  ;;  %v342_v41 = vadd.f32 %v5109_v8, %v303_v25  ;;  %v544_v47 = vsel %vm430_vm2, 0.0, %v469_v38  ;;  %v267_v15 = vld [vmem:[%s5076_s27 + $0x60] sm:$0xff] }
  0x35   : > { %4737 = vmatpush3.bf16.msra.mxu0 %v5185_v34  ;;  %4702 = vmatprep.subr.bf16.mxu1 %v5245_v37  ;;  %v468_v34 = vsel %vm430_vm2, %v466_v11, %v5286_v12  ;;  %v5326_v33 = vpack.c.bf16 %v676_v27, %v675_v26  ;;  %v359_v42 = vadd.f32 %v5109_v8, %v320_v31  ;;  %v657_v43 = vld [vmem:[#allocation2 + $0x30] sm:$0xff]  ;;  %v658_v44 = vld [vmem:[#allocation2 + $0x38] sm:$0xff]  ;;  %v442_v49 = vrot.slane %v371_v39, 7  ;;  %v268_v20 = vld [vmem:[%s5076_s27 + $0x68] sm:$0xff] }
  0x36   : > { %4688 = vmatprep.mubr.msk.bf16.mxu1 %vm565_vm1, %v5279_v7  ;;  %4738 = vmatprep.subr.bf16.mxu0 %v5007_v61  ;;  %604 = vst.msk [vmem:[#allocation2 + $0x128] sm:$0xff] %vm565_vm1, %v468_v34  ;;  %v358_v22 = vadd.f32 %v5109_v8, %v319_v10  ;;  %v659_v45 = vld [vmem:[#allocation2 + $0x48] sm:$0xff]  ;;  %v5338_v51 = vpack.c.bf16 %v658_v44, %v657_v43  ;;  %v660_v53 = vld [vmem:[#allocation2 + $0x50] sm:$0xff]  ;;  %606 = vst.msk [vmem:[#allocation2 + $0x138] sm:$0xff] %vm565_vm1, %v544_v47  ;;  %v5341_v54 = vrot.slane %v372_v40, 7 }
  0x37   : > { %v374_v56 = vmax.f32 %v342_v41, 0.0  ;;  %v535_v63 = vsel %vm430_vm2, 0.0, %v442_v49  ;;  %v391_v0 = vmax.f32 %v359_v42, 0.0  ;;  %v392_v14 = vmax.f32 %v360_v50, 0.0 }
  0x38   : > { %4703 = vmatpush3.bf16.msra.mxu1 %v5245_v37  ;;  %v390_v35 = vmax.f32 %v358_v22, 0.0  ;;  %v373_v37 = vmax.f32 %v341_v30, 0.0  ;;  %4672 = vmatprep.mubr.msk.bf16.mxu0 %vm565_vm1, %v5338_v51  ;;  %v444_v9 = vsel %vm430_vm2, %v442_v49, %v5341_v54  ;;  %579 = vst.msk [vmem:[#allocation2 + $0x60] sm:$0xff] %vm565_vm1, %v535_v63  ;;  %v322_v34 = vmul.f32 %v5102_v5, %v283_v59 }
  0x39   : > { %4739 = vmatpush3.bf16.msra.mxu0 %v5007_v61  ;;  %4772 = vmatprep.subr.bf16.mxu1 %v5300_v18  ;;  %v5345_v61 = vpack.c.bf16 %v660_v53, %v659_v45  ;;  %v677_v4 = vld [vmem:[#allocation2 + $0x120] sm:$0xff]  ;;  %v5358_v11 = vrot.slane %v374_v56, 7  ;;  %580 = vst.msk [vmem:[#allocation2 + $0x68] sm:$0xff] %vm565_vm1, %v444_v9  ;;  %v472_v17 = vrot.slane %v391_v0, 7  ;;  %v5373_v22 = vrot.slane %v392_v14, 7 }
  0x3a   : > { %4808 = vmatprep.subr.bf16.mxu0 %v5314_v13  ;;  %v5334_v46 = vrot.slane %v390_v35, 7  ;;  %v445_v58 = vrot.slane %v373_v37, 7  ;;  %v304_v23 = vmul.f32 %v5102_v5, %v265_v2  ;;  %v305_v24 = vmul.f32 %v5102_v5, %v266_v3 }
  0x3b   : > { %4689 = vmatmul.mubr.msk.bf16.gmra.mrb[4].mxu1 %vm565_vm1, %v5326_v33  ;;  %v545_v25 = vsel %vm430_vm2, 0.0, %v472_v17  ;;  %v361_v26 = vadd.f32 %v5109_v8, %v322_v34  ;;  %v362_v27 = vadd.f32 %v5109_v8, %v323_v19  ;;  %v306_v29 = vmul.f32 %v5102_v5, %v267_v15 }
  0x3c   : > { %v471_v62 = vsel %vm430_vm2, %v469_v38, %v5334_v46  ;;  %v536_v10 = vsel %vm430_vm2, 0.0, %v445_v58  ;;  %4673 = vmatmul.mubr.msk.bf16.gmra.mrb[4].mxu0 %vm565_vm1, %v5345_v61  ;;  %v447_v21 = vsel %vm430_vm2, %v445_v58, %v5358_v11  ;;  %v474_v30 = vsel %vm430_vm2, %v472_v17, %v5373_v22  ;;  %609 = vst.msk [vmem:[#allocation2 + $0x150] sm:$0xff] %vm565_vm1, %v545_v25 }
  0x3d   : > { %v678_v6 = vld [vmem:[#allocation2 + $0x128] sm:$0xff]  ;;  %607 = vst.msk [vmem:[#allocation2 + $0x140] sm:$0xff] %vm565_vm1, %v471_v62  ;;  %582 = vst.msk [vmem:[#allocation2 + $0x78] sm:$0xff] %vm565_vm1, %v536_v10  ;;  %v343_v31 = vadd.f32 %v5109_v8, %v304_v23  ;;  %v344_v32 = vadd.f32 %v5109_v8, %v305_v24  ;;  %v307_v35 = vmul.f32 %v5102_v5, %v268_v20  ;;  %v679_v38 = vld [vmem:[#allocation2 + $0x138] sm:$0xff]  ;;  %v393_v39 = vmax.f32 %v361_v26, 0.0 }
  0x3e   : > { %v5364_v16 = vpack.c.bf16 %v678_v6, %v677_v4  ;;  %583 = vst.msk [vmem:[#allocation2 + $0x80] sm:$0xff] %vm565_vm1, %v447_v21  ;;  %610 = vst.msk [vmem:[#allocation2 + $0x158] sm:$0xff] %vm565_vm1, %v474_v30  ;;  %v394_v40 = vmax.f32 %v362_v27, 0.0  ;;  %v345_v41 = vadd.f32 %v5109_v8, %v306_v29  ;;  %v550_v14 = vsel %vm430_vm2, %v5257_v52, 0.0  ;;  %v1022_v21 = vld [vmem:[#allocation2 + $0x1] sm:$0xff]  ;;  %v1023_v23 = vld [vmem:[#allocation2 + $0x9] sm:$0xff] }
  0x3f   : > { %v375_v37 = vmax.f32 %v343_v31, 0.0  ;;  %v376_v42 = vmax.f32 %v344_v32, 0.0  ;;  %v346_v43 = vadd.f32 %v5109_v8, %v307_v35  ;;  %v661_v45 = vld [vmem:[#allocation2 + $0x60] sm:$0xff]  ;;  %v475_v47 = vrot.slane %v393_v39, 7  ;;  %575 = vst.msk [vmem:[#allocation2 + $0x40] sm:$0x3] %vm568_vm3, %v550_v14 }
  0x40   : > { %4692 = vmatprep.mubr.msk.bf16.mxu1 %vm565_vm1, %v5364_v16  ;;  %v476_v49 = vrot.slane %v394_v40, 7  ;;  %v377_v50 = vmax.f32 %v345_v41, 0.0  ;;  %v662_v56 = vld [vmem:[#allocation2 + $0x68] sm:$0xff]  ;;  %v551_v19 = vsel %vm430_vm2, %v5262_v57, 0.0  ;;  %v552_v24 = vsel %vm430_vm2, %v5341_v54, 0.0  ;;  %v285_v27 = vld [vmem:[%s5076_s27 + $0xf0] sm:$0xff] }
  0x41   : > { %v448_v59 = vrot.slane %v375_v37, 7  ;;  %v449_v60 = vrot.slane %v376_v42, 7  ;;  %v378_v62 = vmax.f32 %v346_v43, 0.0  ;;  %v5395_v63 = vpack.c.bf16 %v662_v56, %v661_v45  ;;  %578 = vst.msk [vmem:[#allocation2 + $0x58] sm:$0x3] %vm568_vm3, %v551_v19  ;;  %v286_v30 = vld [vmem:[%s5076_s27 + $0xf8] sm:$0xff] }
  0x42   : > { %v477_v0 = vsel %vm430_vm2, %v475_v47, %v476_v49  ;;  %v546_v2 = vsel %vm430_vm2, 0.0, %v475_v47  ;;  %v451_v3 = vrot.slane %v377_v50, 7  ;;  %v553_v25 = vsel %vm430_vm2, %v5358_v11, 0.0  ;;  %581 = vst.msk [vmem:[#allocation2 + $0x70] sm:$0x3] %vm568_vm3, %v552_v24  ;;  %v1393_v41 = vld [vmem:[#allocation2 + $0xa] sm:$0xff] }
  0x43   : > { %612 = vst.msk [vmem:[#allocation2 + $0x168] sm:$0xff] %vm565_vm1, %v546_v2  ;;  %613 = vst.msk [vmem:[#allocation2 + $0x170] sm:$0xff] %vm565_vm1, %v477_v0  ;;  %v450_v6 = vsel %vm430_vm2, %v448_v59, %v449_v60  ;;  %v537_v9 = vsel %vm430_vm2, 0.0, %v448_v59  ;;  %v452_v10 = vrot.slane %v378_v62, 7  ;;  %4676 = vmatprep.mubr.msk.bf16.mxu0 %vm565_vm1, %v5395_v63  ;;  %v681_v17 = vld [vmem:[#allocation2 + $0x150] sm:$0xff]  ;;  %v554_v26 = vsel %vm430_vm2, %v449_v60, 0.0 }
  0x44   : > { %v680_v44 = vld [vmem:[#allocation2 + $0x140] sm:$0xff]  ;;  %v663_v58 = vld [vmem:[#allocation2 + $0x78] sm:$0xff]  ;;  %585 = vst.msk [vmem:[#allocation2 + $0x90] sm:$0xff] %vm565_vm1, %v537_v9  ;;  %586 = vst.msk [vmem:[#allocation2 + $0x98] sm:$0xff] %vm565_vm1, %v450_v6  ;;  %v538_v34 = vsel %vm430_vm2, 0.0, %v451_v3  ;;  %v556_v11 = vsel %vm430_vm2, %v5187_v36, 0.0  ;;  %v1086_v40 = vpack.c.bf16 %v1023_v23, %v1022_v21 }
  0x45   : > { %v5393_v53 = vpack.c.bf16 %v680_v44, %v679_v38  ;;  %v664_v4 = vld [vmem:[#allocation2 + $0x80] sm:$0xff]  ;;  %v682_v20 = vld [vmem:[#allocation2 + $0x158] sm:$0xff]  ;;  %v453_v52 = vsel %vm430_vm2, %v451_v3, %v452_v10  ;;  %588 = vst.msk [vmem:[#allocation2 + $0xa8] sm:$0xff] %vm565_vm1, %v538_v34  ;;  %v555_v54 = vsel %vm430_vm2, %v452_v10, 0.0  ;;  %v557_v29 = vsel %vm430_vm2, %v5196_v48, 0.0  ;;  %v1028_v23 = vld [vmem:[#allocation2 + $0x49] sm:$0xff] }
  0x46   : > { %v5409_v15 = vpack.c.bf16 %v664_v4, %v663_v58  ;;  %v5428_v57 = vpack.c.bf16 %v682_v20, %v681_v17  ;;  %589 = vst.msk [vmem:[#allocation2 + $0xb0] sm:$0xff] %vm565_vm1, %v453_v52  ;;  %v558_v31 = vsel %vm430_vm2, %v5213_v1, 0.0  ;;  %v559_v32 = vsel %vm430_vm2, %v5238_v28, 0.0  ;;  %v1392_v48 = vld [vmem:[#allocation2 + $0x2] sm:$0xff]  ;;  %v1024_v59 = vld [vmem:[#allocation2 + $0x19] sm:$0xff] }
  0x47   : > { %4693 = vmatmul.mubr.msk.bf16.gmra.mrb[8].mxu1 %vm565_vm1, %v5393_v53  ;;  %584 = vst.msk [vmem:[#allocation2 + $0x88] sm:$0x3] %vm568_vm3, %v553_v25  ;;  %587 = vst.msk [vmem:[#allocation2 + $0xa0] sm:$0x3] %vm568_vm3, %v554_v26  ;;  %v560_v35 = vsel %vm430_vm2, %v5286_v12, 0.0  ;;  %v561_v36 = vsel %vm430_vm2, %v5334_v46, 0.0  ;;  %v324_v12 = vmul.f32 %v5102_v5, %v285_v27  ;;  %v325_v46 = vmul.f32 %v5102_v5, %v286_v30 }
  0x48   : > { %4677 = vmatmul.mubr.msk.bf16.gmra.mrb[8].mxu0 %vm565_vm1, %v5409_v15  ;;  %590 = vst.msk [vmem:[#allocation2 + $0xb8] sm:$0x3] %vm568_vm3, %v555_v54  ;;  %593 = vst.msk [vmem:[#allocation2 + $0xd0] sm:$0x3] %vm568_vm3, %v556_v11  ;;  %4696 = vmatprep.mubr.msk.bf16.mxu1 %vm565_vm1, %v5428_v57  ;;  %v562_v1 = vsel %vm430_vm2, %v5373_v22, 0.0  ;;  %v563_v28 = vsel %vm430_vm2, %v476_v49, 0.0  ;;  %v1456_v5 = vpack.c.bf16 %v1393_v41, %v1392_v48 }
  0x49   : > { %596 = vst.msk [vmem:[#allocation2 + $0xe8] sm:$0x3] %vm568_vm3, %v557_v29  ;;  %599 = vst.msk [vmem:[#allocation2 + $0x100] sm:$0x3] %vm568_vm3, %v558_v31  ;;  %v363_v22 = vadd.f32 %v5109_v8, %v324_v12  ;;  %v364_v44 = vadd.f32 %v5109_v8, %v325_v46  ;;  %v1025_v60 = vld [vmem:[#allocation2 + $0x21] sm:$0xff]  ;;  %v1026_v8 = vld [vmem:[#allocation2 + $0x31] sm:$0xff] }
  0x4a   : > { %602 = vst.msk [vmem:[#allocation2 + $0x118] sm:$0x3] %vm568_vm3, %v559_v32  ;;  %605 = vst.msk [vmem:[#allocation2 + $0x130] sm:$0x3] %vm568_vm3, %v560_v35  ;;  %v683_v38 = vld [vmem:[#allocation2 + $0x168] sm:$0xff]  ;;  %v684_v39 = vld [vmem:[#allocation2 + $0x170] sm:$0xff]  ;;  %v5479_v3 = vpack.c.bf16 %v1025_v60, %v1024_v59 }
  0x4b   : > { %608 = vst.msk [vmem:[#allocation2 + $0x148] sm:$0x3] %vm568_vm3, %v561_v36  ;;  %611 = vst.msk [vmem:[#allocation2 + $0x160] sm:$0x3] %vm568_vm3, %v562_v1  ;;  %v5464_v37 = vpack.c.bf16 %v684_v39, %v683_v38  ;;  %v665_v42 = vld [vmem:[#allocation2 + $0x90] sm:$0xff]  ;;  %v666_v43 = vld [vmem:[#allocation2 + $0x98] sm:$0xff] }
  0x4c   : > { %614 = vst.msk [vmem:[#allocation2 + $0x178] sm:$0x3] %vm568_vm3, %v563_v28  ;;  %v5468_v45 = vpack.c.bf16 %v666_v43, %v665_v42  ;;  %v667_v47 = vld [vmem:[#allocation2 + $0xa8] sm:$0xff]  ;;  %v395_v50 = vmax.f32 %v363_v22, 0.0  ;;  %v396_v56 = vmax.f32 %v364_v44, 0.0  ;;  %v1027_v62 = vld [vmem:[#allocation2 + $0x39] sm:$0xff] }
  0x4d   : > { %v668_v49 = vld [vmem:[#allocation2 + $0xb0] sm:$0xff]  ;;  %v1394_v4 = vld [vmem:[#allocation2 + $0x1a] sm:$0xff]  ;;  %v1395_v6 = vld [vmem:[#allocation2 + $0x22] sm:$0xff]  ;;  %v5484_v14 = vpack.c.bf16 %v1027_v62, %v1026_v8 }
  0x4e   : > { %4680 = vmatprep.mubr.msk.bf16.mxu0 %vm565_vm1, %v5468_v45  ;;  %v5474_v58 = vpack.c.bf16 %v668_v49, %v667_v47  ;;  %v478_v0 = vrot.slane %v395_v50, 7  ;;  %v479_v2 = vrot.slane %v396_v56, 7  ;;  %v1396_v17 = vld [vmem:[#allocation2 + $0x32] sm:$0xff]  ;;  %v1397_v34 = vld [vmem:[#allocation2 + $0x3a] sm:$0xff]  ;;  %v5493_v52 = vpack.c.bf16 %v1395_v6, %v1394_v4  ;;  %v5011_v25 = vld [vmem:[%s6237_s3 + $0x48] sm:$0xff]  }
  0x4f   : > { %4697 = vmatmul.mubr.msk.bf16.gmra.mrb[12].mxu1 %vm565_vm1, %v5464_v37  ;;  %v5010_v20 = vld [vmem:[%s6237_s3 + $0x38] sm:$0xff]   ;;  %v5497_v21 = vpack.c.bf16 %v1397_v34, %v1396_v17  ;;  %v1030_v26 = vld [vmem:[#allocation2 + $0x61] sm:$0xff]  ;;  %v1031_v27 = vld [vmem:[#allocation2 + $0x69] sm:$0xff] }
  0x50   : > { %4704 = vmatprep.mubr.msk.bf16.mxu1 %vm565_vm1, %v1086_v40  ;;  %4681 = vmatmul.mubr.msk.bf16.gmra.mrb[12].mxu0 %vm565_vm1, %v5474_v58  ;;  %v480_v9 = vsel %vm430_vm2, %v478_v0, %v479_v2  ;;  %v547_v10 = vsel %vm430_vm2, 0.0, %v478_v0  ;;  %v564_v19 = vsel %vm430_vm2, %v479_v2, 0.0  ;;  %v1029_v24 = vld [vmem:[#allocation2 + $0x51] sm:$0xff]  ;;  %v5520_v30 = vld [vmem:[%s6237_s3 + $0x60] sm:$0xff]   ;;  %v5522_v31 = vpack.c.bf16 %v1031_v27, %v1030_v26  ;;  %v1036_v44 = vld [vmem:[#allocation2 + $0xa9] sm:$0xff] }
  0x51   : > { %4740 = vmatprep.mubr.msk.bf16.mxu0 %vm565_vm1, %v1456_v5  ;;  %615 = vst.msk [vmem:[#allocation2 + $0x180] sm:$0xff] %vm565_vm1, %v547_v10  ;;  %616 = vst.msk [vmem:[#allocation2 + $0x188] sm:$0xff] %vm565_vm1, %v480_v9  ;;  %v5508_v54 = vld [vmem:[%s6237_s3 + $0x50] sm:$0xff]   ;;  %v1400_v32 = vld [vmem:[#allocation2 + $0x62] sm:$0xff] }
  0x52   : > { %617 = vst.msk [vmem:[#allocation2 + $0x190] sm:$0x3] %vm568_vm3, %v564_v19  ;;  %v1398_v11 = vld [vmem:[#allocation2 + $0x4a] sm:$0xff]  ;;  %v1399_v29 = vld [vmem:[#allocation2 + $0x52] sm:$0xff]  ;;  %v1033_v1 = vld [vmem:[#allocation2 + $0x81] sm:$0xff] }
  0x53   : > { %v1401_v35 = vld [vmem:[#allocation2 + $0x6a] sm:$0xff]  ;;  %v5525_v36 = vpack.c.bf16 %v1399_v29, %v1398_v11  ;;  %v1032_v48 = vld [vmem:[#allocation2 + $0x79] sm:$0xff]  ;;  %v1403_v39 = vld [vmem:[#allocation2 + $0x82] sm:$0xff] }
  0x54   : > { %v1034_v28 = vld [vmem:[#allocation2 + $0x91] sm:$0xff]  ;;  %v1035_v12 = vld [vmem:[#allocation2 + $0x99] sm:$0xff]  ;;  %v5536_v46 = vpack.c.bf16 %v1033_v1, %v1032_v48  ;;  %v1038_v49 = vld [vmem:[#allocation2 + $0xc1] sm:$0xff] }
  0x55   : > { %v1402_v38 = vld [vmem:[#allocation2 + $0x7a] sm:$0xff]  ;;  %v5540_v40 = vpack.c.bf16 %v1035_v12, %v1034_v28  ;;  %v1404_v41 = vld [vmem:[#allocation2 + $0x92] sm:$0xff]  ;;  %v1039_v5 = vld [vmem:[#allocation2 + $0xc9] sm:$0xff] }
  0x56   : > { %v1405_v42 = vld [vmem:[#allocation2 + $0x9a] sm:$0xff]  ;;  %v5542_v43 = vpack.c.bf16 %v1403_v39, %v1402_v38  ;;  %v1037_v47 = vld [vmem:[#allocation2 + $0xb1] sm:$0xff]  ;;  %v5556_v60 = vpack.c.bf16 %v1039_v5, %v1038_v49  ;;  %v1408_v8 = vld [vmem:[#allocation2 + $0xc2] sm:$0xff] }
  0x57   : > { %4705 = vmatmul.mubr.msk.bf16.vlgmr.msra.gmra.mrb[16].mxu1 %vm565_vm1, %v5479_v3  ;;  %v5546_v22 = vpack.c.bf16 %v1405_v42, %v1404_v41  ;;  %v5552_v50 = vpack.c.bf16 %v1037_v47, %v1036_v44  ;;  %v1406_v56 = vld [vmem:[#allocation2 + $0xaa] sm:$0xff]  ;;  %v1407_v59 = vld [vmem:[#allocation2 + $0xb2] sm:$0xff]  ;;  %v1041_v6 = vld [vmem:[#allocation2 + $0xe1] sm:$0xff] }
  0x58   : > { %4773 = vmatpush3.bf16.msra.mxu1 %v5300_v18  ;;  %4708 = vmatprep.mubr.msk.bf16.mxu1 %vm565_vm1, %v5484_v14  ;;  %v5512_v18 = vpack.c.bf16 %v1029_v24, %v1028_v23  ;;  %v1409_v62 = vld [vmem:[#allocation2 + $0xca] sm:$0xff]  ;;  %v5558_v0 = vpack.c.bf16 %v1407_v59, %v1406_v56  ;;  %v1040_v4 = vld [vmem:[#allocation2 + $0xd9] sm:$0xff]  ;;  %v1411_v19 = vld [vmem:[#allocation2 + $0xe2] sm:$0xff] }
  0x59   : > { %4774 = vmatprep.subr.bf16.mxu1 %v5010_v20  ;;  %4741 = vmatmul.mubr.msk.bf16.vlgmr.msra.gmra.mrb[16].mxu0 %vm565_vm1, %v5493_v52  ;;  %v5562_v2 = vpack.c.bf16 %v1409_v62, %v1408_v8  ;;  %v1042_v9 = vld [vmem:[#allocation2 + $0xf1] sm:$0xff]  ;;  %v1043_v10 = vld [vmem:[#allocation2 + $0xf9] sm:$0xff]  ;;  %v5568_v17 = vpack.c.bf16 %v1041_v6, %v1040_v4  ;;  %v1044_v27 = vld [vmem:[#allocation2 + $0x109] sm:$0xff] }
  0x5a   : > { %4809 = vmatpush3.bf16.msra.mxu0 %v5314_v13  ;;  %4744 = vmatprep.mubr.msk.bf16.mxu0 %vm565_vm1, %v5497_v21  ;;  %v5529_v13 = vpack.c.bf16 %v1401_v35, %v1400_v32  ;;  %v1410_v34 = vld [vmem:[#allocation2 + $0xda] sm:$0xff]  ;;  %v1412_v23 = vld [vmem:[#allocation2 + $0xf2] sm:$0xff]  ;;  %v1047_v32 = vld [vmem:[#allocation2 + $0x129] sm:$0xff] }
  0x5b   : > { %4810 = vmatprep.subr.bf16.mxu0 %v5011_v25  ;;  %v1413_v24 = vld [vmem:[#allocation2 + $0xfa] sm:$0xff]  ;;  %v1045_v11 = vld [vmem:[#allocation2 + $0x111] sm:$0xff]  ;;  %v1416_v12 = vld [vmem:[#allocation2 + $0x122] sm:$0xff] }
  0x5c   : > { %4775 = vmatpush3.bf16.msra.mxu1 %v5010_v20  ;;  %v5572_v20 = vpack.c.bf16 %v1043_v10, %v1042_v9  ;;  %v5578_v26 = vpack.c.bf16 %v1413_v24, %v1412_v23  ;;  %v1046_v29 = vld [vmem:[#allocation2 + $0x121] sm:$0xff]  ;;  %v5584_v35 = vpack.c.bf16 %v1045_v11, %v1044_v27  ;;  %v1414_v48 = vld [vmem:[#allocation2 + $0x10a] sm:$0xff]  ;;  %v1415_v1 = vld [vmem:[#allocation2 + $0x112] sm:$0xff] }
  0x5d   : > { %4844 = vmatprep.subr.bf16.mxu1 %v5508_v54  ;;  %v5588_v28 = vpack.c.bf16 %v1047_v32, %v1046_v29  ;;  %v1417_v38 = vld [vmem:[#allocation2 + $0x12a] sm:$0xff]  ;;  %v5590_v39 = vpack.c.bf16 %v1415_v1, %v1414_v48  ;;  %v1048_v42 = vld [vmem:[#allocation2 + $0x139] sm:$0xff]  ;;  %v1049_v44 = vld [vmem:[#allocation2 + $0x141] sm:$0xff] }
  0x5e   : > { %4811 = vmatpush3.bf16.msra.mxu0 %v5011_v25  ;;  %v5574_v25 = vpack.c.bf16 %v1411_v19, %v1410_v34  ;;  %v5594_v41 = vpack.c.bf16 %v1417_v38, %v1416_v12  ;;  %v1050_v47 = vld [vmem:[#allocation2 + $0x151] sm:$0xff]  ;;  %v1051_v49 = vld [vmem:[#allocation2 + $0x159] sm:$0xff]  ;;  %v5600_v5 = vpack.c.bf16 %v1049_v44, %v1048_v42  ;;  %v1419_v59 = vld [vmem:[#allocation2 + $0x142] sm:$0xff] }
  0x5f   : > { %4709 = vmatmul.mubr.msk.bf16.gmra.mrb[20].mxu1 %vm565_vm1, %v5512_v18  ;;  %4880 = vmatprep.subr.bf16.mxu0 %v5520_v30  ;;  %v1418_v56 = vld [vmem:[#allocation2 + $0x13a] sm:$0xff]  ;;  %v5604_v8 = vpack.c.bf16 %v1051_v49, %v1050_v47  ;;  %v1420_v62 = vld [vmem:[#allocation2 + $0x152] sm:$0xff]  ;;  %v1052_v10 = vld [vmem:[#allocation2 + $0x169] sm:$0xff] }
  0x60   : > { %4712 = vmatprep.mubr.msk.bf16.mxu1 %vm565_vm1, %v5522_v31  ;;  %v1421_v4 = vld [vmem:[#allocation2 + $0x15a] sm:$0xff]  ;;  %v5606_v6 = vpack.c.bf16 %v1419_v59, %v1418_v56  ;;  %v1053_v34 = vld [vmem:[#allocation2 + $0x171] sm:$0xff]  ;;  %v704_v12 = vld [vmem:[#allocation3 + $0x98] sm:$0xff] }
  0x61   : > { %4745 = vmatmul.mubr.msk.bf16.gmra.mrb[20].mxu0 %vm565_vm1, %v5525_v36  ;;  %v5610_v9 = vpack.c.bf16 %v1421_v4, %v1420_v62  ;;  %v1101_v19 = vpack.c.bf16 %v1053_v34, %v1052_v10  ;;  %v1422_v23 = vld [vmem:[#allocation2 + $0x16a] sm:$0xff]  ;;  %v1423_v24 = vld [vmem:[#allocation2 + $0x172] sm:$0xff]  ;;  %v687_v38 = vld [vmem:[#allocation3 + $0x10] sm:$0xff] }
  0x62   : > { %4748 = vmatprep.mubr.msk.bf16.mxu0 %vm565_vm1, %v5529_v13  ;;  %v5618_v27 = vpack.c.bf16 %v1423_v24, %v1422_v23  ;;  %v5014_v11 = vld [vmem:[%s6237_s3 + $0x58] sm:$0xff]   ;;  %v2900_v42 = vld [vmem:[#allocation2 + $0x168] sm:$0xff]  ;;  %v2901_v44 = vld [vmem:[#allocation2 + $0x170] sm:$0xff] }
  0x63   : > { %v685_v47 = vld [vmem:[#allocation3] sm:$0xff]  ;;  %v702_v56 = vld [vmem:[#allocation3 + $0x88] sm:$0xff]  ;;  %v688_v59 = vld [vmem:[#allocation3 + $0x18] sm:$0xff]  ;;  %v2951_v23 = vpack.c.bf16 %v2901_v44, %v2900_v42 }
  0x64   : > { %v686_v10 = vld [vmem:[#allocation3 + $0x8] sm:$0xff]  ;;  %v3618_v42 = vld [vmem:[#allocation2 + $0x62] sm:$0xff]  ;;  %v3619_v44 = vld [vmem:[#allocation2 + $0x6a] sm:$0xff] }
  0x67   : > { %4713 = vmatmul.mubr.msk.bf16.gmra.mrb[24].mxu1 %vm565_vm1, %v5536_v46 }
  0x68   : > { %4716 = vmatprep.mubr.msk.bf16.mxu1 %vm565_vm1, %v5540_v40 }
  0x69   : > { %4749 = vmatmul.mubr.msk.bf16.gmra.mrb[24].mxu0 %vm565_vm1, %v5542_v43 }
  0x6a   : > { %4752 = vmatprep.mubr.msk.bf16.mxu0 %vm565_vm1, %v5546_v22 }
  0x6f   : > { %4717 = vmatmul.mubr.msk.bf16.gmra.mrb[28].mxu1 %vm565_vm1, %v5552_v50 }
  0x70   : > { %4720 = vmatprep.mubr.msk.bf16.mxu1 %vm565_vm1, %v5556_v60 }
  0x71   : > { %4753 = vmatmul.mubr.msk.bf16.gmra.mrb[28].mxu0 %vm565_vm1, %v5558_v0 }
  0x72   : > { %4756 = vmatprep.mubr.msk.bf16.mxu0 %vm565_vm1, %v5562_v2 }
  0x77   : > { %4721 = vmatmul.mubr.msk.bf16.gmra.mrb[32].mxu1 %vm565_vm1, %v5568_v17 }
  0x78   : > { %4724 = vmatprep.mubr.msk.bf16.mxu1 %vm565_vm1, %v5572_v20 }
  0x79   : > { %4757 = vmatmul.mubr.msk.bf16.gmra.mrb[32].mxu0 %vm565_vm1, %v5574_v25 }
  0x7a   : > { %4760 = vmatprep.mubr.msk.bf16.mxu0 %vm565_vm1, %v5578_v26 }
  0x7f   : > { %4725 = vmatmul.mubr.msk.bf16.gmra.mrb[36].mxu1 %vm565_vm1, %v5584_v35 }
  0x80   : > { %4728 = vmatprep.mubr.msk.bf16.mxu1 %vm565_vm1, %v5588_v28 }
  0x81   : > { %4761 = vmatmul.mubr.msk.bf16.gmra.mrb[36].mxu0 %vm565_vm1, %v5590_v39 }
  0x82   : > { %4764 = vmatprep.mubr.msk.bf16.mxu0 %vm565_vm1, %v5594_v41 }
  0x87   : > { %4729 = vmatmul.mubr.msk.bf16.gmra.mrb[40].mxu1 %vm565_vm1, %v5600_v5 }
  0x88   : > { %4732 = vmatprep.mubr.msk.bf16.mxu1 %vm565_vm1, %v5604_v8 }
  0x89   : > { %4765 = vmatmul.mubr.msk.bf16.gmra.mrb[40].mxu0 %vm565_vm1, %v5606_v6 }
  0x8a   : > { %4768 = vmatprep.mubr.msk.bf16.mxu0 %vm565_vm1, %v5610_v9 }
  0x8f   : > { %4733 = vmatmul.mubr.msk.bf16.gmra.mrb[44].mxu1 %vm565_vm1, %v1101_v19 }
  0x90   : > { %4776 = vmatprep.mubr.msk.bf16.mxu1 %vm565_vm1, %v5260_v55  ;;  %v5015_v55 = vld [vmem:[%s6237_s3 + $0x68] sm:$0xff]  }
  0x91   : > { %4769 = vmatmul.mubr.msk.bf16.gmra.mrb[44].mxu0 %vm565_vm1, %v5618_v27 }
  0x92   : > { %4812 = vmatprep.mubr.msk.bf16.mxu0 %vm565_vm1, %v5479_v3  ;;  %v5016_v3 = vld [vmem:[%s6237_s3 + $0x70] sm:$0xff]  }
  0x97   : > { %4777 = vmatmul.mubr.msk.bf16.vlgmr.msra.gmra.mrb[48].mxu1 %vm565_vm1, %v5338_v51  ;;  %v5017_v51 = vld [vmem:[%s6237_s3 + $0x80] sm:$0xff]  }
  0x98   : > { %4845 = vmatpush3.bf16.msra.mxu1 %v5508_v54  ;;  %4780 = vmatprep.mubr.msk.bf16.mxu1 %vm565_vm1, %v5345_v61  ;;  %v1777_v61 = vld [vmem:[#allocation2 + $0xc0] sm:$0xff]  ;;  %v1779_v54 = vld [vmem:[#allocation2 + $0xd8] sm:$0xff] }
  0x99   : > { %4846 = vmatprep.subr.bf16.mxu1 %v5014_v11  ;;  %4813 = vmatmul.mubr.msk.bf16.vlgmr.msra.gmra.mrb[48].mxu0 %vm565_vm1, %v5484_v14  ;;  %v1778_v14 = vld [vmem:[#allocation2 + $0xc8] sm:$0xff] }
  0x9a   : > { %4881 = vmatpush3.bf16.msra.mxu0 %v5520_v30  ;;  %4816 = vmatprep.mubr.msk.bf16.mxu0 %vm565_vm1, %v5512_v18  ;;  %v1780_v30 = vld [vmem:[#allocation2 + $0xe0] sm:$0xff]  ;;  %v1834_v29 = vpack.c.bf16 %v1778_v14, %v1777_v61  ;;  %v2534_v14 = vld [vmem:[#allocation2 + $0x18a] sm:$0xff] }
  0x9b   : > { %4882 = vmatprep.subr.bf16.mxu0 %v5015_v55  ;;  %v2533_v61 = vld [vmem:[#allocation2 + $0x182] sm:$0xff] }
  0x9c   : > { %4847 = vmatpush3.bf16.msra.mxu1 %v5014_v11 }
  0x9d   : > { %4916 = vmatprep.subr.bf16.mxu1 %v5016_v3 }
  0x9e   : > { %4883 = vmatpush3.bf16.msra.mxu0 %v5015_v55 }
  0x9f   : > { %4781 = vmatmul.mubr.msk.bf16.gmra.mrb[52].mxu1 %vm565_vm1, %v5395_v63  ;;  %4952 = vmatprep.subr.bf16.mxu0 %v5017_v51 }
  0xa0   : > { %4784 = vmatprep.mubr.msk.bf16.mxu1 %vm565_vm1, %v5409_v15 }
  0xa1   : > { %4817 = vmatmul.mubr.msk.bf16.gmra.mrb[52].mxu0 %vm565_vm1, %v5522_v31  ;;  %v1835_v31 = vpack.c.bf16 %v1780_v30, %v1779_v54  ;;  %v3244_v30 = vld [vmem:[#allocation2 + $0x31] sm:$0xff] }
  0xa2   : > { %4820 = vmatprep.mubr.msk.bf16.mxu0 %vm565_vm1, %v5536_v46  ;;  %v2164_v46 = vld [vmem:[#allocation2 + $0x189] sm:$0xff] }
  0xa7   : > { %4785 = vmatmul.mubr.msk.bf16.gmra.mrb[56].mxu1 %vm565_vm1, %v5468_v45 }
  0xa8   : > { %4788 = vmatprep.mubr.msk.bf16.mxu1 %vm565_vm1, %v5474_v58 }
  0xa9   : > { %4821 = vmatmul.mubr.msk.bf16.gmra.mrb[56].mxu0 %vm565_vm1, %v5540_v40  ;;  %v2874_v40 = vld [vmem:[#allocation2 + $0x30] sm:$0xff] }
  0xaa   : > { %4824 = vmatprep.mubr.msk.bf16.mxu0 %vm565_vm1, %v5552_v50  ;;  %v2875_v50 = vld [vmem:[#allocation2 + $0x38] sm:$0xff] }
  0xaf   : > { %4789 = vmatmul.mubr.msk.bf16.gmra.mrb[60].mxu1 %vm565_vm1, %v1834_v29 }
  0xb0   : > { %4792 = vmatprep.mubr.msk.bf16.mxu1 %vm565_vm1, %v1835_v31 }
  0xb1   : > { %4825 = vmatmul.mubr.msk.bf16.gmra.mrb[60].mxu0 %vm565_vm1, %v5556_v60 }
  0xb2   : > { %4828 = vmatprep.mubr.msk.bf16.mxu0 %vm565_vm1, %v5568_v17  ;;  %v2877_v17 = vld [vmem:[#allocation2 + $0x50] sm:$0xff] }
  0xb7   : > { %4793 = vmatmul.mubr.msk.bf16.gmra.mrb[64].mxu1 %vm565_vm1, %v5279_v7  ;;  %v1793_v7 = vld [vmem:[#allocation2 + $0x180] sm:$0xff] }
  0xb8   : > { %4796 = vmatprep.mubr.msk.bf16.mxu1 %vm565_vm1, %v5326_v33  ;;  %v1794_v33 = vld [vmem:[#allocation2 + $0x188] sm:$0xff] }
  0xb9   : > { %4829 = vmatmul.mubr.msk.bf16.gmra.mrb[64].mxu0 %vm565_vm1, %v5572_v20  ;;  %v5018_v20 = vld [vmem:[%s6237_s3 + $0x78] sm:$0xff]  }
  0xba   : > { %4832 = vmatprep.mubr.msk.bf16.mxu0 %vm565_vm1, %v5584_v35  ;;  %v2899_v35 = vld [vmem:[#allocation2 + $0x158] sm:$0xff] }
  0xbf   : > { %4797 = vmatmul.mubr.msk.bf16.gmra.mrb[68].mxu1 %vm565_vm1, %v5364_v16  ;;  %v5693_v16 = vpack.c.bf16 %v1794_v33, %v1793_v7  ;;  %v5761_v7 = vpack.c.bf16 %v2534_v14, %v2533_v61  ;;  %v708_v33 = vld [vmem:[#allocation3 + $0xb8] sm:$0xff] }
  0xc0   : > { %4800 = vmatprep.mubr.msk.bf16.mxu1 %vm565_vm1, %v5393_v53  ;;  %v2163_v53 = vld [vmem:[#allocation2 + $0x181] sm:$0xff] }
  0xc1   : > { %4833 = vmatmul.mubr.msk.bf16.gmra.mrb[68].mxu0 %vm565_vm1, %v5588_v28  ;;  %v2212_v60 = vpack.c.bf16 %v2164_v46, %v2163_v53  ;;  %v701_v28 = vld [vmem:[#allocation3 + $0x80] sm:$0xff]  ;;  %v2904_v53 = vld [vmem:[#allocation2 + $0x198] sm:$0xff]  ;;  %v2905_v46 = vld [vmem:[#allocation2 + $0x1a0] sm:$0xff] }
  0xc2   : > { %4836 = vmatprep.mubr.msk.bf16.mxu0 %vm565_vm1, %v5600_v5  ;;  %v696_v14 = vld [vmem:[#allocation3 + $0x58] sm:$0xff] }
  0xc7   : > { %4801 = vmatmul.mubr.msk.bf16.gmra.mrb[72].mxu1 %vm565_vm1, %v5428_v57  ;;  %v2938_v57 = vpack.c.bf16 %v2875_v50, %v2874_v40 }
  0xc8   : > { %4804 = vmatprep.mubr.msk.bf16.mxu1 %vm565_vm1, %v5464_v37  ;;  %v2876_v37 = vld [vmem:[#allocation2 + $0x48] sm:$0xff] }
  0xc9   : > { %4837 = vmatmul.mubr.msk.bf16.gmra.mrb[72].mxu0 %vm565_vm1, %v5604_v8  ;;  %v2939_v32 = vpack.c.bf16 %v2877_v17, %v2876_v37  ;;  %v3614_v37 = vld [vmem:[#allocation2 + $0x32] sm:$0xff]  ;;  %v3615_v17 = vld [vmem:[#allocation2 + $0x3a] sm:$0xff] }
  0xca   : > { %4840 = vmatprep.mubr.msk.bf16.mxu0 %vm565_vm1, %v1101_v19 }
  0xcf   : > { %4805 = vmatmul.mubr.msk.bf16.gmra.mrb[76].mxu1 %vm565_vm1, %v5693_v16 }
  0xd0   : > { %4848 = vmatprep.mubr.msk.bf16.mxu1 %vm565_vm1, %v5493_v52  ;;  %v5019_v52 = vld [vmem:[%s6237_s3 + $0x88] sm:$0xff]  }
  0xd1   : > { %4841 = vmatmul.mubr.msk.bf16.gmra.mrb[76].mxu0 %vm565_vm1, %v2212_v60  ;;  %v706_v60 = vld [vmem:[#allocation3 + $0xa8] sm:$0xff] }
  0xd2   : > { %4884 = vmatprep.mubr.msk.bf16.mxu0 %vm565_vm1, %v2938_v57 }
  0xd7   : > { %4849 = vmatmul.mubr.msk.bf16.vlgmr.msra.gmra.mrb[80].mxu1 %vm565_vm1, %v5497_v21  ;;  %v2891_v21 = vld [vmem:[#allocation2 + $0xf8] sm:$0xff] }
  0xd8   : > { %4917 = vmatpush3.bf16.msra.mxu1 %v5016_v3  ;;  %4852 = vmatprep.mubr.msk.bf16.mxu1 %vm565_vm1, %v5525_v36  ;;  %v2893_v36 = vld [vmem:[#allocation2 + $0x110] sm:$0xff] }
  0xd9   : > { %4918 = vmatprep.subr.bf16.mxu1 %v5018_v20  ;;  %4885 = vmatmul.mubr.msk.bf16.vlgmr.msra.gmra.mrb[80].mxu0 %vm565_vm1, %v2939_v32 }
  0xda   : > { %4953 = vmatpush3.bf16.msra.mxu0 %v5017_v51  ;;  %4888 = vmatprep.mubr.msk.bf16.mxu0 %vm565_vm1, %v5395_v63  ;;  %v2890_v63 = vld [vmem:[#allocation2 + $0xf0] sm:$0xff] }
  0xdb   : > { %4954 = vmatprep.subr.bf16.mxu0 %v5019_v52 }
  0xdc   : > { %4919 = vmatpush3.bf16.msra.mxu1 %v5018_v20 }
  0xde   : > { %4955 = vmatpush3.bf16.msra.mxu0 %v5019_v52  ;;  %v691_v52 = vld [vmem:[#allocation3 + $0x30] sm:$0xff] }
  0xdf   : > { %4853 = vmatmul.mubr.msk.bf16.gmra.mrb[84].mxu1 %vm565_vm1, %v5529_v13  ;;  %v2894_v13 = vld [vmem:[#allocation2 + $0x120] sm:$0xff] }
  0xe0   : > { %4856 = vmatprep.mubr.msk.bf16.mxu1 %vm565_vm1, %v5542_v43  ;;  %v2895_v43 = vld [vmem:[#allocation2 + $0x128] sm:$0xff] }
  0xe1   : > { %4889 = vmatmul.mubr.msk.bf16.gmra.mrb[84].mxu0 %vm565_vm1, %v5409_v15  ;;  %v2946_v15 = vpack.c.bf16 %v2891_v21, %v2890_v63 }
  0xe2   : > { %4892 = vmatprep.mubr.msk.bf16.mxu0 %vm565_vm1, %v5468_v45  ;;  %v2892_v45 = vld [vmem:[#allocation2 + $0x108] sm:$0xff] }
  0xe7   : > { %4857 = vmatmul.mubr.msk.bf16.gmra.mrb[88].mxu1 %vm565_vm1, %v5546_v22  ;;  %v2948_v22 = vpack.c.bf16 %v2895_v43, %v2894_v13  ;;  %v692_v13 = vld [vmem:[#allocation3 + $0x38] sm:$0xff]  ;;  %v3678_v43 = vpack.c.bf16 %v3615_v17, %v3614_v37 }
  0xe8   : > { %4860 = vmatprep.mubr.msk.bf16.mxu1 %vm565_vm1, %v5558_v0  ;;  %v2896_v0 = vld [vmem:[#allocation2 + $0x138] sm:$0xff] }
  0xe9   : > { %4893 = vmatmul.mubr.msk.bf16.gmra.mrb[88].mxu0 %vm565_vm1, %v5474_v58  ;;  %v2947_v58 = vpack.c.bf16 %v2893_v36, %v2892_v45  ;;  %v689_v45 = vld [vmem:[#allocation3 + $0x20] sm:$0xff] }
  0xea   : > { %4896 = vmatprep.mubr.msk.bf16.mxu0 %vm565_vm1, %v1834_v29  ;;  %v3245_v29 = vld [vmem:[#allocation2 + $0x39] sm:$0xff] }
  0xeb   : > { %v3308_v57 = vpack.c.bf16 %v3245_v29, %v3244_v30 }
  0xef   : > { %4861 = vmatmul.mubr.msk.bf16.gmra.mrb[92].mxu1 %vm565_vm1, %v5562_v2  ;;  %v2897_v2 = vld [vmem:[#allocation2 + $0x140] sm:$0xff] }
  0xf0   : > { %4864 = vmatprep.mubr.msk.bf16.mxu1 %vm565_vm1, %v5574_v25  ;;  %v2898_v25 = vld [vmem:[#allocation2 + $0x150] sm:$0xff]  ;;  %v2949_v48 = vpack.c.bf16 %v2897_v2, %v2896_v0  ;;  %v690_v0 = vld [vmem:[#allocation3 + $0x28] sm:$0xff] }
  0xf1   : > { %4897 = vmatmul.mubr.msk.bf16.gmra.mrb[92].mxu0 %vm565_vm1, %v1835_v31  ;;  %v2950_v1 = vpack.c.bf16 %v2899_v35, %v2898_v25  ;;  %v705_v31 = vld [vmem:[#allocation3 + $0xa0] sm:$0xff]  ;;  %v3248_v35 = vld [vmem:[#allocation2 + $0x61] sm:$0xff] }
  0xf2   : > { %4900 = vmatprep.mubr.msk.bf16.mxu0 %vm565_vm1, %v2946_v15  ;;  %v2953_v15 = vpack.c.bf16 %v2905_v46, %v2904_v53  ;;  %v3622_v53 = vld [vmem:[#allocation2 + $0x92] sm:$0xff]  ;;  %v3623_v46 = vld [vmem:[#allocation2 + $0x9a] sm:$0xff] }
  0xf7   : > { %4865 = vmatmul.mubr.msk.bf16.gmra.mrb[96].mxu1 %vm565_vm1, %v5578_v26  ;;  %v703_v26 = vld [vmem:[#allocation3 + $0x90] sm:$0xff] }
  0xf8   : > { %4868 = vmatprep.mubr.msk.bf16.mxu1 %vm565_vm1, %v5590_v39 }
  0xf9   : > { %4901 = vmatmul.mubr.msk.bf16.gmra.mrb[96].mxu0 %vm565_vm1, %v2947_v58 }
  0xfa   : > { %4904 = vmatprep.mubr.msk.bf16.mxu0 %vm565_vm1, %v2948_v22 }
  0xff   : > { %4869 = vmatmul.mubr.msk.bf16.gmra.mrb[100].mxu1 %vm565_vm1, %v5594_v41 }
 0x100   : > { %4872 = vmatprep.mubr.msk.bf16.mxu1 %vm565_vm1, %v5606_v6 }
 0x101   : > { %4905 = vmatmul.mubr.msk.bf16.gmra.mrb[100].mxu0 %vm565_vm1, %v2949_v48  ;;  %v3249_v48 = vld [vmem:[#allocation2 + $0x69] sm:$0xff] }
 0x102   : > { %4908 = vmatprep.mubr.msk.bf16.mxu0 %vm565_vm1, %v2950_v1 }
 0x106   : > { %v4686_v39 = vpop.f32.mrb[0].mxu1 }
 0x107   : > { %v976_v49 = vadd.f32 %v4686_v39, %v703_v26  ;;  %v895_v5 = vpop.f32.mrb[1].mxu1  ;;  %v4670_v41 = vpop.f32.mrb[0].mxu0  ;;  %4873 = vmatmul.mubr.msk.bf16.gmra.mrb[104].mxu1 %vm565_vm1, %v5610_v9  ;;  %v707_v9 = vld [vmem:[#allocation3 + $0xb0] sm:$0xff]  ;;  %v3310_v39 = vpack.c.bf16 %v3249_v48, %v3248_v35 }
 0x108   : > { %v974_v8 = vadd.f32 %v895_v5, %v701_v28  ;;  %v4687_v62 = vpop.f32.mrb[2].mxu1  ;;  %v960_v4 = vadd.f32 %v4670_v41, %v687_v38  ;;  %v831_v6 = vpop.f32.mrb[1].mxu0  ;;  %4876 = vmatprep.mubr.msk.bf16.mxu1 %vm565_vm1, %v5618_v27  ;;  %v3617_v38 = vld [vmem:[#allocation2 + $0x52] sm:$0xff]  ;;  %v3680_v41 = vpack.c.bf16 %v3619_v44, %v3618_v42  ;;  %v700_v44 = vld [vmem:[#allocation3 + $0x78] sm:$0xff] }
 0x109   : > { %1008 = vst.msk [vmem:[#allocation3 + $0x90] sm:$0xff] %vm565_vm1, %v976_v49  ;;  %v977_v34 = vadd.f32 %v4687_v62, %v704_v12  ;;  %v898_v19 = vpop.f32.mrb[3].mxu1  ;;  %v958_v24 = vadd.f32 %v831_v6, %v685_v47  ;;  %v4671_v11 = vpop.f32.mrb[2].mxu0  ;;  %4909 = vmatmul.mubr.msk.bf16.gmra.mrb[104].mxu0 %vm565_vm1, %v2951_v23  ;;  %v3616_v12 = vld [vmem:[#allocation2 + $0x4a] sm:$0xff]  ;;  %v711_v47 = vld [vmem:[#allocation3 + $0xd0] sm:$0xff] }
 0x10a   : > { %1006 = vst.msk [vmem:[#allocation3 + $0x80] sm:$0xff] %vm565_vm1, %v974_v8  ;;  %v975_v55 = vadd.f32 %v898_v19, %v702_v56  ;;  %992 = vst.msk [vmem:[#allocation3 + $0x10] sm:$0xff] %vm565_vm1, %v960_v4  ;;  %v961_v3 = vadd.f32 %v4671_v11, %v688_v59  ;;  %v834_v51 = vpop.f32.mrb[3].mxu0  ;;  %4912 = vmatprep.mubr.msk.bf16.mxu0 %vm565_vm1, %v5693_v16  ;;  %v3679_v49 = vpack.c.bf16 %v3617_v38, %v3616_v12  ;;  %v709_v5 = vld [vmem:[#allocation3 + $0xc0] sm:$0xff]  ;;  %v712_v56 = vld [vmem:[#allocation3 + $0xd8] sm:$0xff] }
 0x10b   : > { %1009 = vst.msk [vmem:[#allocation3 + $0x98] sm:$0xff] %vm565_vm1, %v977_v34  ;;  %990 = vst.msk [vmem:[#allocation3] sm:$0xff] %vm565_vm1, %v958_v24  ;;  %v959_v54 = vadd.f32 %v834_v51, %v686_v10  ;;  %v710_v8 = vld [vmem:[#allocation3 + $0xc8] sm:$0xff]  ;;  %v3251_v4 = vld [vmem:[#allocation2 + $0x81] sm:$0xff] }
 0x10c   : > { %1007 = vst.msk [vmem:[#allocation3 + $0x88] sm:$0xff] %vm565_vm1, %v975_v55  ;;  %993 = vst.msk [vmem:[#allocation3 + $0x18] sm:$0xff] %vm565_vm1, %v961_v3  ;;  %v3250_v62 = vld [vmem:[#allocation2 + $0x79] sm:$0xff]  ;;  %v3252_v19 = vld [vmem:[#allocation2 + $0x91] sm:$0xff] }
 0x10d   : > { %991 = vst.msk [vmem:[#allocation3 + $0x8] sm:$0xff] %vm565_vm1, %v959_v54  ;;  %v695_v34 = vld [vmem:[#allocation3 + $0x50] sm:$0xff]  ;;  %v693_v55 = vld [vmem:[#allocation3 + $0x40] sm:$0xff]  ;;  %v3311_v51 = vpack.c.bf16 %v3251_v4, %v3250_v62 }
 0x10e   : > { %v4690_v27 = vpop.f32.mrb[4].mxu1  ;;  %v3253_v23 = vld [vmem:[#allocation2 + $0x99] sm:$0xff]  ;;  %v3627_v12 = vld [vmem:[#allocation2 + $0xca] sm:$0xff] }
 0x10f   : > { %v980_v40 = vadd.f32 %v4690_v27, %v707_v9  ;;  %v911_v50 = vpop.f32.mrb[5].mxu1  ;;  %4877 = vmatmul.mubr.msk.bf16.gmra.mrb[108].mxu1 %vm565_vm1, %v5761_v7  ;;  %v4674_v36 = vpop.f32.mrb[4].mxu0  ;;  %v3620_v54 = vld [vmem:[#allocation2 + $0x7a] sm:$0xff]  ;;  %v3621_v9 = vld [vmem:[#allocation2 + $0x82] sm:$0xff] }
 0x110   : > { %v978_v20 = vadd.f32 %v911_v50, %v705_v31  ;;  %v4691_v32 = vpop.f32.mrb[6].mxu1  ;;  %4920 = vmatprep.mubr.msk.bf16.mxu1 %vm565_vm1, %v3308_v57  ;;  %v964_v58 = vadd.f32 %v4674_v36, %v691_v52  ;;  %v847_v22 = vpop.f32.mrb[5].mxu0  ;;  %v694_v27 = vld [vmem:[#allocation3 + $0x48] sm:$0xff]  ;;  %v3681_v37 = vpack.c.bf16 %v3621_v9, %v3620_v54  ;;  %v3254_v52 = vld [vmem:[#allocation2 + $0xa9] sm:$0xff] }
 0x111   : > { %1012 = vst.msk [vmem:[#allocation3 + $0xb0] sm:$0xff] %vm565_vm1, %v980_v40  ;;  %v981_v63 = vadd.f32 %v4691_v32, %v708_v33  ;;  %v914_v21 = vpop.f32.mrb[7].mxu1  ;;  %v962_v2 = vadd.f32 %v847_v22, %v689_v45  ;;  %v4675_v25 = vpop.f32.mrb[6].mxu0  ;;  %4913 = vmatmul.mubr.msk.bf16.gmra.mrb[108].mxu0 %vm565_vm1, %v2953_v15  ;;  %v3312_v33 = vpack.c.bf16 %v3253_v23, %v3252_v19  ;;  %v715_v32 = vld [vmem:[#allocation3 + $0xf0] sm:$0xff]  ;;  %v3257_v45 = vld [vmem:[#allocation2 + $0xc9] sm:$0xff]  ;;  %v3260_v23 = vld [vmem:[#allocation2 + $0xf1] sm:$0xff] }
 0x112   : > { %1010 = vst.msk [vmem:[#allocation3 + $0xa0] sm:$0xff] %vm565_vm1, %v978_v20  ;;  %v979_v16 = vadd.f32 %v914_v21, %v706_v60  ;;  %996 = vst.msk [vmem:[#allocation3 + $0x30] sm:$0xff] %vm565_vm1, %v964_v58  ;;  %v965_v1 = vadd.f32 %v4675_v25, %v692_v13  ;;  %v850_v26 = vpop.f32.mrb[7].mxu0  ;;  %4956 = vmatprep.mubr.msk.bf16.mxu0 %vm565_vm1, %v3678_v43  ;;  %v3682_v20 = vpack.c.bf16 %v3623_v46, %v3622_v53  ;;  %v713_v21 = vld [vmem:[#allocation3 + $0xe0] sm:$0xff]  ;;  %v3256_v15 = vld [vmem:[#allocation2 + $0xc1] sm:$0xff] }
 0x113   : > { %1013 = vst.msk [vmem:[#allocation3 + $0xb8] sm:$0xff] %vm565_vm1, %v981_v63  ;;  %994 = vst.msk [vmem:[#allocation3 + $0x20] sm:$0xff] %vm565_vm1, %v962_v2  ;;  %v963_v28 = vadd.f32 %v850_v26, %v690_v0  ;;  %v3255_v63 = vld [vmem:[#allocation2 + $0xb1] sm:$0xff]  ;;  %v716_v36 = vld [vmem:[#allocation3 + $0xf8] sm:$0xff]  ;;  %v3314_v26 = vpack.c.bf16 %v3257_v45, %v3256_v15 }
 0x114   : > { %1011 = vst.msk [vmem:[#allocation3 + $0xa8] sm:$0xff] %vm565_vm1, %v979_v16  ;;  %997 = vst.msk [vmem:[#allocation3 + $0x38] sm:$0xff] %vm565_vm1, %v965_v1  ;;  %v714_v13 = vld [vmem:[#allocation3 + $0xe8] sm:$0xff]  ;;  %v3313_v22 = vpack.c.bf16 %v3255_v63, %v3254_v52  ;;  %v699_v0 = vld [vmem:[#allocation3 + $0x70] sm:$0xff] }
 0x115   : > { %995 = vst.msk [vmem:[#allocation3 + $0x28] sm:$0xff] %vm565_vm1, %v963_v28  ;;  %v3624_v2 = vld [vmem:[#allocation2 + $0xaa] sm:$0xff]  ;;  %v3625_v25 = vld [vmem:[#allocation2 + $0xb2] sm:$0xff]  ;;  %v3626_v28 = vld [vmem:[#allocation2 + $0xc2] sm:$0xff] }
 0x116   : > { %v697_v1 = vld [vmem:[#allocation3 + $0x60] sm:$0xff]  ;;  %v3684_v62 = vpack.c.bf16 %v3627_v12, %v3626_v28  ;;  %v3629_v54 = vld [vmem:[#allocation2 + $0xe2] sm:$0xff]  ;;  %v1055_v46 = vld [vmem:[#allocation3 + $0x8] sm:$0xff] }
 0x117   : > { %4921 = vmatmul.mubr.msk.bf16.vlgmr.msra.gmra.mrb[112].mxu1 %vm565_vm1, %v5512_v18  ;;  %v3262_v52 = vld [vmem:[#allocation2 + $0x109] sm:$0xff]  ;;  %v3263_v63 = vld [vmem:[#allocation2 + $0x111] sm:$0xff] }
 0x118   : > { %4924 = vmatprep.mubr.msk.bf16.mxu1 %vm565_vm1, %v3310_v39  ;;  %v3265_v15 = vld [vmem:[#allocation2 + $0x129] sm:$0xff] }
 0x119   : > { %4957 = vmatmul.mubr.msk.bf16.vlgmr.msra.gmra.mrb[112].mxu0 %vm565_vm1, %v3679_v49  ;;  %v1060_v45 = vld [vmem:[#allocation3 + $0x30] sm:$0xff]  ;;  %v3635_v28 = vld [vmem:[#allocation2 + $0x12a] sm:$0xff] }
 0x11a   : > { %v4694_v59 = vpop.f32.mrb[8].mxu1  ;;  %4960 = vmatprep.mubr.msk.bf16.mxu0 %vm565_vm1, %v3680_v41  ;;  %v3683_v41 = vpack.c.bf16 %v3625_v25, %v3624_v2  ;;  %v3634_v2 = vld [vmem:[#allocation2 + $0x122] sm:$0xff] }
 0x11b   : > { %v984_v6 = vadd.f32 %v4694_v59, %v711_v47  ;;  %v927_v10 = vpop.f32.mrb[9].mxu1  ;;  %v4678_v61 = vpop.f32.mrb[8].mxu0 }
 0x11c   : > { %v982_v24 = vadd.f32 %v927_v10, %v709_v5  ;;  %v4695_v11 = vpop.f32.mrb[10].mxu1  ;;  %v968_v29 = vadd.f32 %v4678_v61, %v695_v34  ;;  %v863_v31 = vpop.f32.mrb[9].mxu0  ;;  %v3258_v10 = vld [vmem:[#allocation2 + $0xd9] sm:$0xff]  ;;  %v3259_v34 = vld [vmem:[#allocation2 + $0xe1] sm:$0xff] }
 0x11d   : > { %1016 = vst.msk [vmem:[#allocation3 + $0xd0] sm:$0xff] %vm565_vm1, %v984_v6  ;;  %v985_v18 = vadd.f32 %v4695_v11, %v712_v56  ;;  %v930_v3 = vpop.f32.mrb[11].mxu1  ;;  %v966_v40 = vadd.f32 %v863_v31, %v693_v55  ;;  %v4679_v50 = vpop.f32.mrb[10].mxu0  ;;  %v698_v56 = vld [vmem:[#allocation3 + $0x68] sm:$0xff]  ;;  %v1056_v11 = vld [vmem:[#allocation3 + $0x10] sm:$0xff]  ;;  %v3315_v61 = vpack.c.bf16 %v3259_v34, %v3258_v10 }
 0x11e   : > { %1014 = vst.msk [vmem:[#allocation3 + $0xc0] sm:$0xff] %vm565_vm1, %v982_v24  ;;  %v983_v30 = vadd.f32 %v930_v3, %v710_v8  ;;  %1000 = vst.msk [vmem:[#allocation3 + $0x50] sm:$0xff] %vm565_vm1, %v968_v29  ;;  %v969_v60 = vadd.f32 %v4679_v50, %v696_v14  ;;  %v866_v57 = vpop.f32.mrb[11].mxu0  ;;  %v3261_v24 = vld [vmem:[#allocation2 + $0xf9] sm:$0xff]  ;;  %v1054_v3 = vld [vmem:[#allocation3] sm:$0xff] }
 0x11f   : > { %1017 = vst.msk [vmem:[#allocation3 + $0xd8] sm:$0xff] %vm565_vm1, %v985_v18  ;;  %4925 = vmatmul.mubr.msk.bf16.gmra.mrb[116].mxu1 %vm565_vm1, %v3311_v51  ;;  %998 = vst.msk [vmem:[#allocation3 + $0x40] sm:$0xff] %vm565_vm1, %v966_v40  ;;  %v967_v17 = vadd.f32 %v866_v57, %v694_v27  ;;  %v3628_v14 = vld [vmem:[#allocation2 + $0xda] sm:$0xff]  ;;  %v3316_v31 = vpack.c.bf16 %v3261_v24, %v3260_v23  ;;  %v3630_v27 = vld [vmem:[#allocation2 + $0xf2] sm:$0xff] }
 0x120   : > { %1015 = vst.msk [vmem:[#allocation3 + $0xc8] sm:$0xff] %vm565_vm1, %v983_v30  ;;  %1001 = vst.msk [vmem:[#allocation3 + $0x58] sm:$0xff] %vm565_vm1, %v969_v60  ;;  %4928 = vmatprep.mubr.msk.bf16.mxu1 %vm565_vm1, %v3312_v33  ;;  %v1057_v30 = vld [vmem:[#allocation3 + $0x18] sm:$0xff]  ;;  %v3631_v33 = vld [vmem:[#allocation2 + $0xfa] sm:$0xff] }
 0x121   : > { %999 = vst.msk [vmem:[#allocation3 + $0x48] sm:$0xff] %vm565_vm1, %v967_v17  ;;  %4961 = vmatmul.mubr.msk.bf16.gmra.mrb[116].mxu0 %vm565_vm1, %v3681_v37  ;;  %v3685_v37 = vpack.c.bf16 %v3629_v54, %v3628_v14  ;;  %v3267_v23 = vld [vmem:[#allocation2 + $0x141] sm:$0xff]  ;;  %v3268_v24 = vld [vmem:[#allocation2 + $0x151] sm:$0xff] }
 0x122   : > { %v4698_v16 = vpop.f32.mrb[12].mxu1  ;;  %4964 = vmatprep.mubr.msk.bf16.mxu0 %vm565_vm1, %v3682_v20  ;;  %v3686_v20 = vpack.c.bf16 %v3631_v33, %v3630_v27 }
 0x123   : > { %v988_v43 = vadd.f32 %v4698_v16, %v715_v32  ;;  %v943_v58 = vpop.f32.mrb[13].mxu1  ;;  %v4682_v42 = vpop.f32.mrb[12].mxu0 }
 0x124   : > { %v986_v35 = vadd.f32 %v943_v58, %v713_v21  ;;  %v4699_v48 = vpop.f32.mrb[14].mxu1  ;;  %v972_v49 = vadd.f32 %v4682_v42, %v699_v0  ;;  %v879_v5 = vpop.f32.mrb[13].mxu0  ;;  %v3264_v21 = vld [vmem:[#allocation2 + $0x121] sm:$0xff]  ;;  %v3633_v0 = vld [vmem:[#allocation2 + $0x112] sm:$0xff] }
 0x125   : > { %1020 = vst.msk [vmem:[#allocation3 + $0xf0] sm:$0xff] %vm565_vm1, %v988_v43  ;;  %v989_v38 = vadd.f32 %v4699_v48, %v716_v36  ;;  %v946_v39 = vpop.f32.mrb[15].mxu1  ;;  %v970_v59 = vadd.f32 %v879_v5, %v697_v1  ;;  %v4683_v8 = vpop.f32.mrb[14].mxu0  ;;  %v3632_v36 = vld [vmem:[#allocation2 + $0x10a] sm:$0xff]  ;;  %v1059_v42 = vld [vmem:[#allocation3 + $0x28] sm:$0xff] }
 0x126   : > { %1018 = vst.msk [vmem:[#allocation3 + $0xe0] sm:$0xff] %vm565_vm1, %v986_v35  ;;  %v987_v47 = vadd.f32 %v946_v39, %v714_v13  ;;  %1004 = vst.msk [vmem:[#allocation3 + $0x70] sm:$0xff] %vm565_vm1, %v972_v49  ;;  %v973_v4 = vadd.f32 %v4683_v8, %v700_v44  ;;  %v882_v6 = vpop.f32.mrb[15].mxu0  ;;  %v1058_v43 = vld [vmem:[#allocation3 + $0x20] sm:$0xff]  ;;  %v1061_v48 = vld [vmem:[#allocation3 + $0x38] sm:$0xff] }
 0x127   : > { %1021 = vst.msk [vmem:[#allocation3 + $0xf8] sm:$0xff] %vm565_vm1, %v989_v38  ;;  %4929 = vmatmul.mubr.msk.bf16.gmra.mrb[120].mxu1 %vm565_vm1, %v3313_v22  ;;  %1002 = vst.msk [vmem:[#allocation3 + $0x60] sm:$0xff] %vm565_vm1, %v970_v59  ;;  %v971_v19 = vadd.f32 %v882_v6, %v698_v56  ;;  %v3317_v22 = vpack.c.bf16 %v3263_v63, %v3262_v52  ;;  %v3687_v59 = vpack.c.bf16 %v3633_v0, %v3632_v36  ;;  %v1065_v27 = vld [vmem:[#allocation3 + $0x58] sm:$0xff] }
 0x128   : > { %1019 = vst.msk [vmem:[#allocation3 + $0xe8] sm:$0xff] %vm565_vm1, %v987_v47  ;;  %4932 = vmatprep.mubr.msk.bf16.mxu1 %vm565_vm1, %v3314_v26  ;;  %1005 = vst.msk [vmem:[#allocation3 + $0x78] sm:$0xff] %vm565_vm1, %v973_v4  ;;  %v3318_v26 = vpack.c.bf16 %v3265_v15, %v3264_v21  ;;  %v3688_v6 = vpack.c.bf16 %v3635_v28, %v3634_v2  ;;  %v3272_v0 = vld [vmem:[#allocation2 + $0x181] sm:$0xff]  ;;  %v3273_v2 = vld [vmem:[#allocation2 + $0x189] sm:$0xff] }
 0x129   : > { %4965 = vmatmul.mubr.msk.bf16.gmra.mrb[120].mxu0 %vm565_vm1, %v3683_v41  ;;  %1003 = vst.msk [vmem:[#allocation3 + $0x68] sm:$0xff] %vm565_vm1, %v971_v19  ;;  %v3266_v19 = vld [vmem:[#allocation2 + $0x139] sm:$0xff] }
 0x12a   : > { %v4706_v55 = vpop.f32.mrb[16].mxu1  ;;  %4968 = vmatprep.mubr.msk.bf16.mxu0 %vm565_vm1, %v3684_v62  ;;  %v3319_v54 = vpack.c.bf16 %v3267_v23, %v3266_v19 }
 0x12b   : > { %v1330_v18 = vadd.f32 %v4706_v55, %v1056_v11  ;;  %v1201_v51 = vpop.f32.mrb[17].mxu1  ;;  %v3269_v11 = vld [vmem:[#allocation2 + $0x159] sm:$0xff] }
 0x12c   : > { %v1328_v9 = vadd.f32 %v1201_v51, %v1054_v3  ;;  %v4707_v29 = vpop.f32.mrb[18].mxu1  ;;  %v4742_v50 = vpop.f32.mrb[16].mxu0  ;;  %v1064_v55 = vld [vmem:[#allocation3 + $0x50] sm:$0xff] }
 0x12d   : > { %1362 = vst.msk [vmem:[#allocation3 + $0x10] sm:$0xff] %vm565_vm1, %v1330_v18  ;;  %v1331_v53 = vadd.f32 %v4707_v29, %v1057_v30  ;;  %v1204_v40 = vpop.f32.mrb[19].mxu1  ;;  %v1571_v57 = vpop.f32.mrb[17].mxu0  ;;  %v3636_v3 = vld [vmem:[#allocation2 + $0x13a] sm:$0xff]  ;;  %v3638_v30 = vld [vmem:[#allocation2 + $0x152] sm:$0xff] }
 0x12e   : > { %1360 = vst.msk [vmem:[#allocation3] sm:$0xff] %vm565_vm1, %v1328_v9  ;;  %v1329_v60 = vadd.f32 %v1204_v40, %v1055_v46  ;;  %v4743_v17 = vpop.f32.mrb[18].mxu0  ;;  %v3637_v9 = vld [vmem:[#allocation2 + $0x142] sm:$0xff]  ;;  %v3639_v46 = vld [vmem:[#allocation2 + $0x15a] sm:$0xff] }
 0x12f   : > { %1363 = vst.msk [vmem:[#allocation3 + $0x18] sm:$0xff] %vm565_vm1, %v1331_v53  ;;  %4933 = vmatmul.mubr.msk.bf16.gmra.mrb[124].mxu1 %vm565_vm1, %v3315_v61  ;;  %v1574_v32 = vpop.f32.mrb[19].mxu0  ;;  %v1062_v61 = vld [vmem:[#allocation3 + $0x40] sm:$0xff]  ;;  %v3320_v53 = vpack.c.bf16 %v3269_v11, %v3268_v24  ;;  %v3689_v21 = vpack.c.bf16 %v3637_v9, %v3636_v3  ;;  %v3690_v36 = vpack.c.bf16 %v3639_v46, %v3638_v30  ;;  %v3274_v3 = vld [vmem:[#allocation2 + $0x199] sm:$0xff]  ;;  %v1073_v46 = vld [vmem:[#allocation3 + $0x98] sm:$0xff] }
 0x130   : > { %1361 = vst.msk [vmem:[#allocation3 + $0x8] sm:$0xff] %vm565_vm1, %v1329_v60  ;;  %4936 = vmatprep.mubr.msk.bf16.mxu1 %vm565_vm1, %v3316_v31  ;;  %v1070_v9 = vld [vmem:[#allocation3 + $0x80] sm:$0xff] }
 0x131   : > { %4969 = vmatmul.mubr.msk.bf16.gmra.mrb[124].mxu0 %vm565_vm1, %v3685_v37 }
 0x132   : > { %v4710_v16 = vpop.f32.mrb[20].mxu1  ;;  %4972 = vmatprep.mubr.msk.bf16.mxu0 %vm565_vm1, %v3686_v20 }
 0x133   : > { %v1334_v13 = vadd.f32 %v4710_v16, %v1060_v45  ;;  %v1217_v58 = vpop.f32.mrb[21].mxu1 }
 0x134   : > { %v1426_v25 = vld [vmem:[#allocation3 + $0x10] sm:$0xff]  ;;  %v1332_v35 = vadd.f32 %v1217_v58, %v1058_v43  ;;  %v4711_v1 = vpop.f32.mrb[22].mxu1  ;;  %v4746_v47 = vpop.f32.mrb[20].mxu0  ;;  %v3270_v58 = vld [vmem:[#allocation2 + $0x169] sm:$0xff] }
 0x135   : > { %v1700_v12 = vadd.f32 %v4742_v50, %v1426_v25  ;;  %1366 = vst.msk [vmem:[#allocation3 + $0x30] sm:$0xff] %vm565_vm1, %v1334_v13  ;;  %v1424_v38 = vld [vmem:[#allocation3] sm:$0xff]  ;;  %v1335_v39 = vadd.f32 %v4711_v1, %v1061_v48  ;;  %v1220_v44 = vpop.f32.mrb[23].mxu1  ;;  %v1587_v41 = vpop.f32.mrb[21].mxu0  ;;  %v1068_v25 = vld [vmem:[#allocation3 + $0x70] sm:$0xff] }
 0x136   : > { %v1698_v49 = vadd.f32 %v1571_v57, %v1424_v38  ;;  %1364 = vst.msk [vmem:[#allocation3 + $0x20] sm:$0xff] %vm565_vm1, %v1332_v35  ;;  %v1427_v5 = vld [vmem:[#allocation3 + $0x18] sm:$0xff]  ;;  %v1333_v56 = vadd.f32 %v1220_v44, %v1059_v42  ;;  %v4747_v4 = vpop.f32.mrb[22].mxu0  ;;  %v1063_v57 = vld [vmem:[#allocation3 + $0x48] sm:$0xff]  ;;  %v1066_v1 = vld [vmem:[#allocation3 + $0x60] sm:$0xff] }
 0x137   : > { %1732 = vst.msk [vmem:[#allocation3 + $0x10] sm:$0xff] %vm565_vm1, %v1700_v12  ;;  %v1701_v8 = vadd.f32 %v4743_v17, %v1427_v5  ;;  %1367 = vst.msk [vmem:[#allocation3 + $0x38] sm:$0xff] %vm565_vm1, %v1335_v39  ;;  %v1425_v62 = vld [vmem:[#allocation3 + $0x8] sm:$0xff]  ;;  %4937 = vmatmul.mubr.msk.bf16.gmra.mrb[128].mxu1 %vm565_vm1, %v3317_v22  ;;  %v1590_v34 = vpop.f32.mrb[23].mxu0  ;;  %v3640_v12 = vld [vmem:[#allocation2 + $0x16a] sm:$0xff] }
 0x138   : > { %1730 = vst.msk [vmem:[#allocation3] sm:$0xff] %vm565_vm1, %v1698_v49  ;;  %v1699_v10 = vadd.f32 %v1574_v32, %v1425_v62  ;;  %1365 = vst.msk [vmem:[#allocation3 + $0x28] sm:$0xff] %vm565_vm1, %v1333_v56  ;;  %4940 = vmatprep.mubr.msk.bf16.mxu1 %vm565_vm1, %v3318_v26  ;;  %v3271_v22 = vld [vmem:[#allocation2 + $0x171] sm:$0xff]  ;;  %v1069_v44 = vld [vmem:[#allocation3 + $0x78] sm:$0xff]  ;;  %v3322_v49 = vpack.c.bf16 %v3273_v2, %v3272_v0 }
 0x139   : > { %1733 = vst.msk [vmem:[#allocation3 + $0x18] sm:$0xff] %vm565_vm1, %v1701_v8  ;;  %4973 = vmatmul.mubr.msk.bf16.gmra.mrb[128].mxu0 %vm565_vm1, %v3687_v59  ;;  %v3321_v28 = vpack.c.bf16 %v3271_v22, %v3270_v58  ;;  %v3641_v38 = vld [vmem:[#allocation2 + $0x172] sm:$0xff] }
 0x13a   : > { %1731 = vst.msk [vmem:[#allocation3 + $0x8] sm:$0xff] %vm565_vm1, %v1699_v10  ;;  %v4714_v18 = vpop.f32.mrb[24].mxu1  ;;  %4976 = vmatprep.mubr.msk.bf16.mxu0 %vm565_vm1, %v3688_v6  ;;  %v1067_v59 = vld [vmem:[#allocation3 + $0x68] sm:$0xff]  ;;  %v3691_v19 = vpack.c.bf16 %v3641_v38, %v3640_v12  ;;  %v1074_v0 = vld [vmem:[#allocation3 + $0xa0] sm:$0xff] }
 0x13b   : > { %v1338_v51 = vadd.f32 %v4714_v18, %v1064_v55  ;;  %v1233_v14 = vpop.f32.mrb[25].mxu1  ;;  %v1075_v38 = vld [vmem:[#allocation3 + $0xa8] sm:$0xff] }
 0x13c   : > { %v1430_v29 = vld [vmem:[#allocation3 + $0x30] sm:$0xff]  ;;  %v1336_v31 = vadd.f32 %v1233_v14, %v1062_v61  ;;  %v4715_v33 = vpop.f32.mrb[26].mxu1  ;;  %v4750_v17 = vpop.f32.mrb[24].mxu0 }
 0x13d   : > { %v1704_v40 = vadd.f32 %v4746_v47, %v1430_v29  ;;  %1370 = vst.msk [vmem:[#allocation3 + $0x50] sm:$0xff] %vm565_vm1, %v1338_v51  ;;  %v1428_v50 = vld [vmem:[#allocation3 + $0x20] sm:$0xff]  ;;  %v1339_v60 = vadd.f32 %v4715_v33, %v1065_v27  ;;  %v1236_v37 = vpop.f32.mrb[27].mxu1  ;;  %v1603_v63 = vpop.f32.mrb[25].mxu0  ;;  %v3275_v51 = vld [vmem:[#allocation2 + $0x1a1] sm:$0xff] }
 0x13e   : > { %v1702_v20 = vadd.f32 %v1587_v41, %v1428_v50  ;;  %1368 = vst.msk [vmem:[#allocation3 + $0x40] sm:$0xff] %vm565_vm1, %v1336_v31  ;;  %v1431_v32 = vld [vmem:[#allocation3 + $0x38] sm:$0xff]  ;;  %v1337_v52 = vadd.f32 %v1236_v37, %v1063_v57  ;;  %v4751_v16 = vpop.f32.mrb[26].mxu0  ;;  %v1072_v61 = vld [vmem:[#allocation3 + $0x90] sm:$0xff]  ;;  %v3323_v29 = vpack.c.bf16 %v3275_v51, %v3274_v3  ;;  %v1071_v37 = vld [vmem:[#allocation3 + $0x88] sm:$0xff] }
 0x13f   : > { %1736 = vst.msk [vmem:[#allocation3 + $0x30] sm:$0xff] %vm565_vm1, %v1704_v40  ;;  %v1705_v15 = vadd.f32 %v4747_v4, %v1431_v32  ;;  %1371 = vst.msk [vmem:[#allocation3 + $0x58] sm:$0xff] %vm565_vm1, %v1339_v60  ;;  %v1429_v45 = vld [vmem:[#allocation3 + $0x28] sm:$0xff]  ;;  %4941 = vmatmul.mubr.msk.bf16.gmra.mrb[132].mxu1 %vm565_vm1, %v3319_v54  ;;  %v1606_v43 = vpop.f32.mrb[27].mxu0  ;;  %v3645_v27 = vld [vmem:[#allocation2 + $0x1a2] sm:$0xff] }
 0x140   : > { %1734 = vst.msk [vmem:[#allocation3 + $0x20] sm:$0xff] %vm565_vm1, %v1702_v20  ;;  %v1703_v13 = vadd.f32 %v1590_v34, %v1429_v45  ;;  %1369 = vst.msk [vmem:[#allocation3 + $0x48] sm:$0xff] %vm565_vm1, %v1337_v52  ;;  %4944 = vmatprep.mubr.msk.bf16.mxu1 %vm565_vm1, %v3320_v53  ;;  %v3644_v31 = vld [vmem:[#allocation2 + $0x19a] sm:$0xff] }
 0x141   : > { %1737 = vst.msk [vmem:[#allocation3 + $0x38] sm:$0xff] %vm565_vm1, %v1705_v15  ;;  %4977 = vmatmul.mubr.msk.bf16.gmra.mrb[132].mxu0 %vm565_vm1, %v3689_v21  ;;  %v3693_v21 = vpack.c.bf16 %v3645_v27, %v3644_v31 }
 0x142   : > { %1735 = vst.msk [vmem:[#allocation3 + $0x28] sm:$0xff] %vm565_vm1, %v1703_v13  ;;  %v4718_v35 = vpop.f32.mrb[28].mxu1  ;;  %4980 = vmatprep.mubr.msk.bf16.mxu0 %vm565_vm1, %v3690_v36 }
 0x143   : > { %v1342_v48 = vadd.f32 %v4718_v35, %v1068_v25  ;;  %v1249_v26 = vpop.f32.mrb[29].mxu1 }
 0x144   : > { %v1434_v39 = vld [vmem:[#allocation3 + $0x50] sm:$0xff]  ;;  %v1340_v42 = vadd.f32 %v1249_v26, %v1066_v1  ;;  %v4719_v47 = vpop.f32.mrb[30].mxu1  ;;  %v4754_v62 = vpop.f32.mrb[28].mxu0 }
 0x145   : > { %v1708_v5 = vadd.f32 %v4750_v17, %v1434_v39  ;;  %1374 = vst.msk [vmem:[#allocation3 + $0x70] sm:$0xff] %vm565_vm1, %v1342_v48  ;;  %v1432_v56 = vld [vmem:[#allocation3 + $0x40] sm:$0xff]  ;;  %v1343_v41 = vadd.f32 %v4719_v47, %v1069_v44  ;;  %v1252_v8 = vpop.f32.mrb[31].mxu1  ;;  %v1619_v34 = vpop.f32.mrb[29].mxu0  ;;  %v1077_v48 = vld [vmem:[#allocation3 + $0xb8] sm:$0xff] }
 0x146   : > { %v1706_v4 = vadd.f32 %v1603_v63, %v1432_v56  ;;  %1372 = vst.msk [vmem:[#allocation3 + $0x60] sm:$0xff] %vm565_vm1, %v1340_v42  ;;  %v1435_v6 = vld [vmem:[#allocation3 + $0x58] sm:$0xff]  ;;  %v1341_v10 = vadd.f32 %v1252_v8, %v1067_v59  ;;  %v4755_v11 = vpop.f32.mrb[30].mxu0 }
 0x147   : > { %1740 = vst.msk [vmem:[#allocation3 + $0x50] sm:$0xff] %vm565_vm1, %v1708_v5  ;;  %v1709_v23 = vadd.f32 %v4751_v16, %v1435_v6  ;;  %1375 = vst.msk [vmem:[#allocation3 + $0x78] sm:$0xff] %vm565_vm1, %v1343_v41  ;;  %v1433_v24 = vld [vmem:[#allocation3 + $0x48] sm:$0xff]  ;;  %4945 = vmatmul.mubr.msk.bf16.gmra.mrb[136].mxu1 %vm565_vm1, %v3321_v28  ;;  %v1622_v18 = vpop.f32.mrb[31].mxu0 }
 0x148   : > { %1738 = vst.msk [vmem:[#allocation3 + $0x40] sm:$0xff] %vm565_vm1, %v1706_v4  ;;  %v1707_v55 = vadd.f32 %v1606_v43, %v1433_v24  ;;  %1373 = vst.msk [vmem:[#allocation3 + $0x68] sm:$0xff] %vm565_vm1, %v1341_v10  ;;  %4948 = vmatprep.mubr.msk.bf16.mxu1 %vm565_vm1, %v3322_v49  ;;  %v1076_v43 = vld [vmem:[#allocation3 + $0xb0] sm:$0xff] }
 0x149   : > { %1741 = vst.msk [vmem:[#allocation3 + $0x58] sm:$0xff] %vm565_vm1, %v1709_v23  ;;  %4981 = vmatmul.mubr.msk.bf16.gmra.mrb[136].mxu0 %vm565_vm1, %v3691_v19  ;;  %v1080_v4 = vld [vmem:[#allocation3 + $0xd0] sm:$0xff] }
 0x14a   : > { %1739 = vst.msk [vmem:[#allocation3 + $0x48] sm:$0xff] %vm565_vm1, %v1707_v55  ;;  %v4722_v14 = vpop.f32.mrb[32].mxu1  ;;  %4984 = vmatprep.mubr.msk.bf16.mxu0 %vm565_vm1, %v5761_v7 }
 0x14b   : > { %v1346_v54 = vadd.f32 %v4722_v14, %v1072_v61  ;;  %v1265_v30 = vpop.f32.mrb[33].mxu1  ;;  %v1079_v61 = vld [vmem:[#allocation3 + $0xc8] sm:$0xff] }
 0x14c   : > { %v1438_v33 = vld [vmem:[#allocation3 + $0x70] sm:$0xff]  ;;  %v1344_v53 = vadd.f32 %v1265_v30, %v1070_v9  ;;  %v4723_v40 = vpop.f32.mrb[34].mxu1  ;;  %v4758_v20 = vpop.f32.mrb[32].mxu0 }
 0x14d   : > { %v1712_v50 = vadd.f32 %v4754_v62, %v1438_v33  ;;  %1378 = vst.msk [vmem:[#allocation3 + $0x90] sm:$0xff] %vm565_vm1, %v1346_v54  ;;  %v1436_v60 = vld [vmem:[#allocation3 + $0x60] sm:$0xff]  ;;  %v1347_v57 = vadd.f32 %v4723_v40, %v1073_v46  ;;  %v1268_v17 = vpop.f32.mrb[35].mxu1  ;;  %v1635_v7 = vpop.f32.mrb[33].mxu0 }
 0x14e   : > { %v1710_v32 = vadd.f32 %v1619_v34, %v1436_v60  ;;  %1376 = vst.msk [vmem:[#allocation3 + $0x80] sm:$0xff] %vm565_vm1, %v1344_v53  ;;  %v1439_v52 = vld [vmem:[#allocation3 + $0x78] sm:$0xff]  ;;  %v1345_v63 = vadd.f32 %v1268_v17, %v1071_v37  ;;  %v4759_v16 = vpop.f32.mrb[34].mxu0  ;;  %v1078_v34 = vld [vmem:[#allocation3 + $0xc0] sm:$0xff] }
 0x14f   : > { %1744 = vst.msk [vmem:[#allocation3 + $0x70] sm:$0xff] %vm565_vm1, %v1712_v50  ;;  %v1713_v15 = vadd.f32 %v4755_v11, %v1439_v52  ;;  %1379 = vst.msk [vmem:[#allocation3 + $0x98] sm:$0xff] %vm565_vm1, %v1347_v57  ;;  %v1437_v45 = vld [vmem:[#allocation3 + $0x68] sm:$0xff]  ;;  %4949 = vmatmul.mubr.msk.bf16.gmra.mrb[140].mxu1 %vm565_vm1, %v3323_v29  ;;  %v1638_v13 = vpop.f32.mrb[35].mxu0  ;;  %v1081_v11 = vld [vmem:[#allocation3 + $0xd8] sm:$0xff] }
 0x150   : > { %1742 = vst.msk [vmem:[#allocation3 + $0x60] sm:$0xff] %vm565_vm1, %v1710_v32  ;;  %v1711_v36 = vadd.f32 %v1622_v18, %v1437_v45  ;;  %1377 = vst.msk [vmem:[#allocation3 + $0x88] sm:$0xff] %vm565_vm1, %v1345_v63  ;;  %v1084_v50 = vld [vmem:[#allocation3 + $0xf0] sm:$0xff]  ;;  %v1082_v37 = vld [vmem:[#allocation3 + $0xe0] sm:$0xff] }
 0x151   : > { %1745 = vst.msk [vmem:[#allocation3 + $0x78] sm:$0xff] %vm565_vm1, %v1713_v15  ;;  %4985 = vmatmul.mubr.msk.bf16.gmra.mrb[140].mxu0 %vm565_vm1, %v3693_v21  ;;  %v1085_v52 = vld [vmem:[#allocation3 + $0xf8] sm:$0xff]  ;;  %v1083_v45 = vld [vmem:[#allocation3 + $0xe8] sm:$0xff] }
 0x152   : > { %1743 = vst.msk [vmem:[#allocation3 + $0x68] sm:$0xff] %vm565_vm1, %v1711_v36  ;;  %v4726_v58 = vpop.f32.mrb[36].mxu1 }
 0x153   : > { %v1350_v22 = vadd.f32 %v4726_v58, %v1076_v43  ;;  %v1281_v2 = vpop.f32.mrb[37].mxu1 }
 0x154   : > { %v1442_v25 = vld [vmem:[#allocation3 + $0x90] sm:$0xff]  ;;  %v1348_v35 = vadd.f32 %v1281_v2, %v1074_v0  ;;  %v4727_v1 = vpop.f32.mrb[38].mxu1  ;;  %v4762_v42 = vpop.f32.mrb[36].mxu0 }
 0x155   : > { %v1716_v26 = vadd.f32 %v4758_v20, %v1442_v25  ;;  %1382 = vst.msk [vmem:[#allocation3 + $0xb0] sm:$0xff] %vm565_vm1, %v1350_v22  ;;  %v1440_v28 = vld [vmem:[#allocation3 + $0x80] sm:$0xff]  ;;  %v1351_v12 = vadd.f32 %v4727_v1, %v1077_v48  ;;  %v1284_v39 = vpop.f32.mrb[39].mxu1  ;;  %v1651_v5 = vpop.f32.mrb[37].mxu0  ;;  %v1797_v1 = vld [vmem:[#allocation3 + $0x10] sm:$0xff] }
 0x156   : > { %v1714_v44 = vadd.f32 %v1635_v7, %v1440_v28  ;;  %1380 = vst.msk [vmem:[#allocation3 + $0xa0] sm:$0xff] %vm565_vm1, %v1348_v35  ;;  %v1443_v47 = vld [vmem:[#allocation3 + $0x98] sm:$0xff]  ;;  %v1349_v49 = vadd.f32 %v1284_v39, %v1075_v38  ;;  %v4763_v59 = vpop.f32.mrb[38].mxu0 }
 0x157   : > { %1748 = vst.msk [vmem:[#allocation3 + $0x90] sm:$0xff] %vm565_vm1, %v1716_v26  ;;  %v1717_v56 = vadd.f32 %v4759_v16, %v1443_v47  ;;  %1383 = vst.msk [vmem:[#allocation3 + $0xb8] sm:$0xff] %vm565_vm1, %v1351_v12  ;;  %v1441_v41 = vld [vmem:[#allocation3 + $0x88] sm:$0xff]  ;;  %v1654_v62 = vpop.f32.mrb[39].mxu0  ;;  %v1795_v12 = vld [vmem:[#allocation3] sm:$0xff] }
 0x158   : > { %1746 = vst.msk [vmem:[#allocation3 + $0x80] sm:$0xff] %vm565_vm1, %v1714_v44  ;;  %v1715_v8 = vadd.f32 %v1638_v13, %v1441_v41  ;;  %1381 = vst.msk [vmem:[#allocation3 + $0xa8] sm:$0xff] %vm565_vm1, %v1349_v49  ;;  %v1798_v44 = vld [vmem:[#allocation3 + $0x18] sm:$0xff]  ;;  %v1796_v41 = vld [vmem:[#allocation3 + $0x8] sm:$0xff] }
 0x159   : > { %1749 = vst.msk [vmem:[#allocation3 + $0x98] sm:$0xff] %vm565_vm1, %v1717_v56 }
 0x15a   : > { %1747 = vst.msk [vmem:[#allocation3 + $0x88] sm:$0xff] %vm565_vm1, %v1715_v8  ;;  %v4730_v6 = vpop.f32.mrb[40].mxu1 }
 0x15b   : > { %v1354_v10 = vadd.f32 %v4730_v6, %v1080_v4  ;;  %v1297_v19 = vpop.f32.mrb[41].mxu1 }
 0x15c   : > { %v1446_v23 = vld [vmem:[#allocation3 + $0xb0] sm:$0xff]  ;;  %v1352_v24 = vadd.f32 %v1297_v19, %v1078_v34  ;;  %v4731_v55 = vpop.f32.mrb[42].mxu1  ;;  %v4766_v54 = vpop.f32.mrb[40].mxu0 }
 0x15d   : > { %v1720_v18 = vadd.f32 %v4762_v42, %v1446_v23  ;;  %1386 = vst.msk [vmem:[#allocation3 + $0xd0] sm:$0xff] %vm565_vm1, %v1354_v10  ;;  %v1444_v3 = vld [vmem:[#allocation3 + $0xa0] sm:$0xff]  ;;  %v1355_v51 = vadd.f32 %v4731_v55, %v1081_v11  ;;  %v1300_v14 = vpop.f32.mrb[43].mxu1  ;;  %v1667_v31 = vpop.f32.mrb[41].mxu0  ;;  %v1801_v55 = vld [vmem:[#allocation3 + $0x30] sm:$0xff] }
 0x15e   : > { %v1718_v9 = vadd.f32 %v1651_v5, %v1444_v3  ;;  %1384 = vst.msk [vmem:[#allocation3 + $0xc0] sm:$0xff] %vm565_vm1, %v1352_v24  ;;  %v1447_v30 = vld [vmem:[#allocation3 + $0xb8] sm:$0xff]  ;;  %v1353_v29 = vadd.f32 %v1300_v14, %v1079_v61  ;;  %v4767_v53 = vpop.f32.mrb[42].mxu0 }
 0x15f   : > { %1752 = vst.msk [vmem:[#allocation3 + $0xb0] sm:$0xff] %vm565_vm1, %v1720_v18  ;;  %v1721_v27 = vadd.f32 %v4763_v59, %v1447_v30  ;;  %1387 = vst.msk [vmem:[#allocation3 + $0xd8] sm:$0xff] %vm565_vm1, %v1355_v51  ;;  %v1445_v33 = vld [vmem:[#allocation3 + $0xa8] sm:$0xff]  ;;  %v1670_v40 = vpop.f32.mrb[43].mxu0  ;;  %v1799_v51 = vld [vmem:[#allocation3 + $0x20] sm:$0xff] }
 0x160   : > { %1750 = vst.msk [vmem:[#allocation3 + $0xa0] sm:$0xff] %vm565_vm1, %v1718_v9  ;;  %v1719_v46 = vadd.f32 %v1654_v62, %v1445_v33  ;;  %1385 = vst.msk [vmem:[#allocation3 + $0xc8] sm:$0xff] %vm565_vm1, %v1353_v29  ;;  %v1802_v9 = vld [vmem:[#allocation3 + $0x38] sm:$0xff]  ;;  %v1800_v33 = vld [vmem:[#allocation3 + $0x28] sm:$0xff] }
 0x161   : > { %1753 = vst.msk [vmem:[#allocation3 + $0xb8] sm:$0xff] %vm565_vm1, %v1721_v27 }
 0x162   : > { %1751 = vst.msk [vmem:[#allocation3 + $0xa8] sm:$0xff] %vm565_vm1, %v1719_v46  ;;  %v4734_v60 = vpop.f32.mrb[44].mxu1 }
 0x163   : > { %v1358_v57 = vadd.f32 %v4734_v60, %v1084_v50  ;;  %v1313_v17 = vpop.f32.mrb[45].mxu1 }
 0x164   : > { %v1450_v20 = vld [vmem:[#allocation3 + $0xd0] sm:$0xff]  ;;  %v1356_v32 = vadd.f32 %v1313_v17, %v1082_v37  ;;  %v4735_v63 = vpop.f32.mrb[46].mxu1  ;;  %v4770_v36 = vpop.f32.mrb[44].mxu0 }
 0x165   : > { %v1724_v7 = vadd.f32 %v4766_v54, %v1450_v20  ;;  %1390 = vst.msk [vmem:[#allocation3 + $0xf0] sm:$0xff] %vm565_vm1, %v1358_v57  ;;  %v1448_v21 = vld [vmem:[#allocation3 + $0xc0] sm:$0xff]  ;;  %v1359_v15 = vadd.f32 %v4735_v63, %v1085_v52  ;;  %v1316_v16 = vpop.f32.mrb[47].mxu1  ;;  %v1683_v22 = vpop.f32.mrb[45].mxu0  ;;  %v1805_v63 = vld [vmem:[#allocation3 + $0x50] sm:$0xff] }
 0x166   : > { %v1722_v13 = vadd.f32 %v1667_v31, %v1448_v21  ;;  %1388 = vst.msk [vmem:[#allocation3 + $0xe0] sm:$0xff] %vm565_vm1, %v1356_v32  ;;  %v1451_v43 = vld [vmem:[#allocation3 + $0xd8] sm:$0xff]  ;;  %v1357_v58 = vadd.f32 %v1316_v16, %v1083_v45  ;;  %v4771_v25 = vpop.f32.mrb[46].mxu0 }
 0x167   : > { %1756 = vst.msk [vmem:[#allocation3 + $0xd0] sm:$0xff] %vm565_vm1, %v1724_v7  ;;  %v1725_v0 = vadd.f32 %v4767_v53, %v1451_v43  ;;  %1391 = vst.msk [vmem:[#allocation3 + $0xf8] sm:$0xff] %vm565_vm1, %v1359_v15  ;;  %v1449_v2 = vld [vmem:[#allocation3 + $0xc8] sm:$0xff]  ;;  %v1686_v48 = vpop.f32.mrb[47].mxu0  ;;  %v1803_v15 = vld [vmem:[#allocation3 + $0x40] sm:$0xff] }
 0x168   : > { %1754 = vst.msk [vmem:[#allocation3 + $0xc0] sm:$0xff] %vm565_vm1, %v1722_v13  ;;  %v1723_v35 = vadd.f32 %v1670_v40, %v1449_v2  ;;  %1389 = vst.msk [vmem:[#allocation3 + $0xe8] sm:$0xff] %vm565_vm1, %v1357_v58  ;;  %v1806_v13 = vld [vmem:[#allocation3 + $0x58] sm:$0xff]  ;;  %v1804_v2 = vld [vmem:[#allocation3 + $0x48] sm:$0xff] }
 0x169   : > { %1757 = vst.msk [vmem:[#allocation3 + $0xd8] sm:$0xff] %vm565_vm1, %v1725_v0 }
 0x16a   : > { %1755 = vst.msk [vmem:[#allocation3 + $0xc8] sm:$0xff] %vm565_vm1, %v1723_v35  ;;  %v4778_v26 = vpop.f32.mrb[48].mxu1 }
 0x16b   : > { %v2071_v28 = vadd.f32 %v4778_v26, %v1797_v1  ;;  %v1942_v38 = vpop.f32.mrb[49].mxu1 }
 0x16c   : > { %v1454_v39 = vld [vmem:[#allocation3 + $0xf0] sm:$0xff]  ;;  %v2069_v42 = vadd.f32 %v1942_v38, %v1795_v12  ;;  %v4779_v47 = vpop.f32.mrb[50].mxu1  ;;  %v4814_v8 = vpop.f32.mrb[48].mxu0 }
 0x16d   : > { %v1728_v49 = vadd.f32 %v4770_v36, %v1454_v39  ;;  %v1452_v5 = vld [vmem:[#allocation3 + $0xe0] sm:$0xff]  ;;  %2103 = vst.msk [vmem:[#allocation3 + $0x10] sm:$0xff] %vm565_vm1, %v2071_v28  ;;  %v2072_v56 = vadd.f32 %v4779_v47, %v1798_v44  ;;  %v1945_v59 = vpop.f32.mrb[51].mxu1  ;;  %v2312_v10 = vpop.f32.mrb[49].mxu0  ;;  %v1809_v47 = vld [vmem:[#allocation3 + $0x70] sm:$0xff] }
 0x16e   : > { %v1726_v62 = vadd.f32 %v1683_v22, %v1452_v5  ;;  %v1455_v4 = vld [vmem:[#allocation3 + $0xf8] sm:$0xff]  ;;  %2101 = vst.msk [vmem:[#allocation3] sm:$0xff] %vm565_vm1, %v2069_v42  ;;  %v2070_v6 = vadd.f32 %v1945_v59, %v1796_v41  ;;  %v4815_v23 = vpop.f32.mrb[50].mxu0 }
 0x16f   : > { %1760 = vst.msk [vmem:[#allocation3 + $0xf0] sm:$0xff] %vm565_vm1, %v1728_v49  ;;  %v1729_v34 = vadd.f32 %v4771_v25, %v1455_v4  ;;  %v1453_v19 = vld [vmem:[#allocation3 + $0xe8] sm:$0xff]  ;;  %2104 = vst.msk [vmem:[#allocation3 + $0x18] sm:$0xff] %vm565_vm1, %v2072_v56  ;;  %v2315_v11 = vpop.f32.mrb[51].mxu0  ;;  %v1807_v56 = vld [vmem:[#allocation3 + $0x60] sm:$0xff] }
 0x170   : > { %1758 = vst.msk [vmem:[#allocation3 + $0xe0] sm:$0xff] %vm565_vm1, %v1726_v62  ;;  %v1727_v24 = vadd.f32 %v1686_v48, %v1453_v19  ;;  %2102 = vst.msk [vmem:[#allocation3 + $0x8] sm:$0xff] %vm565_vm1, %v2070_v6  ;;  %v1810_v62 = vld [vmem:[#allocation3 + $0x78] sm:$0xff]  ;;  %v1808_v19 = vld [vmem:[#allocation3 + $0x68] sm:$0xff] }
 0x171   : > { %1761 = vst.msk [vmem:[#allocation3 + $0xf8] sm:$0xff] %vm565_vm1, %v1729_v34 }
 0x172   : > { %1759 = vst.msk [vmem:[#allocation3 + $0xe8] sm:$0xff] %vm565_vm1, %v1727_v24  ;;  %v4782_v18 = vpop.f32.mrb[52].mxu1 }
 0x173   : > { %v2075_v3 = vadd.f32 %v4782_v18, %v1801_v55  ;;  %v1958_v61 = vpop.f32.mrb[53].mxu1 }
 0x174   : > { %v2167_v14 = vld [vmem:[#allocation3 + $0x10] sm:$0xff]  ;;  %v2073_v54 = vadd.f32 %v1958_v61, %v1799_v51  ;;  %v4783_v30 = vpop.f32.mrb[54].mxu1  ;;  %v4818_v46 = vpop.f32.mrb[52].mxu0 }
 0x175   : > { %v2441_v29 = vadd.f32 %v4814_v8, %v2167_v14  ;;  %2107 = vst.msk [vmem:[#allocation3 + $0x30] sm:$0xff] %vm565_vm1, %v2075_v3  ;;  %v2165_v31 = vld [vmem:[#allocation3] sm:$0xff]  ;;  %v2076_v27 = vadd.f32 %v4783_v30, %v1802_v9  ;;  %v1961_v53 = vpop.f32.mrb[55].mxu1  ;;  %v2328_v57 = vpop.f32.mrb[53].mxu0  ;;  %v1813_v30 = vld [vmem:[#allocation3 + $0x90] sm:$0xff] }
 0x176   : > { %v2439_v40 = vadd.f32 %v2312_v10, %v2165_v31  ;;  %2105 = vst.msk [vmem:[#allocation3 + $0x20] sm:$0xff] %vm565_vm1, %v2073_v54  ;;  %v2168_v50 = vld [vmem:[#allocation3 + $0x18] sm:$0xff]  ;;  %v2074_v60 = vadd.f32 %v1961_v53, %v1800_v33  ;;  %v4819_v20 = vpop.f32.mrb[54].mxu0 }
 0x177   : > { %2473 = vst.msk [vmem:[#allocation3 + $0x10] sm:$0xff] %vm565_vm1, %v2441_v29  ;;  %v2442_v37 = vadd.f32 %v4815_v23, %v2168_v50  ;;  %2108 = vst.msk [vmem:[#allocation3 + $0x38] sm:$0xff] %vm565_vm1, %v2076_v27  ;;  %v2166_v17 = vld [vmem:[#allocation3 + $0x8] sm:$0xff]  ;;  %v2331_v52 = vpop.f32.mrb[55].mxu0  ;;  %v1811_v27 = vld [vmem:[#allocation3 + $0x80] sm:$0xff] }
 0x178   : > { %2471 = vst.msk [vmem:[#allocation3] sm:$0xff] %vm565_vm1, %v2439_v40  ;;  %v2440_v32 = vadd.f32 %v2315_v11, %v2166_v17  ;;  %2106 = vst.msk [vmem:[#allocation3 + $0x28] sm:$0xff] %vm565_vm1, %v2074_v60  ;;  %v1814_v40 = vld [vmem:[#allocation3 + $0x98] sm:$0xff]  ;;  %v1812_v17 = vld [vmem:[#allocation3 + $0x88] sm:$0xff] }
 0x179   : > { %2474 = vst.msk [vmem:[#allocation3 + $0x18] sm:$0xff] %vm565_vm1, %v2442_v37 }
 0x17a   : > { %2472 = vst.msk [vmem:[#allocation3 + $0x8] sm:$0xff] %vm565_vm1, %v2440_v32  ;;  %v4786_v7 = vpop.f32.mrb[56].mxu1 }
 0x17b   : > { %v2079_v21 = vadd.f32 %v4786_v7, %v1805_v63  ;;  %v1974_v45 = vpop.f32.mrb[57].mxu1 }
 0x17c   : > { %v2171_v16 = vld [vmem:[#allocation3 + $0x30] sm:$0xff]  ;;  %v2077_v36 = vadd.f32 %v1974_v45, %v1803_v15  ;;  %v4787_v43 = vpop.f32.mrb[58].mxu1  ;;  %v4822_v35 = vpop.f32.mrb[56].mxu0 }
 0x17d   : > { %v2445_v58 = vadd.f32 %v4818_v46, %v2171_v16  ;;  %2111 = vst.msk [vmem:[#allocation3 + $0x50] sm:$0xff] %vm565_vm1, %v2079_v21  ;;  %v2169_v22 = vld [vmem:[#allocation3 + $0x20] sm:$0xff]  ;;  %v2080_v0 = vadd.f32 %v4787_v43, %v1806_v13  ;;  %v1977_v25 = vpop.f32.mrb[59].mxu1  ;;  %v2344_v28 = vpop.f32.mrb[57].mxu0  ;;  %v1817_v43 = vld [vmem:[#allocation3 + $0xb0] sm:$0xff] }
 0x17e   : > { %v2443_v48 = vadd.f32 %v2328_v57, %v2169_v22  ;;  %2109 = vst.msk [vmem:[#allocation3 + $0x40] sm:$0xff] %vm565_vm1, %v2077_v36  ;;  %v2172_v1 = vld [vmem:[#allocation3 + $0x38] sm:$0xff]  ;;  %v2078_v26 = vadd.f32 %v1977_v25, %v1804_v2  ;;  %v4823_v39 = vpop.f32.mrb[58].mxu0 }
 0x17f   : > { %2477 = vst.msk [vmem:[#allocation3 + $0x30] sm:$0xff] %vm565_vm1, %v2445_v58  ;;  %v2446_v12 = vadd.f32 %v4819_v20, %v2172_v1  ;;  %2112 = vst.msk [vmem:[#allocation3 + $0x58] sm:$0xff] %vm565_vm1, %v2080_v0  ;;  %v2170_v38 = vld [vmem:[#allocation3 + $0x28] sm:$0xff]  ;;  %v2347_v44 = vpop.f32.mrb[59].mxu0  ;;  %v1815_v0 = vld [vmem:[#allocation3 + $0xa0] sm:$0xff] }
 0x180   : > { %2475 = vst.msk [vmem:[#allocation3 + $0x20] sm:$0xff] %vm565_vm1, %v2443_v48  ;;  %v2444_v42 = vadd.f32 %v2331_v52, %v2170_v38  ;;  %2110 = vst.msk [vmem:[#allocation3 + $0x48] sm:$0xff] %vm565_vm1, %v2078_v26  ;;  %v1818_v48 = vld [vmem:[#allocation3 + $0xb8] sm:$0xff]  ;;  %v1816_v38 = vld [vmem:[#allocation3 + $0xa8] sm:$0xff] }
 0x181   : > { %2478 = vst.msk [vmem:[#allocation3 + $0x38] sm:$0xff] %vm565_vm1, %v2446_v12 }
 0x182   : > { %2476 = vst.msk [vmem:[#allocation3 + $0x28] sm:$0xff] %vm565_vm1, %v2444_v42  ;;  %v4790_v49 = vpop.f32.mrb[60].mxu1 }
 0x183   : > { %v2083_v5 = vadd.f32 %v4790_v49, %v1809_v47  ;;  %v1990_v41 = vpop.f32.mrb[61].mxu1 }
 0x184   : > { %v2175_v59 = vld [vmem:[#allocation3 + $0x50] sm:$0xff]  ;;  %v2081_v8 = vadd.f32 %v1990_v41, %v1807_v56  ;;  %v4791_v4 = vpop.f32.mrb[62].mxu1  ;;  %v4826_v24 = vpop.f32.mrb[60].mxu0 }
 0x185   : > { %v2449_v6 = vadd.f32 %v4822_v35, %v2175_v59  ;;  %2115 = vst.msk [vmem:[#allocation3 + $0x70] sm:$0xff] %vm565_vm1, %v2083_v5  ;;  %v2173_v10 = vld [vmem:[#allocation3 + $0x40] sm:$0xff]  ;;  %v2084_v34 = vadd.f32 %v4791_v4, %v1810_v62  ;;  %v1993_v23 = vpop.f32.mrb[63].mxu1  ;;  %v2360_v3 = vpop.f32.mrb[61].mxu0  ;;  %v1821_v4 = vld [vmem:[#allocation3 + $0xd0] sm:$0xff] }
 0x186   : > { %v2447_v11 = vadd.f32 %v2344_v28, %v2173_v10  ;;  %2113 = vst.msk [vmem:[#allocation3 + $0x60] sm:$0xff] %vm565_vm1, %v2081_v8  ;;  %v2176_v55 = vld [vmem:[#allocation3 + $0x58] sm:$0xff]  ;;  %v2082_v18 = vadd.f32 %v1993_v23, %v1808_v19  ;;  %v4827_v14 = vpop.f32.mrb[62].mxu0 }
 0x187   : > { %2481 = vst.msk [vmem:[#allocation3 + $0x50] sm:$0xff] %vm565_vm1, %v2449_v6  ;;  %v2450_v51 = vadd.f32 %v4823_v39, %v2176_v55  ;;  %2116 = vst.msk [vmem:[#allocation3 + $0x78] sm:$0xff] %vm565_vm1, %v2084_v34  ;;  %v2174_v61 = vld [vmem:[#allocation3 + $0x48] sm:$0xff]  ;;  %v2363_v9 = vpop.f32.mrb[63].mxu0  ;;  %v1819_v34 = vld [vmem:[#allocation3 + $0xc0] sm:$0xff] }
 0x188   : > { %2479 = vst.msk [vmem:[#allocation3 + $0x40] sm:$0xff] %vm565_vm1, %v2447_v11  ;;  %v2448_v54 = vadd.f32 %v2347_v44, %v2174_v61  ;;  %2114 = vst.msk [vmem:[#allocation3 + $0x68] sm:$0xff] %vm565_vm1, %v2082_v18  ;;  %v1822_v11 = vld [vmem:[#allocation3 + $0xd8] sm:$0xff]  ;;  %v1820_v61 = vld [vmem:[#allocation3 + $0xc8] sm:$0xff] }
 0x189   : > { %2482 = vst.msk [vmem:[#allocation3 + $0x58] sm:$0xff] %vm565_vm1, %v2450_v51 }
 0x18a   : > { %2480 = vst.msk [vmem:[#allocation3 + $0x48] sm:$0xff] %vm565_vm1, %v2448_v54  ;;  %v4794_v29 = vpop.f32.mrb[64].mxu1 }
 0x18b   : > { %v2087_v31 = vadd.f32 %v4794_v29, %v1813_v30  ;;  %v2006_v33 = vpop.f32.mrb[65].mxu1 }
 0x18c   : > { %v2179_v53 = vld [vmem:[#allocation3 + $0x70] sm:$0xff]  ;;  %v2085_v46 = vadd.f32 %v2006_v33, %v1811_v27  ;;  %v4795_v50 = vpop.f32.mrb[66].mxu1  ;;  %v4830_v32 = vpop.f32.mrb[64].mxu0 }
 0x18d   : > { %v2453_v60 = vadd.f32 %v4826_v24, %v2179_v53  ;;  %2119 = vst.msk [vmem:[#allocation3 + $0x90] sm:$0xff] %vm565_vm1, %v2087_v31  ;;  %v2177_v57 = vld [vmem:[#allocation3 + $0x60] sm:$0xff]  ;;  %v2088_v37 = vadd.f32 %v4795_v50, %v1814_v40  ;;  %v2009_v20 = vpop.f32.mrb[67].mxu1  ;;  %v2376_v21 = vpop.f32.mrb[65].mxu0  ;;  %v1825_v50 = vld [vmem:[#allocation3 + $0xf0] sm:$0xff] }
 0x18e   : > { %v2451_v52 = vadd.f32 %v2360_v3, %v2177_v57  ;;  %2117 = vst.msk [vmem:[#allocation3 + $0x80] sm:$0xff] %vm565_vm1, %v2085_v46  ;;  %v2180_v63 = vld [vmem:[#allocation3 + $0x78] sm:$0xff]  ;;  %v2086_v7 = vadd.f32 %v2009_v20, %v1812_v17  ;;  %v4831_v16 = vpop.f32.mrb[66].mxu0 }
 0x18f   : > { %2485 = vst.msk [vmem:[#allocation3 + $0x70] sm:$0xff] %vm565_vm1, %v2453_v60  ;;  %v2454_v15 = vadd.f32 %v4827_v14, %v2180_v63  ;;  %2120 = vst.msk [vmem:[#allocation3 + $0x98] sm:$0xff] %vm565_vm1, %v2088_v37  ;;  %v2178_v45 = vld [vmem:[#allocation3 + $0x68] sm:$0xff]  ;;  %v2379_v13 = vpop.f32.mrb[67].mxu0  ;;  %v1823_v37 = vld [vmem:[#allocation3 + $0xe0] sm:$0xff] }
 0x190   : > { %2483 = vst.msk [vmem:[#allocation3 + $0x60] sm:$0xff] %vm565_vm1, %v2451_v52  ;;  %v2452_v36 = vadd.f32 %v2363_v9, %v2178_v45  ;;  %2118 = vst.msk [vmem:[#allocation3 + $0x88] sm:$0xff] %vm565_vm1, %v2086_v7  ;;  %v1826_v52 = vld [vmem:[#allocation3 + $0xf8] sm:$0xff]  ;;  %v1824_v45 = vld [vmem:[#allocation3 + $0xe8] sm:$0xff] }
 0x191   : > { %2486 = vst.msk [vmem:[#allocation3 + $0x78] sm:$0xff] %vm565_vm1, %v2454_v15 }
 0x192   : > { %2484 = vst.msk [vmem:[#allocation3 + $0x68] sm:$0xff] %vm565_vm1, %v2452_v36  ;;  %v4798_v58 = vpop.f32.mrb[68].mxu1 }
 0x193   : > { %v2091_v22 = vadd.f32 %v4798_v58, %v1817_v43  ;;  %v2022_v2 = vpop.f32.mrb[69].mxu1 }
 0x194   : > { %v2183_v25 = vld [vmem:[#allocation3 + $0x90] sm:$0xff]  ;;  %v2089_v35 = vadd.f32 %v2022_v2, %v1815_v0  ;;  %v4799_v1 = vpop.f32.mrb[70].mxu1  ;;  %v4834_v42 = vpop.f32.mrb[68].mxu0 }
 0x195   : > { %v2457_v26 = vadd.f32 %v4830_v32, %v2183_v25  ;;  %2123 = vst.msk [vmem:[#allocation3 + $0xb0] sm:$0xff] %vm565_vm1, %v2091_v22  ;;  %v2181_v28 = vld [vmem:[#allocation3 + $0x80] sm:$0xff]  ;;  %v2092_v12 = vadd.f32 %v4799_v1, %v1818_v48  ;;  %v2025_v39 = vpop.f32.mrb[71].mxu1  ;;  %v2392_v5 = vpop.f32.mrb[69].mxu0  ;;  %v2537_v1 = vld [vmem:[#allocation3 + $0x10] sm:$0xff] }
 0x196   : > { %v2455_v44 = vadd.f32 %v2376_v21, %v2181_v28  ;;  %2121 = vst.msk [vmem:[#allocation3 + $0xa0] sm:$0xff] %vm565_vm1, %v2089_v35  ;;  %v2184_v47 = vld [vmem:[#allocation3 + $0x98] sm:$0xff]  ;;  %v2090_v49 = vadd.f32 %v2025_v39, %v1816_v38  ;;  %v4835_v59 = vpop.f32.mrb[70].mxu0 }
 0x197   : > { %2489 = vst.msk [vmem:[#allocation3 + $0x90] sm:$0xff] %vm565_vm1, %v2457_v26  ;;  %v2458_v56 = vadd.f32 %v4831_v16, %v2184_v47  ;;  %2124 = vst.msk [vmem:[#allocation3 + $0xb8] sm:$0xff] %vm565_vm1, %v2092_v12  ;;  %v2182_v41 = vld [vmem:[#allocation3 + $0x88] sm:$0xff]  ;;  %v2395_v62 = vpop.f32.mrb[71].mxu0  ;;  %v2535_v12 = vld [vmem:[#allocation3] sm:$0xff] }
 0x198   : > { %2487 = vst.msk [vmem:[#allocation3 + $0x80] sm:$0xff] %vm565_vm1, %v2455_v44  ;;  %v2456_v8 = vadd.f32 %v2379_v13, %v2182_v41  ;;  %2122 = vst.msk [vmem:[#allocation3 + $0xa8] sm:$0xff] %vm565_vm1, %v2090_v49  ;;  %v2538_v44 = vld [vmem:[#allocation3 + $0x18] sm:$0xff]  ;;  %v2536_v41 = vld [vmem:[#allocation3 + $0x8] sm:$0xff] }
 0x199   : > { %2490 = vst.msk [vmem:[#allocation3 + $0x98] sm:$0xff] %vm565_vm1, %v2458_v56 }
 0x19a   : > { %2488 = vst.msk [vmem:[#allocation3 + $0x88] sm:$0xff] %vm565_vm1, %v2456_v8  ;;  %v4802_v6 = vpop.f32.mrb[72].mxu1 }
 0x19b   : > { %v2095_v10 = vadd.f32 %v4802_v6, %v1821_v4  ;;  %v2038_v19 = vpop.f32.mrb[73].mxu1 }
 0x19c   : > { %v2187_v23 = vld [vmem:[#allocation3 + $0xb0] sm:$0xff]  ;;  %v2093_v24 = vadd.f32 %v2038_v19, %v1819_v34  ;;  %v4803_v55 = vpop.f32.mrb[74].mxu1  ;;  %v4838_v54 = vpop.f32.mrb[72].mxu0 }
 0x19d   : > { %v2461_v18 = vadd.f32 %v4834_v42, %v2187_v23  ;;  %2127 = vst.msk [vmem:[#allocation3 + $0xd0] sm:$0xff] %vm565_vm1, %v2095_v10  ;;  %v2185_v3 = vld [vmem:[#allocation3 + $0xa0] sm:$0xff]  ;;  %v2096_v51 = vadd.f32 %v4803_v55, %v1822_v11  ;;  %v2041_v14 = vpop.f32.mrb[75].mxu1  ;;  %v2408_v31 = vpop.f32.mrb[73].mxu0  ;;  %v2541_v55 = vld [vmem:[#allocation3 + $0x30] sm:$0xff] }
 0x19e   : > { %v2459_v9 = vadd.f32 %v2392_v5, %v2185_v3  ;;  %2125 = vst.msk [vmem:[#allocation3 + $0xc0] sm:$0xff] %vm565_vm1, %v2093_v24  ;;  %v2188_v30 = vld [vmem:[#allocation3 + $0xb8] sm:$0xff]  ;;  %v2094_v29 = vadd.f32 %v2041_v14, %v1820_v61  ;;  %v4839_v53 = vpop.f32.mrb[74].mxu0 }
 0x19f   : > { %2493 = vst.msk [vmem:[#allocation3 + $0xb0] sm:$0xff] %vm565_vm1, %v2461_v18  ;;  %v2462_v27 = vadd.f32 %v4835_v59, %v2188_v30  ;;  %2128 = vst.msk [vmem:[#allocation3 + $0xd8] sm:$0xff] %vm565_vm1, %v2096_v51  ;;  %v2186_v33 = vld [vmem:[#allocation3 + $0xa8] sm:$0xff]  ;;  %v2411_v40 = vpop.f32.mrb[75].mxu0  ;;  %v2539_v51 = vld [vmem:[#allocation3 + $0x20] sm:$0xff] }
 0x1a0   : > { %2491 = vst.msk [vmem:[#allocation3 + $0xa0] sm:$0xff] %vm565_vm1, %v2459_v9  ;;  %v2460_v46 = vadd.f32 %v2395_v62, %v2186_v33  ;;  %2126 = vst.msk [vmem:[#allocation3 + $0xc8] sm:$0xff] %vm565_vm1, %v2094_v29  ;;  %v2542_v9 = vld [vmem:[#allocation3 + $0x38] sm:$0xff]  ;;  %v2540_v33 = vld [vmem:[#allocation3 + $0x28] sm:$0xff] }
 0x1a1   : > { %2494 = vst.msk [vmem:[#allocation3 + $0xb8] sm:$0xff] %vm565_vm1, %v2462_v27 }
 0x1a2   : > { %2492 = vst.msk [vmem:[#allocation3 + $0xa8] sm:$0xff] %vm565_vm1, %v2460_v46  ;;  %v4806_v60 = vpop.f32.mrb[76].mxu1 }
 0x1a3   : > { %v2099_v57 = vadd.f32 %v4806_v60, %v1825_v50  ;;  %v2054_v17 = vpop.f32.mrb[77].mxu1 }
 0x1a4   : > { %v2191_v20 = vld [vmem:[#allocation3 + $0xd0] sm:$0xff]  ;;  %v2097_v32 = vadd.f32 %v2054_v17, %v1823_v37  ;;  %v4807_v63 = vpop.f32.mrb[78].mxu1  ;;  %v4842_v36 = vpop.f32.mrb[76].mxu0 }
 0x1a5   : > { %v2465_v7 = vadd.f32 %v4838_v54, %v2191_v20  ;;  %2131 = vst.msk [vmem:[#allocation3 + $0xf0] sm:$0xff] %vm565_vm1, %v2099_v57  ;;  %v2189_v21 = vld [vmem:[#allocation3 + $0xc0] sm:$0xff]  ;;  %v2100_v15 = vadd.f32 %v4807_v63, %v1826_v52  ;;  %v2057_v16 = vpop.f32.mrb[79].mxu1  ;;  %v2424_v22 = vpop.f32.mrb[77].mxu0  ;;  %v2545_v63 = vld [vmem:[#allocation3 + $0x50] sm:$0xff] }
 0x1a6   : > { %v2463_v13 = vadd.f32 %v2408_v31, %v2189_v21  ;;  %2129 = vst.msk [vmem:[#allocation3 + $0xe0] sm:$0xff] %vm565_vm1, %v2097_v32  ;;  %v2192_v43 = vld [vmem:[#allocation3 + $0xd8] sm:$0xff]  ;;  %v2098_v58 = vadd.f32 %v2057_v16, %v1824_v45  ;;  %v4843_v25 = vpop.f32.mrb[78].mxu0 }
 0x1a7   : > { %2497 = vst.msk [vmem:[#allocation3 + $0xd0] sm:$0xff] %vm565_vm1, %v2465_v7  ;;  %v2466_v0 = vadd.f32 %v4839_v53, %v2192_v43  ;;  %2132 = vst.msk [vmem:[#allocation3 + $0xf8] sm:$0xff] %vm565_vm1, %v2100_v15  ;;  %v2190_v2 = vld [vmem:[#allocation3 + $0xc8] sm:$0xff]  ;;  %v2427_v48 = vpop.f32.mrb[79].mxu0  ;;  %v2543_v15 = vld [vmem:[#allocation3 + $0x40] sm:$0xff] }
 0x1a8   : > { %2495 = vst.msk [vmem:[#allocation3 + $0xc0] sm:$0xff] %vm565_vm1, %v2463_v13  ;;  %v2464_v35 = vadd.f32 %v2411_v40, %v2190_v2  ;;  %2130 = vst.msk [vmem:[#allocation3 + $0xe8] sm:$0xff] %vm565_vm1, %v2098_v58  ;;  %v2546_v13 = vld [vmem:[#allocation3 + $0x58] sm:$0xff]  ;;  %v2544_v2 = vld [vmem:[#allocation3 + $0x48] sm:$0xff] }
 0x1a9   : > { %2498 = vst.msk [vmem:[#allocation3 + $0xd8] sm:$0xff] %vm565_vm1, %v2466_v0 }
 0x1aa   : > { %2496 = vst.msk [vmem:[#allocation3 + $0xc8] sm:$0xff] %vm565_vm1, %v2464_v35  ;;  %v4850_v26 = vpop.f32.mrb[80].mxu1 }
 0x1ab   : > { %v2811_v28 = vadd.f32 %v4850_v26, %v2537_v1  ;;  %v2682_v38 = vpop.f32.mrb[81].mxu1 }
 0x1ac   : > { %v2195_v39 = vld [vmem:[#allocation3 + $0xf0] sm:$0xff]  ;;  %v2809_v42 = vadd.f32 %v2682_v38, %v2535_v12  ;;  %v4851_v47 = vpop.f32.mrb[82].mxu1  ;;  %v4886_v8 = vpop.f32.mrb[80].mxu0 }
 0x1ad   : > { %v2469_v49 = vadd.f32 %v4842_v36, %v2195_v39  ;;  %v2193_v5 = vld [vmem:[#allocation3 + $0xe0] sm:$0xff]  ;;  %2843 = vst.msk [vmem:[#allocation3 + $0x10] sm:$0xff] %vm565_vm1, %v2811_v28  ;;  %v2812_v56 = vadd.f32 %v4851_v47, %v2538_v44  ;;  %v2685_v59 = vpop.f32.mrb[83].mxu1  ;;  %v3053_v10 = vpop.f32.mrb[81].mxu0  ;;  %v2549_v47 = vld [vmem:[#allocation3 + $0x70] sm:$0xff] }
 0x1ae   : > { %v2467_v62 = vadd.f32 %v2424_v22, %v2193_v5  ;;  %v2196_v4 = vld [vmem:[#allocation3 + $0xf8] sm:$0xff]  ;;  %2841 = vst.msk [vmem:[#allocation3] sm:$0xff] %vm565_vm1, %v2809_v42  ;;  %v2810_v6 = vadd.f32 %v2685_v59, %v2536_v41  ;;  %v4887_v23 = vpop.f32.mrb[82].mxu0 }
 0x1af   : > { %2501 = vst.msk [vmem:[#allocation3 + $0xf0] sm:$0xff] %vm565_vm1, %v2469_v49  ;;  %v2470_v34 = vadd.f32 %v4843_v25, %v2196_v4  ;;  %v2194_v19 = vld [vmem:[#allocation3 + $0xe8] sm:$0xff]  ;;  %2844 = vst.msk [vmem:[#allocation3 + $0x18] sm:$0xff] %vm565_vm1, %v2812_v56  ;;  %v3056_v11 = vpop.f32.mrb[83].mxu0  ;;  %v2547_v56 = vld [vmem:[#allocation3 + $0x60] sm:$0xff] }
 0x1b0   : > { %2499 = vst.msk [vmem:[#allocation3 + $0xe0] sm:$0xff] %vm565_vm1, %v2467_v62  ;;  %v2468_v24 = vadd.f32 %v2427_v48, %v2194_v19  ;;  %2842 = vst.msk [vmem:[#allocation3 + $0x8] sm:$0xff] %vm565_vm1, %v2810_v6  ;;  %v2550_v62 = vld [vmem:[#allocation3 + $0x78] sm:$0xff]  ;;  %v2548_v19 = vld [vmem:[#allocation3 + $0x68] sm:$0xff] }
 0x1b1   : > { %2502 = vst.msk [vmem:[#allocation3 + $0xf8] sm:$0xff] %vm565_vm1, %v2470_v34 }
 0x1b2   : > { %2500 = vst.msk [vmem:[#allocation3 + $0xe8] sm:$0xff] %vm565_vm1, %v2468_v24  ;;  %v4854_v18 = vpop.f32.mrb[84].mxu1 }
 0x1b3   : > { %v2815_v3 = vadd.f32 %v4854_v18, %v2541_v55  ;;  %v2698_v61 = vpop.f32.mrb[85].mxu1 }
 0x1b4   : > { %v2908_v14 = vld [vmem:[#allocation3 + $0x10] sm:$0xff]  ;;  %v2813_v54 = vadd.f32 %v2698_v61, %v2539_v51  ;;  %v4855_v30 = vpop.f32.mrb[86].mxu1  ;;  %v4890_v46 = vpop.f32.mrb[84].mxu0 }
 0x1b5   : > { %v3182_v29 = vadd.f32 %v4886_v8, %v2908_v14  ;;  %2847 = vst.msk [vmem:[#allocation3 + $0x30] sm:$0xff] %vm565_vm1, %v2815_v3  ;;  %v2906_v31 = vld [vmem:[#allocation3] sm:$0xff]  ;;  %v2816_v27 = vadd.f32 %v4855_v30, %v2542_v9  ;;  %v2701_v53 = vpop.f32.mrb[87].mxu1  ;;  %v3069_v57 = vpop.f32.mrb[85].mxu0  ;;  %v2553_v30 = vld [vmem:[#allocation3 + $0x90] sm:$0xff] }
 0x1b6   : > { %v3180_v40 = vadd.f32 %v3053_v10, %v2906_v31  ;;  %2845 = vst.msk [vmem:[#allocation3 + $0x20] sm:$0xff] %vm565_vm1, %v2813_v54  ;;  %v2909_v50 = vld [vmem:[#allocation3 + $0x18] sm:$0xff]  ;;  %v2814_v60 = vadd.f32 %v2701_v53, %v2540_v33  ;;  %v4891_v20 = vpop.f32.mrb[86].mxu0 }
 0x1b7   : > { %3214 = vst.msk [vmem:[#allocation3 + $0x10] sm:$0xff] %vm565_vm1, %v3182_v29  ;;  %v3183_v37 = vadd.f32 %v4887_v23, %v2909_v50  ;;  %2848 = vst.msk [vmem:[#allocation3 + $0x38] sm:$0xff] %vm565_vm1, %v2816_v27  ;;  %v2907_v17 = vld [vmem:[#allocation3 + $0x8] sm:$0xff]  ;;  %v3072_v52 = vpop.f32.mrb[87].mxu0  ;;  %v2551_v27 = vld [vmem:[#allocation3 + $0x80] sm:$0xff] }
 0x1b8   : > { %3212 = vst.msk [vmem:[#allocation3] sm:$0xff] %vm565_vm1, %v3180_v40  ;;  %v3181_v32 = vadd.f32 %v3056_v11, %v2907_v17  ;;  %2846 = vst.msk [vmem:[#allocation3 + $0x28] sm:$0xff] %vm565_vm1, %v2814_v60  ;;  %v2554_v40 = vld [vmem:[#allocation3 + $0x98] sm:$0xff]  ;;  %v2552_v17 = vld [vmem:[#allocation3 + $0x88] sm:$0xff] }
 0x1b9   : > { %3215 = vst.msk [vmem:[#allocation3 + $0x18] sm:$0xff] %vm565_vm1, %v3183_v37 }
 0x1ba   : > { %3213 = vst.msk [vmem:[#allocation3 + $0x8] sm:$0xff] %vm565_vm1, %v3181_v32  ;;  %v4858_v7 = vpop.f32.mrb[88].mxu1 }
 0x1bb   : > { %v2819_v21 = vadd.f32 %v4858_v7, %v2545_v63  ;;  %v2714_v45 = vpop.f32.mrb[89].mxu1 }
 0x1bc   : > { %v2912_v16 = vld [vmem:[#allocation3 + $0x30] sm:$0xff]  ;;  %v2817_v36 = vadd.f32 %v2714_v45, %v2543_v15  ;;  %v4859_v43 = vpop.f32.mrb[90].mxu1  ;;  %v4894_v35 = vpop.f32.mrb[88].mxu0 }
 0x1bd   : > { %v3186_v58 = vadd.f32 %v4890_v46, %v2912_v16  ;;  %2851 = vst.msk [vmem:[#allocation3 + $0x50] sm:$0xff] %vm565_vm1, %v2819_v21  ;;  %v2910_v22 = vld [vmem:[#allocation3 + $0x20] sm:$0xff]  ;;  %v2820_v0 = vadd.f32 %v4859_v43, %v2546_v13  ;;  %v2717_v25 = vpop.f32.mrb[91].mxu1  ;;  %v3085_v28 = vpop.f32.mrb[89].mxu0  ;;  %v2557_v43 = vld [vmem:[#allocation3 + $0xb0] sm:$0xff] }
 0x1be   : > { %v3184_v48 = vadd.f32 %v3069_v57, %v2910_v22  ;;  %2849 = vst.msk [vmem:[#allocation3 + $0x40] sm:$0xff] %vm565_vm1, %v2817_v36  ;;  %v2913_v1 = vld [vmem:[#allocation3 + $0x38] sm:$0xff]  ;;  %v2818_v26 = vadd.f32 %v2717_v25, %v2544_v2  ;;  %v4895_v39 = vpop.f32.mrb[90].mxu0 }
 0x1bf   : > { %3218 = vst.msk [vmem:[#allocation3 + $0x30] sm:$0xff] %vm565_vm1, %v3186_v58  ;;  %v3187_v12 = vadd.f32 %v4891_v20, %v2913_v1  ;;  %2852 = vst.msk [vmem:[#allocation3 + $0x58] sm:$0xff] %vm565_vm1, %v2820_v0  ;;  %v2911_v38 = vld [vmem:[#allocation3 + $0x28] sm:$0xff]  ;;  %v3088_v44 = vpop.f32.mrb[91].mxu0  ;;  %v2555_v0 = vld [vmem:[#allocation3 + $0xa0] sm:$0xff] }
 0x1c0   : > { %3216 = vst.msk [vmem:[#allocation3 + $0x20] sm:$0xff] %vm565_vm1, %v3184_v48  ;;  %v3185_v42 = vadd.f32 %v3072_v52, %v2911_v38  ;;  %2850 = vst.msk [vmem:[#allocation3 + $0x48] sm:$0xff] %vm565_vm1, %v2818_v26  ;;  %v2558_v48 = vld [vmem:[#allocation3 + $0xb8] sm:$0xff]  ;;  %v2556_v38 = vld [vmem:[#allocation3 + $0xa8] sm:$0xff] }
 0x1c1   : > { %3219 = vst.msk [vmem:[#allocation3 + $0x38] sm:$0xff] %vm565_vm1, %v3187_v12 }
 0x1c2   : > { %3217 = vst.msk [vmem:[#allocation3 + $0x28] sm:$0xff] %vm565_vm1, %v3185_v42  ;;  %v4862_v49 = vpop.f32.mrb[92].mxu1 }
 0x1c3   : > { %v2823_v5 = vadd.f32 %v4862_v49, %v2549_v47  ;;  %v2730_v41 = vpop.f32.mrb[93].mxu1 }
 0x1c4   : > { %v2916_v59 = vld [vmem:[#allocation3 + $0x50] sm:$0xff]  ;;  %v2821_v8 = vadd.f32 %v2730_v41, %v2547_v56  ;;  %v4863_v4 = vpop.f32.mrb[94].mxu1  ;;  %v4898_v24 = vpop.f32.mrb[92].mxu0 }
 0x1c5   : > { %v3190_v6 = vadd.f32 %v4894_v35, %v2916_v59  ;;  %2855 = vst.msk [vmem:[#allocation3 + $0x70] sm:$0xff] %vm565_vm1, %v2823_v5  ;;  %v2914_v10 = vld [vmem:[#allocation3 + $0x40] sm:$0xff]  ;;  %v2824_v34 = vadd.f32 %v4863_v4, %v2550_v62  ;;  %v2733_v23 = vpop.f32.mrb[95].mxu1  ;;  %v3101_v3 = vpop.f32.mrb[93].mxu0  ;;  %v2561_v4 = vld [vmem:[#allocation3 + $0xd0] sm:$0xff] }
 0x1c6   : > { %v3188_v11 = vadd.f32 %v3085_v28, %v2914_v10  ;;  %2853 = vst.msk [vmem:[#allocation3 + $0x60] sm:$0xff] %vm565_vm1, %v2821_v8  ;;  %v2917_v55 = vld [vmem:[#allocation3 + $0x58] sm:$0xff]  ;;  %v2822_v18 = vadd.f32 %v2733_v23, %v2548_v19  ;;  %v4899_v14 = vpop.f32.mrb[94].mxu0 }
 0x1c7   : > { %3222 = vst.msk [vmem:[#allocation3 + $0x50] sm:$0xff] %vm565_vm1, %v3190_v6  ;;  %v3191_v51 = vadd.f32 %v4895_v39, %v2917_v55  ;;  %2856 = vst.msk [vmem:[#allocation3 + $0x78] sm:$0xff] %vm565_vm1, %v2824_v34  ;;  %v2915_v61 = vld [vmem:[#allocation3 + $0x48] sm:$0xff]  ;;  %v3104_v9 = vpop.f32.mrb[95].mxu0  ;;  %v2559_v34 = vld [vmem:[#allocation3 + $0xc0] sm:$0xff] }
 0x1c8   : > { %3220 = vst.msk [vmem:[#allocation3 + $0x40] sm:$0xff] %vm565_vm1, %v3188_v11  ;;  %v3189_v54 = vadd.f32 %v3088_v44, %v2915_v61  ;;  %2854 = vst.msk [vmem:[#allocation3 + $0x68] sm:$0xff] %vm565_vm1, %v2822_v18  ;;  %v2562_v11 = vld [vmem:[#allocation3 + $0xd8] sm:$0xff]  ;;  %v2560_v61 = vld [vmem:[#allocation3 + $0xc8] sm:$0xff] }
 0x1c9   : > { %3223 = vst.msk [vmem:[#allocation3 + $0x58] sm:$0xff] %vm565_vm1, %v3191_v51 }
 0x1ca   : > { %3221 = vst.msk [vmem:[#allocation3 + $0x48] sm:$0xff] %vm565_vm1, %v3189_v54  ;;  %v4866_v29 = vpop.f32.mrb[96].mxu1 }
 0x1cb   : > { %v2827_v31 = vadd.f32 %v4866_v29, %v2553_v30  ;;  %v2746_v33 = vpop.f32.mrb[97].mxu1 }
 0x1cc   : > { %v2920_v53 = vld [vmem:[#allocation3 + $0x70] sm:$0xff]  ;;  %v2825_v46 = vadd.f32 %v2746_v33, %v2551_v27  ;;  %v4867_v50 = vpop.f32.mrb[98].mxu1  ;;  %v4902_v32 = vpop.f32.mrb[96].mxu0 }
 0x1cd   : > { %v3194_v60 = vadd.f32 %v4898_v24, %v2920_v53  ;;  %2859 = vst.msk [vmem:[#allocation3 + $0x90] sm:$0xff] %vm565_vm1, %v2827_v31  ;;  %v2918_v57 = vld [vmem:[#allocation3 + $0x60] sm:$0xff]  ;;  %v2828_v37 = vadd.f32 %v4867_v50, %v2554_v40  ;;  %v2749_v20 = vpop.f32.mrb[99].mxu1  ;;  %v3117_v21 = vpop.f32.mrb[97].mxu0  ;;  %v2565_v50 = vld [vmem:[#allocation3 + $0xf0] sm:$0xff] }
 0x1ce   : > { %v3192_v52 = vadd.f32 %v3101_v3, %v2918_v57  ;;  %2857 = vst.msk [vmem:[#allocation3 + $0x80] sm:$0xff] %vm565_vm1, %v2825_v46  ;;  %v2921_v63 = vld [vmem:[#allocation3 + $0x78] sm:$0xff]  ;;  %v2826_v7 = vadd.f32 %v2749_v20, %v2552_v17  ;;  %v4903_v16 = vpop.f32.mrb[98].mxu0 }
 0x1cf   : > { %3226 = vst.msk [vmem:[#allocation3 + $0x70] sm:$0xff] %vm565_vm1, %v3194_v60  ;;  %v3195_v15 = vadd.f32 %v4899_v14, %v2921_v63  ;;  %2860 = vst.msk [vmem:[#allocation3 + $0x98] sm:$0xff] %vm565_vm1, %v2828_v37  ;;  %v2919_v45 = vld [vmem:[#allocation3 + $0x68] sm:$0xff]  ;;  %v3120_v13 = vpop.f32.mrb[99].mxu0  ;;  %v2563_v37 = vld [vmem:[#allocation3 + $0xe0] sm:$0xff] }
 0x1d0   : > { %3224 = vst.msk [vmem:[#allocation3 + $0x60] sm:$0xff] %vm565_vm1, %v3192_v52  ;;  %v3193_v36 = vadd.f32 %v3104_v9, %v2919_v45  ;;  %2858 = vst.msk [vmem:[#allocation3 + $0x88] sm:$0xff] %vm565_vm1, %v2826_v7  ;;  %v2566_v52 = vld [vmem:[#allocation3 + $0xf8] sm:$0xff]  ;;  %v2564_v45 = vld [vmem:[#allocation3 + $0xe8] sm:$0xff] }
 0x1d1   : > { %3227 = vst.msk [vmem:[#allocation3 + $0x78] sm:$0xff] %vm565_vm1, %v3195_v15 }
 0x1d2   : > { %3225 = vst.msk [vmem:[#allocation3 + $0x68] sm:$0xff] %vm565_vm1, %v3193_v36  ;;  %v4870_v58 = vpop.f32.mrb[100].mxu1 }
 0x1d3   : > { %v2831_v22 = vadd.f32 %v4870_v58, %v2557_v43  ;;  %v2762_v2 = vpop.f32.mrb[101].mxu1 }
 0x1d4   : > { %v2924_v25 = vld [vmem:[#allocation3 + $0x90] sm:$0xff]  ;;  %v2829_v35 = vadd.f32 %v2762_v2, %v2555_v0  ;;  %v4871_v1 = vpop.f32.mrb[102].mxu1  ;;  %v4906_v42 = vpop.f32.mrb[100].mxu0 }
 0x1d5   : > { %v3198_v26 = vadd.f32 %v4902_v32, %v2924_v25  ;;  %2863 = vst.msk [vmem:[#allocation3 + $0xb0] sm:$0xff] %vm565_vm1, %v2831_v22  ;;  %v2922_v28 = vld [vmem:[#allocation3 + $0x80] sm:$0xff]  ;;  %v2832_v12 = vadd.f32 %v4871_v1, %v2558_v48  ;;  %v2765_v39 = vpop.f32.mrb[103].mxu1  ;;  %v3133_v5 = vpop.f32.mrb[101].mxu0  ;;  %v3278_v1 = vld [vmem:[#allocation3 + $0x10] sm:$0xff] }
 0x1d6   : > { %v3196_v44 = vadd.f32 %v3117_v21, %v2922_v28  ;;  %2861 = vst.msk [vmem:[#allocation3 + $0xa0] sm:$0xff] %vm565_vm1, %v2829_v35  ;;  %v2925_v47 = vld [vmem:[#allocation3 + $0x98] sm:$0xff]  ;;  %v2830_v49 = vadd.f32 %v2765_v39, %v2556_v38  ;;  %v4907_v59 = vpop.f32.mrb[102].mxu0 }
 0x1d7   : > { %3230 = vst.msk [vmem:[#allocation3 + $0x90] sm:$0xff] %vm565_vm1, %v3198_v26  ;;  %v3199_v56 = vadd.f32 %v4903_v16, %v2925_v47  ;;  %2864 = vst.msk [vmem:[#allocation3 + $0xb8] sm:$0xff] %vm565_vm1, %v2832_v12  ;;  %v2923_v41 = vld [vmem:[#allocation3 + $0x88] sm:$0xff]  ;;  %v3136_v62 = vpop.f32.mrb[103].mxu0  ;;  %v3276_v12 = vld [vmem:[#allocation3] sm:$0xff] }
 0x1d8   : > { %3228 = vst.msk [vmem:[#allocation3 + $0x80] sm:$0xff] %vm565_vm1, %v3196_v44  ;;  %v3197_v8 = vadd.f32 %v3120_v13, %v2923_v41  ;;  %2862 = vst.msk [vmem:[#allocation3 + $0xa8] sm:$0xff] %vm565_vm1, %v2830_v49  ;;  %v3279_v44 = vld [vmem:[#allocation3 + $0x18] sm:$0xff]  ;;  %v3277_v41 = vld [vmem:[#allocation3 + $0x8] sm:$0xff] }
 0x1d9   : > { %3231 = vst.msk [vmem:[#allocation3 + $0x98] sm:$0xff] %vm565_vm1, %v3199_v56 }
 0x1da   : > { %3229 = vst.msk [vmem:[#allocation3 + $0x88] sm:$0xff] %vm565_vm1, %v3197_v8  ;;  %v4874_v6 = vpop.f32.mrb[104].mxu1 }
 0x1db   : > { %v2835_v10 = vadd.f32 %v4874_v6, %v2561_v4  ;;  %v2778_v19 = vpop.f32.mrb[105].mxu1 }
 0x1dc   : > { %v2928_v23 = vld [vmem:[#allocation3 + $0xb0] sm:$0xff]  ;;  %v2833_v24 = vadd.f32 %v2778_v19, %v2559_v34  ;;  %v4875_v55 = vpop.f32.mrb[106].mxu1  ;;  %v4910_v54 = vpop.f32.mrb[104].mxu0 }
 0x1dd   : > { %v3202_v18 = vadd.f32 %v4906_v42, %v2928_v23  ;;  %2867 = vst.msk [vmem:[#allocation3 + $0xd0] sm:$0xff] %vm565_vm1, %v2835_v10  ;;  %v2926_v3 = vld [vmem:[#allocation3 + $0xa0] sm:$0xff]  ;;  %v2836_v51 = vadd.f32 %v4875_v55, %v2562_v11  ;;  %v2781_v14 = vpop.f32.mrb[107].mxu1  ;;  %v3149_v31 = vpop.f32.mrb[105].mxu0  ;;  %v3282_v55 = vld [vmem:[#allocation3 + $0x30] sm:$0xff] }
 0x1de   : > { %v3200_v9 = vadd.f32 %v3133_v5, %v2926_v3  ;;  %2865 = vst.msk [vmem:[#allocation3 + $0xc0] sm:$0xff] %vm565_vm1, %v2833_v24  ;;  %v2929_v30 = vld [vmem:[#allocation3 + $0xb8] sm:$0xff]  ;;  %v2834_v29 = vadd.f32 %v2781_v14, %v2560_v61  ;;  %v4911_v53 = vpop.f32.mrb[106].mxu0 }
 0x1df   : > { %3234 = vst.msk [vmem:[#allocation3 + $0xb0] sm:$0xff] %vm565_vm1, %v3202_v18  ;;  %v3203_v27 = vadd.f32 %v4907_v59, %v2929_v30  ;;  %2868 = vst.msk [vmem:[#allocation3 + $0xd8] sm:$0xff] %vm565_vm1, %v2836_v51  ;;  %v2927_v33 = vld [vmem:[#allocation3 + $0xa8] sm:$0xff]  ;;  %v3152_v40 = vpop.f32.mrb[107].mxu0  ;;  %v3280_v51 = vld [vmem:[#allocation3 + $0x20] sm:$0xff] }
 0x1e0   : > { %3232 = vst.msk [vmem:[#allocation3 + $0xa0] sm:$0xff] %vm565_vm1, %v3200_v9  ;;  %v3201_v46 = vadd.f32 %v3136_v62, %v2927_v33  ;;  %2866 = vst.msk [vmem:[#allocation3 + $0xc8] sm:$0xff] %vm565_vm1, %v2834_v29  ;;  %v3283_v9 = vld [vmem:[#allocation3 + $0x38] sm:$0xff]  ;;  %v3281_v33 = vld [vmem:[#allocation3 + $0x28] sm:$0xff] }
 0x1e1   : > { %3235 = vst.msk [vmem:[#allocation3 + $0xb8] sm:$0xff] %vm565_vm1, %v3203_v27 }
 0x1e2   : > { %3233 = vst.msk [vmem:[#allocation3 + $0xa8] sm:$0xff] %vm565_vm1, %v3201_v46  ;;  %v4878_v60 = vpop.f32.mrb[108].mxu1 }
 0x1e3   : > { %v2839_v57 = vadd.f32 %v4878_v60, %v2565_v50  ;;  %v2794_v17 = vpop.f32.mrb[109].mxu1 }
 0x1e4   : > { %v2932_v20 = vld [vmem:[#allocation3 + $0xd0] sm:$0xff]  ;;  %v2837_v32 = vadd.f32 %v2794_v17, %v2563_v37  ;;  %v4879_v63 = vpop.f32.mrb[110].mxu1  ;;  %v4914_v36 = vpop.f32.mrb[108].mxu0 }
 0x1e5   : > { %v3206_v7 = vadd.f32 %v4910_v54, %v2932_v20  ;;  %2871 = vst.msk [vmem:[#allocation3 + $0xf0] sm:$0xff] %vm565_vm1, %v2839_v57  ;;  %v2930_v21 = vld [vmem:[#allocation3 + $0xc0] sm:$0xff]  ;;  %v2840_v15 = vadd.f32 %v4879_v63, %v2566_v52  ;;  %v2797_v16 = vpop.f32.mrb[111].mxu1  ;;  %v3165_v22 = vpop.f32.mrb[109].mxu0  ;;  %v3286_v63 = vld [vmem:[#allocation3 + $0x50] sm:$0xff] }
 0x1e6   : > { %v3204_v13 = vadd.f32 %v3149_v31, %v2930_v21  ;;  %2869 = vst.msk [vmem:[#allocation3 + $0xe0] sm:$0xff] %vm565_vm1, %v2837_v32  ;;  %v2933_v43 = vld [vmem:[#allocation3 + $0xd8] sm:$0xff]  ;;  %v2838_v58 = vadd.f32 %v2797_v16, %v2564_v45  ;;  %v4915_v25 = vpop.f32.mrb[110].mxu0 }
 0x1e7   : > { %3238 = vst.msk [vmem:[#allocation3 + $0xd0] sm:$0xff] %vm565_vm1, %v3206_v7  ;;  %v3207_v0 = vadd.f32 %v4911_v53, %v2933_v43  ;;  %2872 = vst.msk [vmem:[#allocation3 + $0xf8] sm:$0xff] %vm565_vm1, %v2840_v15  ;;  %v2931_v2 = vld [vmem:[#allocation3 + $0xc8] sm:$0xff]  ;;  %v3168_v48 = vpop.f32.mrb[111].mxu0  ;;  %v3284_v15 = vld [vmem:[#allocation3 + $0x40] sm:$0xff] }
 0x1e8   : > { %3236 = vst.msk [vmem:[#allocation3 + $0xc0] sm:$0xff] %vm565_vm1, %v3204_v13  ;;  %v3205_v35 = vadd.f32 %v3152_v40, %v2931_v2  ;;  %2870 = vst.msk [vmem:[#allocation3 + $0xe8] sm:$0xff] %vm565_vm1, %v2838_v58  ;;  %v3287_v13 = vld [vmem:[#allocation3 + $0x58] sm:$0xff]  ;;  %v3285_v2 = vld [vmem:[#allocation3 + $0x48] sm:$0xff] }
 0x1e9   : > { %3239 = vst.msk [vmem:[#allocation3 + $0xd8] sm:$0xff] %vm565_vm1, %v3207_v0 }
 0x1ea   : > { %3237 = vst.msk [vmem:[#allocation3 + $0xc8] sm:$0xff] %vm565_vm1, %v3205_v35  ;;  %v4922_v26 = vpop.f32.mrb[112].mxu1 }
 0x1eb   : > { %v3552_v28 = vadd.f32 %v4922_v26, %v3278_v1  ;;  %v3423_v38 = vpop.f32.mrb[113].mxu1 }
 0x1ec   : > { %v2936_v39 = vld [vmem:[#allocation3 + $0xf0] sm:$0xff]  ;;  %v3550_v42 = vadd.f32 %v3423_v38, %v3276_v12  ;;  %v4923_v47 = vpop.f32.mrb[114].mxu1  ;;  %v4958_v8 = vpop.f32.mrb[112].mxu0 }
 0x1ed   : > { %v3210_v49 = vadd.f32 %v4914_v36, %v2936_v39  ;;  %v2934_v5 = vld [vmem:[#allocation3 + $0xe0] sm:$0xff]  ;;  %3584 = vst.msk [vmem:[#allocation3 + $0x10] sm:$0xff] %vm565_vm1, %v3552_v28  ;;  %v3553_v56 = vadd.f32 %v4923_v47, %v3279_v44  ;;  %v3426_v59 = vpop.f32.mrb[115].mxu1  ;;  %v3793_v10 = vpop.f32.mrb[113].mxu0 }
 0x1ee   : > { %v3208_v62 = vadd.f32 %v3165_v22, %v2934_v5  ;;  %v2937_v4 = vld [vmem:[#allocation3 + $0xf8] sm:$0xff]  ;;  %3582 = vst.msk [vmem:[#allocation3] sm:$0xff] %vm565_vm1, %v3550_v42  ;;  %v3551_v6 = vadd.f32 %v3426_v59, %v3277_v41  ;;  %v4959_v23 = vpop.f32.mrb[114].mxu0 }
 0x1ef   : > { %3242 = vst.msk [vmem:[#allocation3 + $0xf0] sm:$0xff] %vm565_vm1, %v3210_v49  ;;  %v3211_v34 = vadd.f32 %v4915_v25, %v2937_v4  ;;  %v2935_v19 = vld [vmem:[#allocation3 + $0xe8] sm:$0xff]  ;;  %3585 = vst.msk [vmem:[#allocation3 + $0x18] sm:$0xff] %vm565_vm1, %v3553_v56  ;;  %v3796_v11 = vpop.f32.mrb[115].mxu0 }
 0x1f0   : > { %3240 = vst.msk [vmem:[#allocation3 + $0xe0] sm:$0xff] %vm565_vm1, %v3208_v62  ;;  %v3209_v24 = vadd.f32 %v3168_v48, %v2935_v19  ;;  %3583 = vst.msk [vmem:[#allocation3 + $0x8] sm:$0xff] %vm565_vm1, %v3551_v6  ;;  %v3290_v6 = vld [vmem:[#allocation3 + $0x70] sm:$0xff] }
 0x1f1   : > { %3243 = vst.msk [vmem:[#allocation3 + $0xf8] sm:$0xff] %vm565_vm1, %v3211_v34 }
 0x1f2   : > { %3241 = vst.msk [vmem:[#allocation3 + $0xe8] sm:$0xff] %vm565_vm1, %v3209_v24  ;;  %v4926_v18 = vpop.f32.mrb[116].mxu1  ;;  %v3288_v24 = vld [vmem:[#allocation3 + $0x60] sm:$0xff] }
 0x1f3   : > { %v3556_v3 = vadd.f32 %v4926_v18, %v3282_v55  ;;  %v3439_v61 = vpop.f32.mrb[117].mxu1 }
 0x1f4   : > { %v3648_v14 = vld [vmem:[#allocation3 + $0x10] sm:$0xff]  ;;  %v3554_v54 = vadd.f32 %v3439_v61, %v3280_v51  ;;  %v4927_v30 = vpop.f32.mrb[118].mxu1  ;;  %v4962_v46 = vpop.f32.mrb[116].mxu0 }
 0x1f5   : > { %v3922_v29 = vadd.f32 %v4958_v8, %v3648_v14  ;;  %3588 = vst.msk [vmem:[#allocation3 + $0x30] sm:$0xff] %vm565_vm1, %v3556_v3  ;;  %v3646_v31 = vld [vmem:[#allocation3] sm:$0xff]  ;;  %v3557_v27 = vadd.f32 %v4927_v30, %v3283_v9  ;;  %v3442_v53 = vpop.f32.mrb[119].mxu1  ;;  %v3809_v57 = vpop.f32.mrb[117].mxu0  ;;  %v3291_v14 = vld [vmem:[#allocation3 + $0x78] sm:$0xff] }
 0x1f6   : > { %v3920_v40 = vadd.f32 %v3793_v10, %v3646_v31  ;;  %3586 = vst.msk [vmem:[#allocation3 + $0x20] sm:$0xff] %vm565_vm1, %v3554_v54  ;;  %v3649_v50 = vld [vmem:[#allocation3 + $0x18] sm:$0xff]  ;;  %v3555_v60 = vadd.f32 %v3442_v53, %v3281_v33  ;;  %v4963_v20 = vpop.f32.mrb[118].mxu0  ;;  %v3289_v33 = vld [vmem:[#allocation3 + $0x68] sm:$0xff] }
 0x1f7   : > { %3954 = vst.msk [vmem:[#allocation3 + $0x10] sm:$0xff] %vm565_vm1, %v3922_v29  ;;  %v3923_v37 = vadd.f32 %v4959_v23, %v3649_v50  ;;  %3589 = vst.msk [vmem:[#allocation3 + $0x38] sm:$0xff] %vm565_vm1, %v3557_v27  ;;  %v3647_v17 = vld [vmem:[#allocation3 + $0x8] sm:$0xff]  ;;  %v3812_v52 = vpop.f32.mrb[119].mxu0 }
 0x1f8   : > { %3952 = vst.msk [vmem:[#allocation3] sm:$0xff] %vm565_vm1, %v3920_v40  ;;  %v3921_v32 = vadd.f32 %v3796_v11, %v3647_v17  ;;  %3587 = vst.msk [vmem:[#allocation3 + $0x28] sm:$0xff] %vm565_vm1, %v3555_v60 }
 0x1f9   : > { %3955 = vst.msk [vmem:[#allocation3 + $0x18] sm:$0xff] %vm565_vm1, %v3923_v37 }
 0x1fa   : > { %3953 = vst.msk [vmem:[#allocation3 + $0x8] sm:$0xff] %vm565_vm1, %v3921_v32  ;;  %v4930_v7 = vpop.f32.mrb[120].mxu1 }
 0x1fb   : > { %v3560_v21 = vadd.f32 %v4930_v7, %v3286_v63  ;;  %v3455_v45 = vpop.f32.mrb[121].mxu1 }
 0x1fc   : > { %v3652_v16 = vld [vmem:[#allocation3 + $0x30] sm:$0xff]  ;;  %v3558_v36 = vadd.f32 %v3455_v45, %v3284_v15  ;;  %v4931_v43 = vpop.f32.mrb[122].mxu1  ;;  %v4966_v35 = vpop.f32.mrb[120].mxu0 }
 0x1fd   : > { %v3926_v58 = vadd.f32 %v4962_v46, %v3652_v16  ;;  %3592 = vst.msk [vmem:[#allocation3 + $0x50] sm:$0xff] %vm565_vm1, %v3560_v21  ;;  %v3650_v22 = vld [vmem:[#allocation3 + $0x20] sm:$0xff]  ;;  %v3561_v0 = vadd.f32 %v4931_v43, %v3287_v13  ;;  %v3458_v25 = vpop.f32.mrb[123].mxu1  ;;  %v3825_v12 = vpop.f32.mrb[121].mxu0 }
 0x1fe   : > { %v3986_v48 = vld [vmem:[#allocation3 + $0x10] sm:$0xff]  ;;  %v3924_v1 = vadd.f32 %v3809_v57, %v3650_v22  ;;  %3590 = vst.msk [vmem:[#allocation3 + $0x40] sm:$0xff] %vm565_vm1, %v3558_v36  ;;  %v3653_v26 = vld [vmem:[#allocation3 + $0x38] sm:$0xff]  ;;  %v3559_v28 = vadd.f32 %v3458_v25, %v3285_v2  ;;  %v4967_v44 = vpop.f32.mrb[122].mxu0 }
 0x1ff   : > { %4018 = vst.msk [vmem:[%s5081_s30 + $0x10] sm:$0xff] %vm565_vm1, %v3986_v48  ;;  %v3984_v38 = vld [vmem:[#allocation3] sm:$0xff]  ;;  %3958 = vst.msk [vmem:[#allocation3 + $0x30] sm:$0xff] %vm565_vm1, %v3926_v58  ;;  %v3927_v39 = vadd.f32 %v4963_v20, %v3653_v26  ;;  %v3651_v42 = vld [vmem:[#allocation3 + $0x28] sm:$0xff]  ;;  %v3828_v56 = vpop.f32.mrb[123].mxu0  ;;  %v4124_v59 = vmul.f32 %v3986_v48, %v3986_v48  ;;  %v4052_v55 = vsel %vm565_vm1, %v3986_v48, 0.0 }
 0x200   : > { %3593 = vst.msk [vmem:[#allocation3 + $0x58] sm:$0xff] %vm565_vm1, %v3561_v0  ;;  %4016 = vst.msk [vmem:[%s5081_s30] sm:$0xff] %vm565_vm1, %v3984_v38  ;;  %v4122_v47 = vmul.f32 %v3984_v38, %v3984_v38  ;;  %v3987_v49 = vld [vmem:[#allocation3 + $0x18] sm:$0xff]  ;;  %v3925_v5 = vadd.f32 %v3812_v52, %v3651_v42  ;;  %v4049_v8 = vsel %vm565_vm1, %v3984_v38, 0.0  ;;  %v3294_v26 = vld [vmem:[#allocation3 + $0x90] sm:$0xff] }
 0x201   : > { %3956 = vst.msk [vmem:[#allocation3 + $0x20] sm:$0xff] %vm565_vm1, %v3924_v1  ;;  %3591 = vst.msk [vmem:[#allocation3 + $0x48] sm:$0xff] %vm565_vm1, %v3559_v28  ;;  %v3985_v41 = vld [vmem:[#allocation3 + $0x8] sm:$0xff]  ;;  %v4125_v34 = vmul.f32 %v3987_v49, %v3987_v49  ;;  %v4157_v40 = vsel %vm565_vm1, %v4124_v59, 0.0  ;;  %v4054_v50 = vsel %vm565_vm1, %v3987_v49, 0.0  ;;  %v3295_v59 = vld [vmem:[#allocation3 + $0x98] sm:$0xff] }
 0x202   : > { %4019 = vst.msk [vmem:[%s5081_s30 + $0x18] sm:$0xff] %vm565_vm1, %v3987_v49  ;;  %3959 = vst.msk [vmem:[#allocation3 + $0x38] sm:$0xff] %vm565_vm1, %v3927_v39  ;;  %v4050_v62 = vsel %vm565_vm1, %v3985_v41, 0.0  ;;  %v4123_v4 = vmul.f32 %v3985_v41, %v3985_v41  ;;  %v4934_v10 = vpop.f32.mrb[124].mxu1  ;;  %v4154_v18 = vsel %vm565_vm1, %v4122_v47, 0.0 }
 0x203   : > { %4017 = vst.msk [vmem:[%s5081_s30 + $0x8] sm:$0xff] %vm565_vm1, %v3985_v41  ;;  %3957 = vst.msk [vmem:[#allocation3 + $0x28] sm:$0xff] %vm565_vm1, %v3925_v5  ;;  %v4051_v19 = vadd.f32 %v4050_v62, %v4049_v8  ;;  %v3564_v23 = vadd.f32 %v4934_v10, %v3290_v6  ;;  %v3471_v11 = vpop.f32.mrb[125].mxu1  ;;  %v4159_v32 = vsel %vm565_vm1, %v4125_v34, 0.0 }
 0x204   : > { %v4155_v3 = vsel %vm565_vm1, %v4123_v4, 0.0  ;;  %v3656_v51 = vld [vmem:[#allocation3 + $0x50] sm:$0xff]  ;;  %v3562_v61 = vadd.f32 %v3471_v11, %v3288_v24  ;;  %v4935_v54 = vpop.f32.mrb[126].mxu1  ;;  %v4970_v46 = vpop.f32.mrb[124].mxu0 }
 0x205   : > { %v4053_v9 = vadd.f32 %v4052_v55, %v4051_v19  ;;  %v4156_v30 = vadd.f32 %v4155_v3, %v4154_v18  ;;  %v3930_v29 = vadd.f32 %v4966_v35, %v3656_v51  ;;  %3596 = vst.msk [vmem:[#allocation3 + $0x70] sm:$0xff] %vm565_vm1, %v3564_v23  ;;  %v3654_v31 = vld [vmem:[#allocation3 + $0x40] sm:$0xff]  ;;  %v3565_v27 = vadd.f32 %v4935_v54, %v3291_v14  ;;  %v3474_v53 = vpop.f32.mrb[127].mxu1  ;;  %v3841_v20 = vpop.f32.mrb[125].mxu0  ;;  %v3293_v19 = vld [vmem:[#allocation3 + $0x88] sm:$0xff] }
 0x206   : > { %v3990_v60 = vld [vmem:[#allocation3 + $0x30] sm:$0xff]  ;;  %v3928_v57 = vadd.f32 %v3825_v12, %v3654_v31  ;;  %3594 = vst.msk [vmem:[#allocation3 + $0x60] sm:$0xff] %vm565_vm1, %v3562_v61  ;;  %v3563_v17 = vadd.f32 %v3474_v53, %v3289_v33  ;;  %v6060_v15 = vpop.f32.mrb[126].mxu0 }
 0x207   : > { %v3657_v37 = vld [vmem:[#allocation3 + $0x58] sm:$0xff]  ;;  %v4158_v52 = vadd.f32 %v4157_v40, %v4156_v30  ;;  %4022 = vst.msk [vmem:[%s5081_s30 + $0x30] sm:$0xff] %vm565_vm1, %v3990_v60  ;;  %v4055_v7 = vadd.f32 %v4054_v50, %v4053_v9  ;;  %3962 = vst.msk [vmem:[#allocation3 + $0x50] sm:$0xff] %vm565_vm1, %v3930_v29  ;;  %v3844_v58 = vpop.f32.mrb[127].mxu0  ;;  %v4128_v25 = vmul.f32 %v3990_v60, %v3990_v60  ;;  %v4060_v49 = vsel %vm565_vm1, %v3990_v60, 0.0 }
 0x208   : > { %v3988_v63 = vld [vmem:[#allocation3 + $0x20] sm:$0xff]  ;;  %3597 = vst.msk [vmem:[#allocation3 + $0x78] sm:$0xff] %vm565_vm1, %v3565_v27  ;;  %v3655_v21 = vld [vmem:[#allocation3 + $0x48] sm:$0xff]  ;;  %3960 = vst.msk [vmem:[#allocation3 + $0x40] sm:$0xff] %vm565_vm1, %v3928_v57  ;;  %v3931_v13 = vadd.f32 %v4967_v44, %v3657_v37 }
 0x209   : > { %4020 = vst.msk [vmem:[%s5081_s30 + $0x20] sm:$0xff] %vm565_vm1, %v3988_v63  ;;  %v4056_v45 = vsel %vm565_vm1, %v3988_v63, 0.0  ;;  %v4126_v16 = vmul.f32 %v3988_v63, %v3988_v63  ;;  %v3991_v36 = vld [vmem:[#allocation3 + $0x38] sm:$0xff]  ;;  %v3929_v43 = vadd.f32 %v3828_v56, %v3655_v21  ;;  %3595 = vst.msk [vmem:[#allocation3 + $0x68] sm:$0xff] %vm565_vm1, %v3563_v17  ;;  %v4160_v0 = vadd.f32 %v4159_v32, %v4158_v52  ;;  %v3292_v44 = vld [vmem:[#allocation3 + $0x80] sm:$0xff] }
 0x20a   : > { %v4057_v22 = vadd.f32 %v4056_v45, %v4055_v7  ;;  %4023 = vst.msk [vmem:[%s5081_s30 + $0x38] sm:$0xff] %vm565_vm1, %v3991_v36  ;;  %v3989_v2 = vld [vmem:[#allocation3 + $0x28] sm:$0xff]  ;;  %3963 = vst.msk [vmem:[#allocation3 + $0x58] sm:$0xff] %vm565_vm1, %v3931_v13  ;;  %v4938_v28 = vpop.f32.mrb[128].mxu1  ;;  %v4129_v38 = vmul.f32 %v3991_v36, %v3991_v36  ;;  %v4165_v11 = vsel %vm565_vm1, %v4128_v25, 0.0  ;;  %v4062_v55 = vsel %vm565_vm1, %v3991_v36, 0.0 }
 0x20b   : > { %v4161_v35 = vsel %vm565_vm1, %v4126_v16, 0.0  ;;  %4021 = vst.msk [vmem:[%s5081_s30 + $0x28] sm:$0xff] %vm565_vm1, %v3989_v2  ;;  %v4058_v48 = vsel %vm565_vm1, %v3989_v2, 0.0  ;;  %v4127_v1 = vmul.f32 %v3989_v2, %v3989_v2  ;;  %3961 = vst.msk [vmem:[#allocation3 + $0x48] sm:$0xff] %vm565_vm1, %v3929_v43  ;;  %v3568_v42 = vadd.f32 %v4938_v28, %v3294_v26  ;;  %v3487_v47 = vpop.f32.mrb[129].mxu1  ;;  %v3298_v63 = vld [vmem:[#allocation3 + $0xb0] sm:$0xff] }
 0x20c   : > { %v4162_v12 = vadd.f32 %v4161_v35, %v4160_v0  ;;  %v4059_v39 = vadd.f32 %v4058_v48, %v4057_v22  ;;  %v3660_v56 = vld [vmem:[#allocation3 + $0x70] sm:$0xff]  ;;  %v3566_v41 = vadd.f32 %v3487_v47, %v3292_v44  ;;  %v4939_v8 = vpop.f32.mrb[130].mxu1  ;;  %v4974_v24 = vpop.f32.mrb[128].mxu0  ;;  %v4167_v54 = vsel %vm565_vm1, %v4129_v38, 0.0  ;;  %v3296_v36 = vld [vmem:[#allocation3 + $0xa0] sm:$0xff]  ;;  %v3299_v2 = vld [vmem:[#allocation3 + $0xb8] sm:$0xff] }
 0x20d   : > { %v4163_v5 = vsel %vm565_vm1, %v4127_v1, 0.0  ;;  %v3934_v6 = vadd.f32 %v4970_v46, %v3660_v56  ;;  %3600 = vst.msk [vmem:[#allocation3 + $0x90] sm:$0xff] %vm565_vm1, %v3568_v42  ;;  %v3658_v10 = vld [vmem:[#allocation3 + $0x60] sm:$0xff]  ;;  %v3569_v34 = vadd.f32 %v4939_v8, %v3295_v59  ;;  %v3490_v23 = vpop.f32.mrb[131].mxu1  ;;  %v3857_v14 = vpop.f32.mrb[129].mxu0 }
 0x20e   : > { %v4061_v62 = vadd.f32 %v4060_v49, %v4059_v39  ;;  %v4164_v4 = vadd.f32 %v4163_v5, %v4162_v12  ;;  %v3994_v18 = vld [vmem:[#allocation3 + $0x50] sm:$0xff]  ;;  %v3932_v3 = vadd.f32 %v3841_v20, %v3658_v10  ;;  %3598 = vst.msk [vmem:[#allocation3 + $0x80] sm:$0xff] %vm565_vm1, %v3566_v41  ;;  %v3567_v61 = vadd.f32 %v3490_v23, %v3293_v19  ;;  %v4975_v27 = vpop.f32.mrb[130].mxu0  ;;  %v3297_v12 = vld [vmem:[#allocation3 + $0xa8] sm:$0xff] }
 0x20f   : > { %v3661_v51 = vld [vmem:[#allocation3 + $0x78] sm:$0xff]  ;;  %4026 = vst.msk [vmem:[%s5081_s30 + $0x50] sm:$0xff] %vm565_vm1, %v3994_v18  ;;  %v3992_v30 = vld [vmem:[#allocation3 + $0x40] sm:$0xff]  ;;  %3966 = vst.msk [vmem:[#allocation3 + $0x70] sm:$0xff] %vm565_vm1, %v3934_v6  ;;  %v3860_v50 = vpop.f32.mrb[131].mxu0  ;;  %v4132_v20 = vmul.f32 %v3994_v18, %v3994_v18  ;;  %v4068_v43 = vsel %vm565_vm1, %v3994_v18, 0.0 }
 0x210   : > { %v4166_v9 = vadd.f32 %v4165_v11, %v4164_v4  ;;  %v4063_v29 = vadd.f32 %v4062_v55, %v4061_v62  ;;  %3601 = vst.msk [vmem:[#allocation3 + $0x98] sm:$0xff] %vm565_vm1, %v3569_v34  ;;  %v3659_v31 = vld [vmem:[#allocation3 + $0x68] sm:$0xff]  ;;  %4024 = vst.msk [vmem:[%s5081_s30 + $0x40] sm:$0xff] %vm565_vm1, %v3992_v30  ;;  %v4064_v33 = vsel %vm565_vm1, %v3992_v30, 0.0  ;;  %v4130_v53 = vmul.f32 %v3992_v30, %v3992_v30 }
 0x211   : > { %3964 = vst.msk [vmem:[#allocation3 + $0x60] sm:$0xff] %vm565_vm1, %v3932_v3  ;;  %v3935_v46 = vadd.f32 %v6060_v15, %v3661_v51  ;;  %v3933_v40 = vadd.f32 %v3844_v58, %v3659_v31  ;;  %3599 = vst.msk [vmem:[#allocation3 + $0x88] sm:$0xff] %vm565_vm1, %v3567_v61  ;;  %v3995_v37 = vld [vmem:[#allocation3 + $0x58] sm:$0xff]  ;;  %v4173_v59 = vsel %vm565_vm1, %v4132_v20, 0.0 }
 0x212   : > { %v4065_v60 = vadd.f32 %v4064_v33, %v4063_v29  ;;  %v4168_v57 = vadd.f32 %v4167_v54, %v4166_v9  ;;  %v3993_v17 = vld [vmem:[#allocation3 + $0x48] sm:$0xff]  ;;  %v4169_v32 = vsel %vm565_vm1, %v4130_v53, 0.0  ;;  %4027 = vst.msk [vmem:[%s5081_s30 + $0x58] sm:$0xff] %vm565_vm1, %v3995_v37  ;;  %v4942_v7 = vpop.f32.mrb[132].mxu1  ;;  %v4133_v58 = vmul.f32 %v3995_v37, %v3995_v37  ;;  %v3302_v54 = vld [vmem:[#allocation3 + $0xd0] sm:$0xff]  ;;  %v3300_v33 = vld [vmem:[#allocation3 + $0xc0] sm:$0xff] }
 0x213   : > { %4025 = vst.msk [vmem:[%s5081_s30 + $0x48] sm:$0xff] %vm565_vm1, %v3993_v17  ;;  %v4066_v52 = vsel %vm565_vm1, %v3993_v17, 0.0  ;;  %3967 = vst.msk [vmem:[#allocation3 + $0x78] sm:$0xff] %vm565_vm1, %v3935_v46  ;;  %v4131_v45 = vmul.f32 %v3993_v17, %v3993_v17  ;;  %v3572_v16 = vadd.f32 %v4942_v7, %v3298_v63  ;;  %v3503_v13 = vpop.f32.mrb[133].mxu1  ;;  %v4070_v42 = vsel %vm565_vm1, %v3995_v37, 0.0  ;;  %v3303_v37 = vld [vmem:[#allocation3 + $0xd8] sm:$0xff] }
 0x214   : > { %3965 = vst.msk [vmem:[#allocation3 + $0x68] sm:$0xff] %vm565_vm1, %v3933_v40  ;;  %v4170_v21 = vadd.f32 %v4169_v32, %v4168_v57  ;;  %v4067_v15 = vadd.f32 %v4066_v52, %v4065_v60  ;;  %v3664_v22 = vld [vmem:[#allocation3 + $0x90] sm:$0xff]  ;;  %v3570_v0 = vadd.f32 %v3503_v13, %v3296_v36  ;;  %v4943_v25 = vpop.f32.mrb[134].mxu1  ;;  %v4978_v39 = vpop.f32.mrb[132].mxu0  ;;  %v4175_v55 = vsel %vm565_vm1, %v4133_v58, 0.0 }
 0x215   : > { %v4171_v48 = vsel %vm565_vm1, %v4131_v45, 0.0  ;;  %v3938_v1 = vadd.f32 %v4974_v24, %v3664_v22  ;;  %3604 = vst.msk [vmem:[#allocation3 + $0xb0] sm:$0xff] %vm565_vm1, %v3572_v16  ;;  %v3662_v26 = vld [vmem:[#allocation3 + $0x80] sm:$0xff]  ;;  %v3573_v28 = vadd.f32 %v4943_v25, %v3299_v2  ;;  %v3506_v38 = vpop.f32.mrb[135].mxu1  ;;  %v3873_v41 = vpop.f32.mrb[133].mxu0 }
 0x216   : > { %v4069_v35 = vadd.f32 %v4068_v43, %v4067_v15  ;;  %v4172_v44 = vadd.f32 %v4171_v48, %v4170_v21  ;;  %v3998_v47 = vld [vmem:[#allocation3 + $0x70] sm:$0xff]  ;;  %v3936_v49 = vadd.f32 %v3857_v14, %v3662_v26  ;;  %3602 = vst.msk [vmem:[#allocation3 + $0xa0] sm:$0xff] %vm565_vm1, %v3570_v0  ;;  %v3571_v56 = vadd.f32 %v3506_v38, %v3297_v12  ;;  %v4979_v10 = vpop.f32.mrb[134].mxu0  ;;  %v3301_v21 = vld [vmem:[#allocation3 + $0xc8] sm:$0xff] }
 0x217   : > { %v3665_v5 = vld [vmem:[#allocation3 + $0x98] sm:$0xff]  ;;  %4030 = vst.msk [vmem:[%s5081_s30 + $0x70] sm:$0xff] %vm565_vm1, %v3998_v47  ;;  %3970 = vst.msk [vmem:[#allocation3 + $0x90] sm:$0xff] %vm565_vm1, %v3938_v1  ;;  %v6115_v11 = vpop.f32.mrb[135].mxu0  ;;  %v4136_v30 = vmul.f32 %v3998_v47, %v3998_v47  ;;  %v4076_v46 = vsel %vm565_vm1, %v3998_v47, 0.0 }
 0x218   : > { %v3996_v8 = vld [vmem:[#allocation3 + $0x60] sm:$0xff]  ;;  %v4071_v62 = vadd.f32 %v4070_v42, %v4069_v35  ;;  %v3939_v4 = vadd.f32 %v4975_v27, %v3665_v5  ;;  %3605 = vst.msk [vmem:[#allocation3 + $0xb8] sm:$0xff] %vm565_vm1, %v3573_v28  ;;  %v3663_v6 = vld [vmem:[#allocation3 + $0x88] sm:$0xff]  ;;  %v4174_v34 = vadd.f32 %v4173_v59, %v4172_v44  ;;  %3968 = vst.msk [vmem:[#allocation3 + $0x80] sm:$0xff] %vm565_vm1, %v3936_v49 }
 0x219   : > { %4028 = vst.msk [vmem:[%s5081_s30 + $0x60] sm:$0xff] %vm565_vm1, %v3996_v8  ;;  %v4072_v19 = vsel %vm565_vm1, %v3996_v8, 0.0  ;;  %v4134_v23 = vmul.f32 %v3996_v8, %v3996_v8  ;;  %v3937_v24 = vadd.f32 %v3860_v50, %v3663_v6  ;;  %3603 = vst.msk [vmem:[#allocation3 + $0xa8] sm:$0xff] %vm565_vm1, %v3571_v56  ;;  %v4181_v2 = vsel %vm565_vm1, %v4136_v30, 0.0 }
 0x21a   : > { %v4073_v18 = vadd.f32 %v4072_v19, %v4071_v62  ;;  %v3999_v3 = vld [vmem:[#allocation3 + $0x78] sm:$0xff]  ;;  %3971 = vst.msk [vmem:[#allocation3 + $0x98] sm:$0xff] %vm565_vm1, %v3939_v4  ;;  %v4176_v61 = vadd.f32 %v4175_v55, %v4174_v34  ;;  %v4946_v9 = vpop.f32.mrb[136].mxu1  ;;  %v3306_v62 = vld [vmem:[#allocation3 + $0xf0] sm:$0xff]  ;;  %v3304_v19 = vld [vmem:[#allocation3 + $0xe0] sm:$0xff] }
 0x21b   : > { %v3997_v51 = vld [vmem:[#allocation3 + $0x68] sm:$0xff]  ;;  %v4177_v14 = vsel %vm565_vm1, %v4134_v23, 0.0  ;;  %4031 = vst.msk [vmem:[%s5081_s30 + $0x78] sm:$0xff] %vm565_vm1, %v3999_v3  ;;  %3969 = vst.msk [vmem:[#allocation3 + $0x88] sm:$0xff] %vm565_vm1, %v3937_v24  ;;  %v3576_v27 = vadd.f32 %v4946_v9, %v3302_v54  ;;  %v3519_v53 = vpop.f32.mrb[137].mxu1  ;;  %v4137_v20 = vmul.f32 %v3999_v3, %v3999_v3  ;;  %v4078_v25 = vsel %vm565_vm1, %v3999_v3, 0.0 }
 0x21c   : > { %4029 = vst.msk [vmem:[%s5081_s30 + $0x68] sm:$0xff] %vm565_vm1, %v3997_v51  ;;  %v4074_v29 = vsel %vm565_vm1, %v3997_v51, 0.0  ;;  %v4135_v31 = vmul.f32 %v3997_v51, %v3997_v51  ;;  %v4178_v40 = vadd.f32 %v4177_v14, %v4176_v61  ;;  %v3668_v60 = vld [vmem:[#allocation3 + $0xb0] sm:$0xff]  ;;  %v3574_v57 = vadd.f32 %v3519_v53, %v3300_v33  ;;  %v4947_v17 = vpop.f32.mrb[138].mxu1  ;;  %v4982_v45 = vpop.f32.mrb[136].mxu0  ;;  %v3307_v51 = vld [vmem:[#allocation3 + $0xf8] sm:$0xff] }
 0x21d   : > { %v4075_v50 = vadd.f32 %v4074_v29, %v4073_v18  ;;  %v3942_v52 = vadd.f32 %v4978_v39, %v3668_v60  ;;  %3608 = vst.msk [vmem:[#allocation3 + $0xd0] sm:$0xff] %vm565_vm1, %v3576_v27  ;;  %v3666_v63 = vld [vmem:[#allocation3 + $0xa0] sm:$0xff]  ;;  %v3577_v7 = vadd.f32 %v4947_v17, %v3303_v37  ;;  %v3522_v15 = vpop.f32.mrb[139].mxu1  ;;  %v3889_v0 = vpop.f32.mrb[137].mxu0  ;;  %v4183_v47 = vsel %vm565_vm1, %v4137_v20, 0.0 }
 0x21e   : > { %v4179_v32 = vsel %vm565_vm1, %v4135_v31, 0.0  ;;  %v4002_v13 = vld [vmem:[#allocation3 + $0x90] sm:$0xff]  ;;  %v3940_v43 = vadd.f32 %v3873_v41, %v3666_v63  ;;  %3606 = vst.msk [vmem:[#allocation3 + $0xc0] sm:$0xff] %vm565_vm1, %v3574_v57  ;;  %v3575_v22 = vadd.f32 %v3522_v15, %v3301_v21  ;;  %v4983_v26 = vpop.f32.mrb[138].mxu0  ;;  %v3305_v31 = vld [vmem:[#allocation3 + $0xe8] sm:$0xff] }
 0x21f   : > { %v4077_v16 = vadd.f32 %v4076_v46, %v4075_v50  ;;  %v4180_v36 = vadd.f32 %v4179_v32, %v4178_v40  ;;  %v3669_v58 = vld [vmem:[#allocation3 + $0xb8] sm:$0xff]  ;;  %4034 = vst.msk [vmem:[%s5081_s30 + $0x90] sm:$0xff] %vm565_vm1, %v4002_v13  ;;  %v4000_v35 = vld [vmem:[#allocation3 + $0x80] sm:$0xff]  ;;  %3974 = vst.msk [vmem:[#allocation3 + $0xb0] sm:$0xff] %vm565_vm1, %v3942_v52  ;;  %v6141_v44 = vpop.f32.mrb[139].mxu0  ;;  %v4140_v6 = vmul.f32 %v4002_v13, %v4002_v13  ;;  %v4084_v24 = vsel %vm565_vm1, %v4002_v13, 0.0 }
 0x220   : > { %v3943_v48 = vadd.f32 %v4979_v10, %v3669_v58  ;;  %3609 = vst.msk [vmem:[#allocation3 + $0xd8] sm:$0xff] %vm565_vm1, %v3577_v7  ;;  %v3667_v1 = vld [vmem:[#allocation3 + $0xa8] sm:$0xff]  ;;  %4032 = vst.msk [vmem:[%s5081_s30 + $0x80] sm:$0xff] %vm565_vm1, %v4000_v35  ;;  %v4080_v38 = vsel %vm565_vm1, %v4000_v35, 0.0  ;;  %v4138_v39 = vmul.f32 %v4000_v35, %v4000_v35 }
 0x221   : > { %v4182_v28 = vadd.f32 %v4181_v2, %v4180_v36  ;;  %v4079_v12 = vadd.f32 %v4078_v25, %v4077_v16  ;;  %v4003_v42 = vld [vmem:[#allocation3 + $0x98] sm:$0xff]  ;;  %3972 = vst.msk [vmem:[#allocation3 + $0xa0] sm:$0xff] %vm565_vm1, %v3940_v43  ;;  %3607 = vst.msk [vmem:[#allocation3 + $0xc8] sm:$0xff] %vm565_vm1, %v3575_v22  ;;  %v3941_v5 = vadd.f32 %v6115_v11, %v3667_v1  ;;  %v4189_v17 = vsel %vm565_vm1, %v4140_v6, 0.0 }
 0x222   : > { %4035 = vst.msk [vmem:[%s5081_s30 + $0x98] sm:$0xff] %vm565_vm1, %v4003_v42  ;;  %v4001_v49 = vld [vmem:[#allocation3 + $0x88] sm:$0xff]  ;;  %3975 = vst.msk [vmem:[#allocation3 + $0xb8] sm:$0xff] %vm565_vm1, %v3943_v48  ;;  %v4185_v59 = vsel %vm565_vm1, %v4138_v39, 0.0  ;;  %v4950_v4 = vpop.f32.mrb[140].mxu1  ;;  %v4141_v14 = vmul.f32 %v4003_v42, %v4003_v42  ;;  %v4086_v20 = vsel %vm565_vm1, %v4003_v42, 0.0 }
 0x223   : > { %v4081_v56 = vadd.f32 %v4080_v38, %v4079_v12  ;;  %v4184_v41 = vadd.f32 %v4183_v47, %v4182_v28  ;;  %4033 = vst.msk [vmem:[%s5081_s30 + $0x88] sm:$0xff] %vm565_vm1, %v4001_v49  ;;  %v4082_v8 = vsel %vm565_vm1, %v4001_v49, 0.0  ;;  %v4139_v10 = vmul.f32 %v4001_v49, %v4001_v49  ;;  %3973 = vst.msk [vmem:[#allocation3 + $0xa8] sm:$0xff] %vm565_vm1, %v3941_v5  ;;  %v3535_v23 = vpop.f32.mrb[141].mxu1 }
 0x224   : > { %v3580_v34 = vadd.f32 %v4950_v4, %v3306_v62  ;;  %v3672_v18 = vld [vmem:[#allocation3 + $0xd0] sm:$0xff]  ;;  %v3578_v3 = vadd.f32 %v3535_v23, %v3304_v19  ;;  %v4951_v61 = vpop.f32.mrb[142].mxu1  ;;  %v4986_v33 = vpop.f32.mrb[140].mxu0  ;;  %v4191_v43 = vsel %vm565_vm1, %v4141_v14, 0.0 }
 0x225   : > { %v4186_v11 = vadd.f32 %v4185_v59, %v4184_v41  ;;  %v4083_v55 = vadd.f32 %v4082_v8, %v4081_v56  ;;  %v4187_v54 = vsel %vm565_vm1, %v4139_v10, 0.0  ;;  %v3946_v9 = vadd.f32 %v4982_v45, %v3672_v18  ;;  %v3670_v30 = vld [vmem:[#allocation3 + $0xc0] sm:$0xff]  ;;  %v3538_v27 = vpop.f32.mrb[143].mxu1  ;;  %v3905_v37 = vpop.f32.mrb[141].mxu0 }
 0x226   : > { %3612 = vst.msk [vmem:[#allocation3 + $0xf0] sm:$0xff] %vm565_vm1, %v3580_v34  ;;  %v3581_v29 = vadd.f32 %v4951_v61, %v3307_v51  ;;  %v4006_v40 = vld [vmem:[#allocation3 + $0xb0] sm:$0xff]  ;;  %v3944_v50 = vadd.f32 %v3889_v0, %v3670_v30  ;;  %3610 = vst.msk [vmem:[#allocation3 + $0xe0] sm:$0xff] %vm565_vm1, %v3578_v3  ;;  %v3579_v57 = vadd.f32 %v3538_v27, %v3305_v31  ;;  %v4987_v7 = vpop.f32.mrb[142].mxu0 }
 0x227   : > { %v4085_v53 = vadd.f32 %v4084_v24, %v4083_v55  ;;  %v4188_v46 = vadd.f32 %v4187_v54, %v4186_v11  ;;  %v3673_v60 = vld [vmem:[#allocation3 + $0xd8] sm:$0xff]  ;;  %4038 = vst.msk [vmem:[%s5081_s30 + $0xb0] sm:$0xff] %vm565_vm1, %v4006_v40  ;;  %3978 = vst.msk [vmem:[#allocation3 + $0xd0] sm:$0xff] %vm565_vm1, %v3946_v9  ;;  %v3908_v13 = vpop.f32.mrb[143].mxu0  ;;  %v4144_v35 = vmul.f32 %v4006_v40, %v4006_v40  ;;  %v4092_v38 = vsel %vm565_vm1, %v4006_v40, 0.0 }
 0x228   : > { %v4004_v32 = vld [vmem:[#allocation3 + $0xa0] sm:$0xff]  ;;  %v3947_v52 = vadd.f32 %v4983_v26, %v3673_v60  ;;  %3613 = vst.msk [vmem:[#allocation3 + $0xf8] sm:$0xff] %vm565_vm1, %v3581_v29  ;;  %v3671_v63 = vld [vmem:[#allocation3 + $0xc8] sm:$0xff]  ;;  %3976 = vst.msk [vmem:[#allocation3 + $0xc0] sm:$0xff] %vm565_vm1, %v3944_v50 }
 0x229   : > { %v4190_v21 = vadd.f32 %v4189_v17, %v4188_v46  ;;  %4036 = vst.msk [vmem:[%s5081_s30 + $0xa0] sm:$0xff] %vm565_vm1, %v4004_v32  ;;  %v4087_v15 = vadd.f32 %v4086_v20, %v4085_v53  ;;  %v4088_v45 = vsel %vm565_vm1, %v4004_v32, 0.0  ;;  %v4142_v16 = vmul.f32 %v4004_v32, %v4004_v32  ;;  %v4007_v36 = vld [vmem:[#allocation3 + $0xb8] sm:$0xff]  ;;  %3611 = vst.msk [vmem:[#allocation3 + $0xe8] sm:$0xff] %vm565_vm1, %v3579_v57 }
 0x22a   : > { %4039 = vst.msk [vmem:[%s5081_s30 + $0xb8] sm:$0xff] %vm565_vm1, %v4007_v36  ;;  %3979 = vst.msk [vmem:[#allocation3 + $0xd8] sm:$0xff] %vm565_vm1, %v3947_v52  ;;  %v3945_v58 = vadd.f32 %v6141_v44, %v3671_v63  ;;  %v4005_v25 = vld [vmem:[#allocation3 + $0xa8] sm:$0xff]  ;;  %v4145_v39 = vmul.f32 %v4007_v36, %v4007_v36  ;;  %v4197_v8 = vsel %vm565_vm1, %v4144_v35, 0.0  ;;  %v4094_v62 = vsel %vm565_vm1, %v4007_v36, 0.0 }
 0x22b   : > { %v4089_v22 = vadd.f32 %v4088_v45, %v4087_v15  ;;  %v4192_v0 = vadd.f32 %v4191_v43, %v4190_v21  ;;  %v4193_v2 = vsel %vm565_vm1, %v4142_v16, 0.0  ;;  %4037 = vst.msk [vmem:[%s5081_s30 + $0xa8] sm:$0xff] %vm565_vm1, %v4005_v25  ;;  %v4090_v48 = vsel %vm565_vm1, %v4005_v25, 0.0 }
 0x22c   : > { %v4143_v1 = vmul.f32 %v4005_v25, %v4005_v25  ;;  %3977 = vst.msk [vmem:[#allocation3 + $0xc8] sm:$0xff] %vm565_vm1, %v3945_v58  ;;  %v4199_v55 = vsel %vm565_vm1, %v4145_v39, 0.0 }
 0x22d   : > { %v4194_v26 = vadd.f32 %v4193_v2, %v4192_v0  ;;  %v4091_v28 = vadd.f32 %v4090_v48, %v4089_v22  ;;  %v3676_v12 = vld [vmem:[#allocation3 + $0xf0] sm:$0xff]  ;;  %v3674_v47 = vld [vmem:[#allocation3 + $0xe0] sm:$0xff] }
 0x22e   : > { %v4195_v42 = vsel %vm565_vm1, %v4143_v1, 0.0  ;;  %v3950_v44 = vadd.f32 %v4986_v33, %v3676_v12  ;;  %v4010_v56 = vld [vmem:[#allocation3 + $0xd0] sm:$0xff]  ;;  %v3948_v41 = vadd.f32 %v3905_v37, %v3674_v47 }
 0x22f   : > { %v4093_v49 = vadd.f32 %v4092_v38, %v4091_v28  ;;  %v4196_v5 = vadd.f32 %v4195_v42, %v4194_v26  ;;  %v3677_v59 = vld [vmem:[#allocation3 + $0xf8] sm:$0xff]  ;;  %4042 = vst.msk [vmem:[%s5081_s30 + $0xd0] sm:$0xff] %vm565_vm1, %v4010_v56  ;;  %v4008_v4 = vld [vmem:[#allocation3 + $0xc0] sm:$0xff]  ;;  %v4148_v54 = vmul.f32 %v4010_v56, %v4010_v56  ;;  %v4100_v27 = vsel %vm565_vm1, %v4010_v56, 0.0 }
 0x230   : > { %3982 = vst.msk [vmem:[#allocation3 + $0xf0] sm:$0xff] %vm565_vm1, %v3950_v44  ;;  %v3951_v6 = vadd.f32 %v4987_v7, %v3677_v59  ;;  %v3675_v10 = vld [vmem:[#allocation3 + $0xe8] sm:$0xff]  ;;  %4040 = vst.msk [vmem:[%s5081_s30 + $0xc0] sm:$0xff] %vm565_vm1, %v4008_v4  ;;  %v4096_v23 = vsel %vm565_vm1, %v4008_v4, 0.0  ;;  %v4146_v24 = vmul.f32 %v4008_v4, %v4008_v4 }
 0x231   : > { %v4198_v34 = vadd.f32 %v4197_v8, %v4196_v5  ;;  %v4095_v19 = vadd.f32 %v4094_v62, %v4093_v49  ;;  %v4011_v11 = vld [vmem:[#allocation3 + $0xd8] sm:$0xff]  ;;  %3980 = vst.msk [vmem:[#allocation3 + $0xe0] sm:$0xff] %vm565_vm1, %v3948_v41  ;;  %v3949_v18 = vadd.f32 %v3908_v13, %v3675_v10  ;;  %v4205_v60 = vsel %vm565_vm1, %v4148_v54, 0.0  ;;  %v4048_v62 = vld [vmem:[%s6239_s5] sm:$0x1] }
 0x232   : > { %4043 = vst.msk [vmem:[%s5081_s30 + $0xd8] sm:$0xff] %vm565_vm1, %v4011_v11  ;;  %3983 = vst.msk [vmem:[#allocation3 + $0xf8] sm:$0xff] %vm565_vm1, %v3951_v6  ;;  %v4201_v61 = vsel %vm565_vm1, %v4146_v24, 0.0  ;;  %v4149_v33 = vmul.f32 %v4011_v11, %v4011_v11  ;;  %v4102_v57 = vsel %vm565_vm1, %v4011_v11, 0.0  ;;  %v4121_v10 = vld [vmem:[%s6240_s6] sm:$0x1] }
 0x233   : > { %v4097_v3 = vadd.f32 %v4096_v23, %v4095_v19  ;;  %v4200_v51 = vadd.f32 %v4199_v55, %v4198_v34  ;;  %v4009_v14 = vld [vmem:[#allocation3 + $0xc8] sm:$0xff]  ;;  %3981 = vst.msk [vmem:[#allocation3 + $0xe8] sm:$0xff] %vm565_vm1, %v3949_v18 }
 0x234   : > { %4041 = vst.msk [vmem:[%s5081_s30 + $0xc8] sm:$0xff] %vm565_vm1, %v4009_v14  ;;  %v4098_v9 = vsel %vm565_vm1, %v4009_v14, 0.0  ;;  %v4147_v30 = vmul.f32 %v4009_v14, %v4009_v14  ;;  %v4207_v7 = vsel %vm565_vm1, %v4149_v33, 0.0 }
 0x235   : > { %v4202_v29 = vadd.f32 %v4201_v61, %v4200_v51  ;;  %v4099_v31 = vadd.f32 %v4098_v9, %v4097_v3 }
 0x236   : > { %v4203_v53 = vsel %vm565_vm1, %v4147_v30, 0.0 }
 0x237   : > { %v4101_v46 = vadd.f32 %v4100_v27, %v4099_v31  ;;  %v4204_v40 = vadd.f32 %v4203_v53, %v4202_v29  ;;  %v4014_v50 = vld [vmem:[#allocation3 + $0xf0] sm:$0xff] }
 0x238   : > { %4046 = vst.msk [vmem:[%s5081_s30 + $0xf0] sm:$0xff] %vm565_vm1, %v4014_v50  ;;  %v4012_v37 = vld [vmem:[#allocation3 + $0xe0] sm:$0xff]  ;;  %v4152_v36 = vmul.f32 %v4014_v50, %v4014_v50  ;;  %v4108_v0 = vsel %vm565_vm1, %v4014_v50, 0.0 }
 0x239   : > { %v4206_v17 = vadd.f32 %v4205_v60, %v4204_v40  ;;  %4044 = vst.msk [vmem:[%s5081_s30 + $0xe0] sm:$0xff] %vm565_vm1, %v4012_v37  ;;  %v4103_v20 = vadd.f32 %v4102_v57, %v4101_v46  ;;  %v4104_v32 = vsel %vm565_vm1, %v4012_v37, 0.0  ;;  %v4150_v52 = vmul.f32 %v4012_v37, %v4012_v37  ;;  %v4015_v63 = vld [vmem:[#allocation3 + $0xf8] sm:$0xff] }
 0x23a   : > { %4047 = vst.msk [vmem:[%s5081_s30 + $0xf8] sm:$0xff] %vm565_vm1, %v4015_v63  ;;  %v4013_v16 = vld [vmem:[#allocation3 + $0xe8] sm:$0xff]  ;;  %v4153_v2 = vmul.f32 %v4015_v63, %v4015_v63  ;;  %v4213_v1 = vsel %vm565_vm1, %v4152_v36, 0.0  ;;  %v4110_v26 = vsel %vm565_vm1, %v4015_v63, 0.0 }
 0x23b   : > { %v4105_v21 = vadd.f32 %v4104_v32, %v4103_v20  ;;  %v4208_v15 = vadd.f32 %v4207_v7, %v4206_v17  ;;  %v4209_v45 = vsel %vm565_vm1, %v4150_v52, 0.0  ;;  %4045 = vst.msk [vmem:[%s5081_s30 + $0xe8] sm:$0xff] %vm565_vm1, %v4013_v16  ;;  %v4106_v13 = vsel %vm565_vm1, %v4013_v16, 0.0 }
 0x23c   : > { %v4151_v43 = vmul.f32 %v4013_v16, %v4013_v16  ;;  %v4215_v38 = vsel %vm565_vm1, %v4153_v2, 0.0 }
 0x23d   : > { %v4210_v58 = vadd.f32 %v4209_v45, %v4208_v15  ;;  %v4107_v22 = vadd.f32 %v4106_v13, %v4105_v21 }
 0x23e   : > { %v4211_v25 = vsel %vm565_vm1, %v4151_v43, 0.0 }
 0x23f   : > { %v4109_v35 = vadd.f32 %v4108_v0, %v4107_v22  ;;  %v4212_v48 = vadd.f32 %v4211_v25, %v4210_v58 }
 0x241   : > { %v4111_v28 = vadd.f32 %v4110_v26, %v4109_v35  ;;  %v4214_v12 = vadd.f32 %v4213_v1, %v4212_v48 }
 0x243   : > { %v4112_v39 = vrot.slane %v4111_v28, 4  ;;  %v4216_v42 = vadd.f32 %v4215_v38, %v4214_v12 }
 0x245   : > { %v4113_v44 = vadd.f32 %v4112_v39, %v4111_v28  ;;  %v4217_v47 = vrot.slane %v4216_v42, 4 }
 0x247   : > { %v4114_v49 = vrot.slane %v4113_v44, 2  ;;  %v4218_v5 = vadd.f32 %v4217_v47, %v4216_v42 }
 0x249   : > { %v4115_v56 = vadd.f32 %v4114_v49, %v4113_v44  ;;  %v4219_v41 = vrot.slane %v4218_v5, 2 }
 0x24b   : > { %v4116_v59 = vrot.slane %v4115_v56, 1  ;;  %v4220_v8 = vadd.f32 %v4219_v41, %v4218_v5 }
 0x24d   : > { %v4117_v4 = vadd.f32 %v4116_v59, %v4115_v56  ;;  %v4221_v6 = vrot.slane %v4220_v8, 1 }
 0x24f   : > { %v4118_v34 = vadd.f32 %v4117_v4, %v4048_v62  ;;  %v4222_v19 = vadd.f32 %v4221_v6, %v4220_v8 }
 0x251   : > { %4120 = vst.msk [vmem:[%s6239_s5] sm:$0x1] %vm4119_vm4, %v4118_v34  ;;  %v4223_v23 = vadd.f32 %v4222_v19, %v4121_v10 }
 0x253   : > { %4224 = vst.msk [vmem:[%s6240_s6] sm:$0x1] %vm4119_vm4, %v4223_v23 }
 0x254 PF: > { %s17_s21 = sadd.s32 1, %s5026_s21  }
 0x255   : > { %p14_p5 = scmp.ge.s32.totalorder %s17_s21, 4  }
 0x257   :  { %16 = sbr.rel (!%p14_p5) target bundleno = 1 (0x1), region = 96 }

</bundles_post_ra>
